<compile_context>
chip_gen: v7x
topology: tpu7x:2x2x1
jax: 0.10.0
libtpu: 0.0.40
codegen_flags: <defaults>
</compile_context>

<pallas_src>
import functools
import math

import jax
import jax.numpy as jnp
from jax import lax
from jax.experimental import pallas as pl
from jax.experimental.pallas import tpu as pltpu


# ----------------------------- fused Pallas kernel -----------------------------

def _encoder_pooler_kernel(
        emb_ref, bias_ref, emb_g_ref, emb_b_ref,
        wqkv_ref, bqkv_ref, wo_ref, bo_ref, ln1_g_ref, ln1_b_ref,
        w1_ref, b1_ref, w2_ref, b2_ref, ln2_g_ref, ln2_b_ref,
        pool_w_ref, pool_b_ref,
        pooled_ref,
        ctx_sc,
        *, n_layers, B, S, nH, Dh, eps):
    """Embedding-LN -> n_layers post-LN transformer blocks -> tanh pooler on [CLS].

    emb_ref : (B*S, H) f32      bias_ref : (B, S) f32 additive attention bias
    stacked layer weights carry a leading layer dim; matmul weights are bf16.
    pooled_ref : (B, H) f32 output.  ctx_sc : (B*S, H) f32 VMEM scratch.
    """
    H = nH * Dh
    scale = 1.0 / math.sqrt(Dh)

    def layer_norm(x, g, b):                      # f32 in / f32 out
        mu = jnp.mean(x, axis=-1, keepdims=True)
        xc = x - mu
        var = jnp.mean(xc * xc, axis=-1, keepdims=True)
        return xc * lax.rsqrt(var + eps) * g + b

    def gelu(x):
        # TODO(synk): torch/XLM-R default is exact erf-GELU; tanh approximation used
        # for robust in-kernel lowering (numerically very close).
        c = math.sqrt(2.0 / math.pi)
        return 0.5 * x * (1.0 + jnp.tanh(c * (x + 0.044715 * x * x * x)))

    # --- embedding LayerNorm (embedding dropout is identity in eval mode) ---
    h = layer_norm(emb_ref[...], emb_g_ref[...], emb_b_ref[...])          # (N, H) f32

    for l in range(n_layers):
        # --- fused QKV projection: one (H, 3H) matmul on the MXU (bf16 operands) ---
        qkv = (jnp.dot(h.astype(jnp.bfloat16), wqkv_ref[l],
                       preferred_element_type=jnp.float32) + bqkv_ref[l])  # (N, 3H) f32

        # --- self-attention, statically unrolled over (batch, head) slices ---
        for b in range(B):
            bias_b = bias_ref[b:b + 1, :]                                  # (1, S) f32
            r0 = b * S
            for hh in range(nH):
                cq = hh * Dh
                q_bh = qkv[r0:r0 + S, cq:cq + Dh]                          # (S, Dh)
                k_bh = qkv[r0:r0 + S, H + cq:H + cq + Dh]
                v_bh = qkv[r0:r0 + S, 2 * H + cq:2 * H + cq + Dh]
                # q @ k^T without materializing a transpose.
                s = lax.dot_general(
                    q_bh.astype(jnp.bfloat16), k_bh.astype(jnp.bfloat16),
                    (((1,), (1,)), ((), ())),
                    preferred_element_type=jnp.float32) * scale + bias_b   # (S, S) f32
                s = s - jnp.max(s, axis=-1, keepdims=True)
                p = jnp.exp(s)
                p = p * pl.reciprocal(jnp.sum(p, axis=-1, keepdims=True), approx=True)
                ctx_bh = jnp.dot(p.astype(jnp.bfloat16), v_bh.astype(jnp.bfloat16),
                                 preferred_element_type=jnp.float32)       # (S, Dh)
                ctx_sc[r0:r0 + S, cq:cq + Dh] = ctx_bh

        ctx = ctx_sc[...]                                                  # (N, H) f32

        # --- output projection + residual + LayerNorm (fused) ---
        attn = (jnp.dot(ctx.astype(jnp.bfloat16), wo_ref[l],
                        preferred_element_type=jnp.float32) + bo_ref[l])
        h = layer_norm(h + attn, ln1_g_ref[l], ln1_b_ref[l])

        # --- FFN (GELU) + residual + LayerNorm (fused) ---
        ffn = gelu(jnp.dot(h.astype(jnp.bfloat16), w1_ref[l],
                           preferred_element_type=jnp.float32) + b1_ref[l])
        ffn = (jnp.dot(ffn.astype(jnp.bfloat16), w2_ref[l],
                       preferred_element_type=jnp.float32) + b2_ref[l])
        h = layer_norm(h + ffn, ln2_g_ref[l], ln2_b_ref[l])

    # --- pooler: dense + tanh on the [CLS] (first) token of each sequence ---
    for b in range(B):
        cls_b = h[b * S:b * S + 1, :]                                      # (1, H)
        pooled_b = jnp.tanh(
            jnp.dot(cls_b.astype(jnp.bfloat16), pool_w_ref[...],
                    preferred_element_type=jnp.float32) + pool_b_ref[...])
        pooled_ref[b:b + 1, :] = pooled_b.astype(pooled_ref.dtype)


def encoder_pooler(emb, bias, params, cfg):
    """Single fused pallas_call: returns pooled [CLS] output, shape (B, H) f32."""
    N, H = emb.shape
    B, S = bias.shape
    nH = cfg["heads"]
    kernel = functools.partial(
        _encoder_pooler_kernel,
        n_layers=cfg["layers"], B=B, S=S, nH=nH, Dh=H // nH, eps=cfg["ln_eps"])
    args = (emb, bias,
            params["emb_ln_g"], params["emb_ln_b"],
            params["wqkv"], params["bqkv"], params["wo"], params["bo"],
            params["ln1_g"], params["ln1_b"],
            params["w1"], params["b1"], params["w2"], params["b2"],
            params["ln2_g"], params["ln2_b"],
            params["pooler_w"], params["pooler_b"])
    vmem = pl.BlockSpec(memory_space=pltpu.MemorySpace.VMEM)
    return pl.pallas_call(
        kernel,
        out_shape=jax.ShapeDtypeStruct((B, H), jnp.float32),
        in_specs=[vmem] * len(args),
        out_specs=vmem,
        scratch_shapes=[pltpu.VMEM((N, H), jnp.float32)],
    )(*args)


# ----------------------------- model definition -----------------------------

CFG = dict(
    vocab=120,
    hidden=128,        # lane-dense (multiple of 128)
    intermediate=256,  # lane-dense
    layers=2,
    heads=4,           # Dh = 32
    max_pos=32,
    type_vocab=1,
    n_classes=3,
    pad_token_id=1,
    ln_eps=1e-5,
)


def make_params(key, cfg):
    H, I, L = cfg["hidden"], cfg["intermediate"], cfg["layers"]
    keys = iter(jax.random.split(key, 3 + 6 * L + 2))

    def dense(fan_in, fan_out):
        return jax.random.normal(next(keys), (fan_in, fan_out), jnp.float32) * 0.02

    word_emb = dense(cfg["vocab"], H)
    pos_emb = dense(cfg["max_pos"], H)
    type_emb = dense(cfg["type_vocab"], H)

    wqkv, wo, w1, w2 = [], [], [], []
    for _ in range(L):
        wq, wk, wv = dense(H, H), dense(H, H), dense(H, H)
        wqkv.append(jnp.concatenate([wq, wk, wv], axis=1))   # fused (H, 3H)
        wo.append(dense(H, H))
        w1.append(dense(H, I))
        w2.append(dense(I, H))

    return {
        "word_emb": word_emb, "pos_emb": pos_emb, "type_emb": type_emb,
        "emb_ln_g": jnp.ones((1, H), jnp.float32),
        "emb_ln_b": jnp.zeros((1, H), jnp.float32),
        # matmul weights stored bf16 (MXU operands); biases / LN params stay f32.
        "wqkv": jnp.stack(wqkv).astype(jnp.bfloat16),        # (L, H, 3H)
        "bqkv": jnp.zeros((L, 1, 3 * H), jnp.float32),
        "wo": jnp.stack(wo).astype(jnp.bfloat16),            # (L, H, H)
        "bo": jnp.zeros((L, 1, H), jnp.float32),
        "ln1_g": jnp.ones((L, 1, H), jnp.float32),
        "ln1_b": jnp.zeros((L, 1, H), jnp.float32),
        "w1": jnp.stack(w1).astype(jnp.bfloat16),            # (L, H, I)
        "b1": jnp.zeros((L, 1, I), jnp.float32),
        "w2": jnp.stack(w2).astype(jnp.bfloat16),            # (L, I, H)
        "b2": jnp.zeros((L, 1, H), jnp.float32),
        "ln2_g": jnp.ones((L, 1, H), jnp.float32),
        "ln2_b": jnp.zeros((L, 1, H), jnp.float32),
        "pooler_w": dense(H, H).astype(jnp.bfloat16),
        "pooler_b": jnp.zeros((1, H), jnp.float32),
        "out_w": dense(H, cfg["n_classes"]),                 # tiny head stays f32 / plain JAX
        "out_b": jnp.zeros((cfg["n_classes"],), jnp.float32),
    }


def sentiment_classifier_forward(params, input_ids, attention_mask, cfg):
    B, S = input_ids.shape
    H = cfg["hidden"]

    # --- embeddings (gathers are plain-JAX glue) ---
    mask_f = attention_mask.astype(jnp.float32)
    # XLM-R position ids: cumsum of mask (1-based) offset by padding_idx.
    position_ids = (jnp.cumsum(attention_mask, axis=1) * attention_mask
                    + cfg["pad_token_id"]).astype(jnp.int32)
    emb = (jnp.take(params["word_emb"], input_ids, axis=0)
           + jnp.take(params["pos_emb"], position_ids, axis=0)
           + params["type_emb"][0][None, None, :])
    emb = emb.reshape(B * S, H).astype(jnp.float32)

    # additive attention bias: 0 where attended, -1e4 where masked (per batch row)
    bias = (1.0 - mask_f) * -10000.0                         # (B, S)

    # --- single fused Pallas kernel: emb-LN + all encoder layers + tanh pooler ---
    pooled = encoder_pooler(emb, bias, params, cfg)          # (B, H)

    # self.drop = nn.Dropout(p=0.3): identity at inference (eval mode).
    # self.out = nn.Linear(hidden, n_classes): (2,128)@(128,3) — kept in plain JAX
    # (below one MXU pass; a Pallas launch + 3-lane masked store would cost more).
    logits = pooled @ params["out_w"] + params["out_b"]
    return logits                                            # (B, n_classes)


# ----------------------------- main -----------------------------

if __name__ == "__main__":
    key = jax.random.PRNGKey(0)
    k_params, k_ids = jax.random.split(key)

    B, S = 2, 8
    params = make_params(k_params, CFG)

    input_ids = jax.random.randint(k_ids, (B, S), 2, CFG["vocab"], dtype=jnp.int32)
    attention_mask = jnp.ones((B, S), jnp.int32).at[1, S - 2:].set(0)   # pad tail of row 1
    input_ids = jnp.where(attention_mask == 0, CFG["pad_token_id"], input_ids)

    logits = sentiment_classifier_forward(params, input_ids, attention_mask, CFG)
    logits = jax.block_until_ready(logits)

    assert logits.shape == (B, CFG["n_classes"])
    assert bool(jnp.all(jnp.isfinite(logits)))
    print("KERNEL_OK")
</pallas_src>

<mosaic_0001>
module attributes {stable_mosaic.version = 11 : i64} {
  func.func @_encoder_pooler_kernel(%arg0: memref<16x128xf32, #tpu.memory_space<vmem>>, %arg1: memref<2x8xf32, #tpu.memory_space<vmem>>, %arg2: memref<1x128xf32, #tpu.memory_space<vmem>>, %arg3: memref<1x128xf32, #tpu.memory_space<vmem>>, %arg4: memref<2x128x384xbf16, #tpu.memory_space<vmem>>, %arg5: memref<2x1x384xf32, #tpu.memory_space<vmem>>, %arg6: memref<2x128x128xbf16, #tpu.memory_space<vmem>>, %arg7: memref<2x1x128xf32, #tpu.memory_space<vmem>>, %arg8: memref<2x1x128xf32, #tpu.memory_space<vmem>>, %arg9: memref<2x1x128xf32, #tpu.memory_space<vmem>>, %arg10: memref<2x128x256xbf16, #tpu.memory_space<vmem>>, %arg11: memref<2x1x256xf32, #tpu.memory_space<vmem>>, %arg12: memref<2x256x128xbf16, #tpu.memory_space<vmem>>, %arg13: memref<2x1x128xf32, #tpu.memory_space<vmem>>, %arg14: memref<2x1x128xf32, #tpu.memory_space<vmem>>, %arg15: memref<2x1x128xf32, #tpu.memory_space<vmem>>, %arg16: memref<128x128xbf16, #tpu.memory_space<vmem>>, %arg17: memref<1x128xf32, #tpu.memory_space<vmem>>, %arg18: memref<2x128xf32, #tpu.memory_space<vmem>>, %arg19: memref<16x128xf32, #tpu.memory_space<vmem>>) attributes {dimension_semantics = [], scalar_prefetch = 0 : i64, scratch_operands = 1 : i64, tpu.core_type = #tpu.core_type<tc>} {
    %c0 = arith.constant 0 : index
    %c0_0 = arith.constant 0 : index
    %0 = vector.load %arg0[%c0, %c0_0] : memref<16x128xf32, #tpu.memory_space<vmem>>, vector<16x128xf32>
    %c0_1 = arith.constant 0 : index
    %c0_2 = arith.constant 0 : index
    %1 = vector.load %arg2[%c0_1, %c0_2] : memref<1x128xf32, #tpu.memory_space<vmem>>, vector<1x128xf32>
    %c0_3 = arith.constant 0 : index
    %c0_4 = arith.constant 0 : index
    %2 = vector.load %arg3[%c0_3, %c0_4] : memref<1x128xf32, #tpu.memory_space<vmem>>, vector<1x128xf32>
    %cst = arith.constant dense<0.000000e+00> : vector<16xf32>
    %3 = vector.multi_reduction <add>, %0, %cst [1] : vector<16x128xf32> to vector<16xf32>
    %4 = vector.shape_cast %3 : vector<16xf32> to vector<16x1xf32>
    %cst_5 = arith.constant 1.280000e+02 : f32
    %5 = vector.broadcast %cst_5 : f32 to vector<16x1xf32>
    %6 = arith.divf %4, %5 : vector<16x1xf32>
    %7 = vector.broadcast %6 : vector<16x1xf32> to vector<16x128xf32>
    %8 = arith.subf %0, %7 : vector<16x128xf32>
    %9 = arith.mulf %8, %8 : vector<16x128xf32>
    %cst_6 = arith.constant dense<0.000000e+00> : vector<16xf32>
    %10 = vector.multi_reduction <add>, %9, %cst_6 [1] : vector<16x128xf32> to vector<16xf32>
    %11 = vector.shape_cast %10 : vector<16xf32> to vector<16x1xf32>
    %cst_7 = arith.constant 1.280000e+02 : f32
    %12 = vector.broadcast %cst_7 : f32 to vector<16x1xf32>
    %13 = arith.divf %11, %12 : vector<16x1xf32>
    %cst_8 = arith.constant 9.99999974E-6 : f32
    %14 = vector.broadcast %cst_8 : f32 to vector<16x1xf32>
    %15 = arith.addf %13, %14 : vector<16x1xf32>
    %16 = math.rsqrt %15 : vector<16x1xf32>
    %17 = vector.broadcast %16 : vector<16x1xf32> to vector<16x128xf32>
    %18 = arith.mulf %8, %17 : vector<16x128xf32>
    %19 = vector.broadcast %1 : vector<1x128xf32> to vector<16x128xf32>
    %20 = arith.mulf %18, %19 : vector<16x128xf32>
    %21 = vector.broadcast %2 : vector<1x128xf32> to vector<16x128xf32>
    %22 = arith.addf %20, %21 : vector<16x128xf32>
    %23 = arith.truncf %22 : vector<16x128xf32> to vector<16x128xbf16>
    %c0_9 = arith.constant 0 : index
    %c0_10 = arith.constant 0 : index
    %c0_11 = arith.constant 0 : index
    %24 = vector.load %arg4[%c0_9, %c0_10, %c0_11] : memref<2x128x384xbf16, #tpu.memory_space<vmem>>, vector<1x128x384xbf16>
    %25 = vector.shape_cast %24 : vector<1x128x384xbf16> to vector<128x384xbf16>
    %cst_12 = arith.constant dense<0.000000e+00> : vector<16x384xf32>
    %26 = tpu.matmul %23, %25, %cst_12 {dimension_numbers = #tpu.dot_dimension_numbers<[1], [0], [0], [1], [0, 0, 1, 1], [], []>} : vector<16x128xbf16>, vector<128x384xbf16>, vector<16x384xf32> -> vector<16x384xf32>
    %c0_13 = arith.constant 0 : index
    %c0_14 = arith.constant 0 : index
    %c0_15 = arith.constant 0 : index
    %27 = vector.load %arg5[%c0_13, %c0_14, %c0_15] : memref<2x1x384xf32, #tpu.memory_space<vmem>>, vector<1x1x384xf32>
    %28 = vector.shape_cast %27 : vector<1x1x384xf32> to vector<1x384xf32>
    %29 = vector.broadcast %28 : vector<1x384xf32> to vector<16x384xf32>
    %30 = arith.addf %26, %29 : vector<16x384xf32>
    %c0_16 = arith.constant 0 : index
    %c0_17 = arith.constant 0 : index
    %31 = vector.load %arg1[%c0_16, %c0_17] : memref<2x8xf32, #tpu.memory_space<vmem>>, vector<1x8xf32>
    %32 = vector.extract_strided_slice %30 {offsets = [0, 0], sizes = [8, 32], strides = [1, 1]} : vector<16x384xf32> to vector<8x32xf32>
    %33 = vector.extract_strided_slice %30 {offsets = [0, 128], sizes = [8, 32], strides = [1, 1]} : vector<16x384xf32> to vector<8x32xf32>
    %34 = vector.extract_strided_slice %30 {offsets = [0, 256], sizes = [8, 32], strides = [1, 1]} : vector<16x384xf32> to vector<8x32xf32>
    %35 = arith.truncf %32 : vector<8x32xf32> to vector<8x32xbf16>
    %36 = arith.truncf %33 : vector<8x32xf32> to vector<8x32xbf16>
    %cst_18 = arith.constant dense<0.000000e+00> : vector<8x8xf32>
    %37 = tpu.matmul %35, %36, %cst_18 {dimension_numbers = #tpu.dot_dimension_numbers<[1], [1], [0], [0], [0, 0, 1, 0], [], []>} : vector<8x32xbf16>, vector<8x32xbf16>, vector<8x8xf32> -> vector<8x8xf32>
    %cst_19 = arith.constant 0.176776692 : f32
    %38 = vector.broadcast %cst_19 : f32 to vector<8x8xf32>
    %39 = arith.mulf %37, %38 : vector<8x8xf32>
    %40 = vector.broadcast %31 : vector<1x8xf32> to vector<8x8xf32>
    %41 = arith.addf %39, %40 : vector<8x8xf32>
    %cst_20 = arith.constant dense<0xFF800000> : vector<8xf32>
    %42 = vector.multi_reduction <maximumf>, %41, %cst_20 [1] : vector<8x8xf32> to vector<8xf32>
    %43 = vector.shape_cast %42 : vector<8xf32> to vector<8x1xf32>
    %44 = vector.broadcast %43 : vector<8x1xf32> to vector<8x8xf32>
    %45 = arith.subf %41, %44 : vector<8x8xf32>
    %46 = math.exp %45 : vector<8x8xf32>
    %cst_21 = arith.constant dense<0.000000e+00> : vector<8xf32>
    %47 = vector.multi_reduction <add>, %46, %cst_21 [1] : vector<8x8xf32> to vector<8xf32>
    %48 = vector.shape_cast %47 : vector<8xf32> to vector<8x1xf32>
    %49 = tpu.reciprocal %48 {approx = true} : vector<8x1xf32> -> vector<8x1xf32>
    %50 = vector.broadcast %49 : vector<8x1xf32> to vector<8x8xf32>
    %51 = arith.mulf %46, %50 : vector<8x8xf32>
    %52 = arith.truncf %51 : vector<8x8xf32> to vector<8x8xbf16>
    %53 = arith.truncf %34 : vector<8x32xf32> to vector<8x32xbf16>
    %cst_22 = arith.constant dense<0.000000e+00> : vector<8x32xf32>
    %54 = tpu.matmul %52, %53, %cst_22 {dimension_numbers = #tpu.dot_dimension_numbers<[1], [0], [0], [1], [0, 0, 1, 1], [], []>} : vector<8x8xbf16>, vector<8x32xbf16>, vector<8x32xf32> -> vector<8x32xf32>
    %c0_23 = arith.constant 0 : index
    %c0_24 = arith.constant 0 : index
    %55 = vector.load %arg19[%c0_23, %c0_24] : memref<16x128xf32, #tpu.memory_space<vmem>>, vector<8x32xf32>
    tpu.vector_store %arg19[%c0_23, %c0_24], %54 {strides = array<i32>} : memref<16x128xf32, #tpu.memory_space<vmem>>, vector<8x32xf32>,
    %56 = vector.extract_strided_slice %30 {offsets = [0, 32], sizes = [8, 32], strides = [1, 1]} : vector<16x384xf32> to vector<8x32xf32>
    %57 = vector.extract_strided_slice %30 {offsets = [0, 160], sizes = [8, 32], strides = [1, 1]} : vector<16x384xf32> to vector<8x32xf32>
    %58 = vector.extract_strided_slice %30 {offsets = [0, 288], sizes = [8, 32], strides = [1, 1]} : vector<16x384xf32> to vector<8x32xf32>
    %59 = arith.truncf %56 : vector<8x32xf32> to vector<8x32xbf16>
    %60 = arith.truncf %57 : vector<8x32xf32> to vector<8x32xbf16>
    %cst_25 = arith.constant dense<0.000000e+00> : vector<8x8xf32>
    %61 = tpu.matmul %59, %60, %cst_25 {dimension_numbers = #tpu.dot_dimension_numbers<[1], [1], [0], [0], [0, 0, 1, 0], [], []>} : vector<8x32xbf16>, vector<8x32xbf16>, vector<8x8xf32> -> vector<8x8xf32>
    %cst_26 = arith.constant 0.176776692 : f32
    %62 = vector.broadcast %cst_26 : f32 to vector<8x8xf32>
    %63 = arith.mulf %61, %62 : vector<8x8xf32>
    %64 = vector.broadcast %31 : vector<1x8xf32> to vector<8x8xf32>
    %65 = arith.addf %63, %64 : vector<8x8xf32>
    %cst_27 = arith.constant dense<0xFF800000> : vector<8xf32>
    %66 = vector.multi_reduction <maximumf>, %65, %cst_27 [1] : vector<8x8xf32> to vector<8xf32>
    %67 = vector.shape_cast %66 : vector<8xf32> to vector<8x1xf32>
    %68 = vector.broadcast %67 : vector<8x1xf32> to vector<8x8xf32>
    %69 = arith.subf %65, %68 : vector<8x8xf32>
    %70 = math.exp %69 : vector<8x8xf32>
    %cst_28 = arith.constant dense<0.000000e+00> : vector<8xf32>
    %71 = vector.multi_reduction <add>, %70, %cst_28 [1] : vector<8x8xf32> to vector<8xf32>
    %72 = vector.shape_cast %71 : vector<8xf32> to vector<8x1xf32>
    %73 = tpu.reciprocal %72 {approx = true} : vector<8x1xf32> -> vector<8x1xf32>
    %74 = vector.broadcast %73 : vector<8x1xf32> to vector<8x8xf32>
    %75 = arith.mulf %70, %74 : vector<8x8xf32>
    %76 = arith.truncf %75 : vector<8x8xf32> to vector<8x8xbf16>
    %77 = arith.truncf %58 : vector<8x32xf32> to vector<8x32xbf16>
    %cst_29 = arith.constant dense<0.000000e+00> : vector<8x32xf32>
    %78 = tpu.matmul %76, %77, %cst_29 {dimension_numbers = #tpu.dot_dimension_numbers<[1], [0], [0], [1], [0, 0, 1, 1], [], []>} : vector<8x8xbf16>, vector<8x32xbf16>, vector<8x32xf32> -> vector<8x32xf32>
    %c0_30 = arith.constant 0 : index
    %c32 = arith.constant 32 : index
    %79 = vector.load %arg19[%c0_30, %c32] : memref<16x128xf32, #tpu.memory_space<vmem>>, vector<8x32xf32>
    tpu.vector_store %arg19[%c0_30, %c32], %78 {strides = array<i32>} : memref<16x128xf32, #tpu.memory_space<vmem>>, vector<8x32xf32>,
    %80 = vector.extract_strided_slice %30 {offsets = [0, 64], sizes = [8, 32], strides = [1, 1]} : vector<16x384xf32> to vector<8x32xf32>
    %81 = vector.extract_strided_slice %30 {offsets = [0, 192], sizes = [8, 32], strides = [1, 1]} : vector<16x384xf32> to vector<8x32xf32>
    %82 = vector.extract_strided_slice %30 {offsets = [0, 320], sizes = [8, 32], strides = [1, 1]} : vector<16x384xf32> to vector<8x32xf32>
    %83 = arith.truncf %80 : vector<8x32xf32> to vector<8x32xbf16>
    %84 = arith.truncf %81 : vector<8x32xf32> to vector<8x32xbf16>
    %cst_31 = arith.constant dense<0.000000e+00> : vector<8x8xf32>
    %85 = tpu.matmul %83, %84, %cst_31 {dimension_numbers = #tpu.dot_dimension_numbers<[1], [1], [0], [0], [0, 0, 1, 0], [], []>} : vector<8x32xbf16>, vector<8x32xbf16>, vector<8x8xf32> -> vector<8x8xf32>
    %cst_32 = arith.constant 0.176776692 : f32
    %86 = vector.broadcast %cst_32 : f32 to vector<8x8xf32>
    %87 = arith.mulf %85, %86 : vector<8x8xf32>
    %88 = vector.broadcast %31 : vector<1x8xf32> to vector<8x8xf32>
    %89 = arith.addf %87, %88 : vector<8x8xf32>
    %cst_33 = arith.constant dense<0xFF800000> : vector<8xf32>
    %90 = vector.multi_reduction <maximumf>, %89, %cst_33 [1] : vector<8x8xf32> to vector<8xf32>
    %91 = vector.shape_cast %90 : vector<8xf32> to vector<8x1xf32>
    %92 = vector.broadcast %91 : vector<8x1xf32> to vector<8x8xf32>
    %93 = arith.subf %89, %92 : vector<8x8xf32>
    %94 = math.exp %93 : vector<8x8xf32>
    %cst_34 = arith.constant dense<0.000000e+00> : vector<8xf32>
    %95 = vector.multi_reduction <add>, %94, %cst_34 [1] : vector<8x8xf32> to vector<8xf32>
    %96 = vector.shape_cast %95 : vector<8xf32> to vector<8x1xf32>
    %97 = tpu.reciprocal %96 {approx = true} : vector<8x1xf32> -> vector<8x1xf32>
    %98 = vector.broadcast %97 : vector<8x1xf32> to vector<8x8xf32>
    %99 = arith.mulf %94, %98 : vector<8x8xf32>
    %100 = arith.truncf %99 : vector<8x8xf32> to vector<8x8xbf16>
    %101 = arith.truncf %82 : vector<8x32xf32> to vector<8x32xbf16>
    %cst_35 = arith.constant dense<0.000000e+00> : vector<8x32xf32>
    %102 = tpu.matmul %100, %101, %cst_35 {dimension_numbers = #tpu.dot_dimension_numbers<[1], [0], [0], [1], [0, 0, 1, 1], [], []>} : vector<8x8xbf16>, vector<8x32xbf16>, vector<8x32xf32> -> vector<8x32xf32>
    %c0_36 = arith.constant 0 : index
    %c64 = arith.constant 64 : index
    %103 = vector.load %arg19[%c0_36, %c64] : memref<16x128xf32, #tpu.memory_space<vmem>>, vector<8x32xf32>
    tpu.vector_store %arg19[%c0_36, %c64], %102 {strides = array<i32>} : memref<16x128xf32, #tpu.memory_space<vmem>>, vector<8x32xf32>,
    %104 = vector.extract_strided_slice %30 {offsets = [0, 96], sizes = [8, 32], strides = [1, 1]} : vector<16x384xf32> to vector<8x32xf32>
    %105 = vector.extract_strided_slice %30 {offsets = [0, 224], sizes = [8, 32], strides = [1, 1]} : vector<16x384xf32> to vector<8x32xf32>
    %106 = vector.extract_strided_slice %30 {offsets = [0, 352], sizes = [8, 32], strides = [1, 1]} : vector<16x384xf32> to vector<8x32xf32>
    %107 = arith.truncf %104 : vector<8x32xf32> to vector<8x32xbf16>
    %108 = arith.truncf %105 : vector<8x32xf32> to vector<8x32xbf16>
    %cst_37 = arith.constant dense<0.000000e+00> : vector<8x8xf32>
    %109 = tpu.matmul %107, %108, %cst_37 {dimension_numbers = #tpu.dot_dimension_numbers<[1], [1], [0], [0], [0, 0, 1, 0], [], []>} : vector<8x32xbf16>, vector<8x32xbf16>, vector<8x8xf32> -> vector<8x8xf32>
    %cst_38 = arith.constant 0.176776692 : f32
    %110 = vector.broadcast %cst_38 : f32 to vector<8x8xf32>
    %111 = arith.mulf %109, %110 : vector<8x8xf32>
    %112 = vector.broadcast %31 : vector<1x8xf32> to vector<8x8xf32>
    %113 = arith.addf %111, %112 : vector<8x8xf32>
    %cst_39 = arith.constant dense<0xFF800000> : vector<8xf32>
    %114 = vector.multi_reduction <maximumf>, %113, %cst_39 [1] : vector<8x8xf32> to vector<8xf32>
    %115 = vector.shape_cast %114 : vector<8xf32> to vector<8x1xf32>
    %116 = vector.broadcast %115 : vector<8x1xf32> to vector<8x8xf32>
    %117 = arith.subf %113, %116 : vector<8x8xf32>
    %118 = math.exp %117 : vector<8x8xf32>
    %cst_40 = arith.constant dense<0.000000e+00> : vector<8xf32>
    %119 = vector.multi_reduction <add>, %118, %cst_40 [1] : vector<8x8xf32> to vector<8xf32>
    %120 = vector.shape_cast %119 : vector<8xf32> to vector<8x1xf32>
    %121 = tpu.reciprocal %120 {approx = true} : vector<8x1xf32> -> vector<8x1xf32>
    %122 = vector.broadcast %121 : vector<8x1xf32> to vector<8x8xf32>
    %123 = arith.mulf %118, %122 : vector<8x8xf32>
    %124 = arith.truncf %123 : vector<8x8xf32> to vector<8x8xbf16>
    %125 = arith.truncf %106 : vector<8x32xf32> to vector<8x32xbf16>
    %cst_41 = arith.constant dense<0.000000e+00> : vector<8x32xf32>
    %126 = tpu.matmul %124, %125, %cst_41 {dimension_numbers = #tpu.dot_dimension_numbers<[1], [0], [0], [1], [0, 0, 1, 1], [], []>} : vector<8x8xbf16>, vector<8x32xbf16>, vector<8x32xf32> -> vector<8x32xf32>
    %c0_42 = arith.constant 0 : index
    %c96 = arith.constant 96 : index
    %127 = vector.load %arg19[%c0_42, %c96] : memref<16x128xf32, #tpu.memory_space<vmem>>, vector<8x32xf32>
    tpu.vector_store %arg19[%c0_42, %c96], %126 {strides = array<i32>} : memref<16x128xf32, #tpu.memory_space<vmem>>, vector<8x32xf32>,
    %c1 = arith.constant 1 : index
    %c0_43 = arith.constant 0 : index
    %128 = vector.load %arg1[%c1, %c0_43] : memref<2x8xf32, #tpu.memory_space<vmem>>, vector<1x8xf32>
    %129 = vector.extract_strided_slice %30 {offsets = [8, 0], sizes = [8, 32], strides = [1, 1]} : vector<16x384xf32> to vector<8x32xf32>
    %130 = vector.extract_strided_slice %30 {offsets = [8, 128], sizes = [8, 32], strides = [1, 1]} : vector<16x384xf32> to vector<8x32xf32>
    %131 = vector.extract_strided_slice %30 {offsets = [8, 256], sizes = [8, 32], strides = [1, 1]} : vector<16x384xf32> to vector<8x32xf32>
    %132 = arith.truncf %129 : vector<8x32xf32> to vector<8x32xbf16>
    %133 = arith.truncf %130 : vector<8x32xf32> to vector<8x32xbf16>
    %cst_44 = arith.constant dense<0.000000e+00> : vector<8x8xf32>
    %134 = tpu.matmul %132, %133, %cst_44 {dimension_numbers = #tpu.dot_dimension_numbers<[1], [1], [0], [0], [0, 0, 1, 0], [], []>} : vector<8x32xbf16>, vector<8x32xbf16>, vector<8x8xf32> -> vector<8x8xf32>
    %cst_45 = arith.constant 0.176776692 : f32
    %135 = vector.broadcast %cst_45 : f32 to vector<8x8xf32>
    %136 = arith.mulf %134, %135 : vector<8x8xf32>
    %137 = vector.broadcast %128 : vector<1x8xf32> to vector<8x8xf32>
    %138 = arith.addf %136, %137 : vector<8x8xf32>
    %cst_46 = arith.constant dense<0xFF800000> : vector<8xf32>
    %139 = vector.multi_reduction <maximumf>, %138, %cst_46 [1] : vector<8x8xf32> to vector<8xf32>
    %140 = vector.shape_cast %139 : vector<8xf32> to vector<8x1xf32>
    %141 = vector.broadcast %140 : vector<8x1xf32> to vector<8x8xf32>
    %142 = arith.subf %138, %141 : vector<8x8xf32>
    %143 = math.exp %142 : vector<8x8xf32>
    %cst_47 = arith.constant dense<0.000000e+00> : vector<8xf32>
    %144 = vector.multi_reduction <add>, %143, %cst_47 [1] : vector<8x8xf32> to vector<8xf32>
    %145 = vector.shape_cast %144 : vector<8xf32> to vector<8x1xf32>
    %146 = tpu.reciprocal %145 {approx = true} : vector<8x1xf32> -> vector<8x1xf32>
    %147 = vector.broadcast %146 : vector<8x1xf32> to vector<8x8xf32>
    %148 = arith.mulf %143, %147 : vector<8x8xf32>
    %149 = arith.truncf %148 : vector<8x8xf32> to vector<8x8xbf16>
    %150 = arith.truncf %131 : vector<8x32xf32> to vector<8x32xbf16>
    %cst_48 = arith.constant dense<0.000000e+00> : vector<8x32xf32>
    %151 = tpu.matmul %149, %150, %cst_48 {dimension_numbers = #tpu.dot_dimension_numbers<[1], [0], [0], [1], [0, 0, 1, 1], [], []>} : vector<8x8xbf16>, vector<8x32xbf16>, vector<8x32xf32> -> vector<8x32xf32>
    %c8 = arith.constant 8 : index
    %c0_49 = arith.constant 0 : index
    %152 = vector.load %arg19[%c8, %c0_49] : memref<16x128xf32, #tpu.memory_space<vmem>>, vector<8x32xf32>
    tpu.vector_store %arg19[%c8, %c0_49], %151 {strides = array<i32>} : memref<16x128xf32, #tpu.memory_space<vmem>>, vector<8x32xf32>,
    %153 = vector.extract_strided_slice %30 {offsets = [8, 32], sizes = [8, 32], strides = [1, 1]} : vector<16x384xf32> to vector<8x32xf32>
    %154 = vector.extract_strided_slice %30 {offsets = [8, 160], sizes = [8, 32], strides = [1, 1]} : vector<16x384xf32> to vector<8x32xf32>
    %155 = vector.extract_strided_slice %30 {offsets = [8, 288], sizes = [8, 32], strides = [1, 1]} : vector<16x384xf32> to vector<8x32xf32>
    %156 = arith.truncf %153 : vector<8x32xf32> to vector<8x32xbf16>
    %157 = arith.truncf %154 : vector<8x32xf32> to vector<8x32xbf16>
    %cst_50 = arith.constant dense<0.000000e+00> : vector<8x8xf32>
    %158 = tpu.matmul %156, %157, %cst_50 {dimension_numbers = #tpu.dot_dimension_numbers<[1], [1], [0], [0], [0, 0, 1, 0], [], []>} : vector<8x32xbf16>, vector<8x32xbf16>, vector<8x8xf32> -> vector<8x8xf32>
    %cst_51 = arith.constant 0.176776692 : f32
    %159 = vector.broadcast %cst_51 : f32 to vector<8x8xf32>
    %160 = arith.mulf %158, %159 : vector<8x8xf32>
    %161 = vector.broadcast %128 : vector<1x8xf32> to vector<8x8xf32>
    %162 = arith.addf %160, %161 : vector<8x8xf32>
    %cst_52 = arith.constant dense<0xFF800000> : vector<8xf32>
    %163 = vector.multi_reduction <maximumf>, %162, %cst_52 [1] : vector<8x8xf32> to vector<8xf32>
    %164 = vector.shape_cast %163 : vector<8xf32> to vector<8x1xf32>
    %165 = vector.broadcast %164 : vector<8x1xf32> to vector<8x8xf32>
    %166 = arith.subf %162, %165 : vector<8x8xf32>
    %167 = math.exp %166 : vector<8x8xf32>
    %cst_53 = arith.constant dense<0.000000e+00> : vector<8xf32>
    %168 = vector.multi_reduction <add>, %167, %cst_53 [1] : vector<8x8xf32> to vector<8xf32>
    %169 = vector.shape_cast %168 : vector<8xf32> to vector<8x1xf32>
    %170 = tpu.reciprocal %169 {approx = true} : vector<8x1xf32> -> vector<8x1xf32>
    %171 = vector.broadcast %170 : vector<8x1xf32> to vector<8x8xf32>
    %172 = arith.mulf %167, %171 : vector<8x8xf32>
    %173 = arith.truncf %172 : vector<8x8xf32> to vector<8x8xbf16>
    %174 = arith.truncf %155 : vector<8x32xf32> to vector<8x32xbf16>
    %cst_54 = arith.constant dense<0.000000e+00> : vector<8x32xf32>
    %175 = tpu.matmul %173, %174, %cst_54 {dimension_numbers = #tpu.dot_dimension_numbers<[1], [0], [0], [1], [0, 0, 1, 1], [], []>} : vector<8x8xbf16>, vector<8x32xbf16>, vector<8x32xf32> -> vector<8x32xf32>
    %c8_55 = arith.constant 8 : index
    %c32_56 = arith.constant 32 : index
    %176 = vector.load %arg19[%c8_55, %c32_56] : memref<16x128xf32, #tpu.memory_space<vmem>>, vector<8x32xf32>
    tpu.vector_store %arg19[%c8_55, %c32_56], %175 {strides = array<i32>} : memref<16x128xf32, #tpu.memory_space<vmem>>, vector<8x32xf32>,
    %177 = vector.extract_strided_slice %30 {offsets = [8, 64], sizes = [8, 32], strides = [1, 1]} : vector<16x384xf32> to vector<8x32xf32>
    %178 = vector.extract_strided_slice %30 {offsets = [8, 192], sizes = [8, 32], strides = [1, 1]} : vector<16x384xf32> to vector<8x32xf32>
    %179 = vector.extract_strided_slice %30 {offsets = [8, 320], sizes = [8, 32], strides = [1, 1]} : vector<16x384xf32> to vector<8x32xf32>
    %180 = arith.truncf %177 : vector<8x32xf32> to vector<8x32xbf16>
    %181 = arith.truncf %178 : vector<8x32xf32> to vector<8x32xbf16>
    %cst_57 = arith.constant dense<0.000000e+00> : vector<8x8xf32>
    %182 = tpu.matmul %180, %181, %cst_57 {dimension_numbers = #tpu.dot_dimension_numbers<[1], [1], [0], [0], [0, 0, 1, 0], [], []>} : vector<8x32xbf16>, vector<8x32xbf16>, vector<8x8xf32> -> vector<8x8xf32>
    %cst_58 = arith.constant 0.176776692 : f32
    %183 = vector.broadcast %cst_58 : f32 to vector<8x8xf32>
    %184 = arith.mulf %182, %183 : vector<8x8xf32>
    %185 = vector.broadcast %128 : vector<1x8xf32> to vector<8x8xf32>
    %186 = arith.addf %184, %185 : vector<8x8xf32>
    %cst_59 = arith.constant dense<0xFF800000> : vector<8xf32>
    %187 = vector.multi_reduction <maximumf>, %186, %cst_59 [1] : vector<8x8xf32> to vector<8xf32>
    %188 = vector.shape_cast %187 : vector<8xf32> to vector<8x1xf32>
    %189 = vector.broadcast %188 : vector<8x1xf32> to vector<8x8xf32>
    %190 = arith.subf %186, %189 : vector<8x8xf32>
    %191 = math.exp %190 : vector<8x8xf32>
    %cst_60 = arith.constant dense<0.000000e+00> : vector<8xf32>
    %192 = vector.multi_reduction <add>, %191, %cst_60 [1] : vector<8x8xf32> to vector<8xf32>
    %193 = vector.shape_cast %192 : vector<8xf32> to vector<8x1xf32>
    %194 = tpu.reciprocal %193 {approx = true} : vector<8x1xf32> -> vector<8x1xf32>
    %195 = vector.broadcast %194 : vector<8x1xf32> to vector<8x8xf32>
    %196 = arith.mulf %191, %195 : vector<8x8xf32>
    %197 = arith.truncf %196 : vector<8x8xf32> to vector<8x8xbf16>
    %198 = arith.truncf %179 : vector<8x32xf32> to vector<8x32xbf16>
    %cst_61 = arith.constant dense<0.000000e+00> : vector<8x32xf32>
    %199 = tpu.matmul %197, %198, %cst_61 {dimension_numbers = #tpu.dot_dimension_numbers<[1], [0], [0], [1], [0, 0, 1, 1], [], []>} : vector<8x8xbf16>, vector<8x32xbf16>, vector<8x32xf32> -> vector<8x32xf32>
    %c8_62 = arith.constant 8 : index
    %c64_63 = arith.constant 64 : index
    %200 = vector.load %arg19[%c8_62, %c64_63] : memref<16x128xf32, #tpu.memory_space<vmem>>, vector<8x32xf32>
    tpu.vector_store %arg19[%c8_62, %c64_63], %199 {strides = array<i32>} : memref<16x128xf32, #tpu.memory_space<vmem>>, vector<8x32xf32>,
    %201 = vector.extract_strided_slice %30 {offsets = [8, 96], sizes = [8, 32], strides = [1, 1]} : vector<16x384xf32> to vector<8x32xf32>
    %202 = vector.extract_strided_slice %30 {offsets = [8, 224], sizes = [8, 32], strides = [1, 1]} : vector<16x384xf32> to vector<8x32xf32>
    %203 = vector.extract_strided_slice %30 {offsets = [8, 352], sizes = [8, 32], strides = [1, 1]} : vector<16x384xf32> to vector<8x32xf32>
    %204 = arith.truncf %201 : vector<8x32xf32> to vector<8x32xbf16>
    %205 = arith.truncf %202 : vector<8x32xf32> to vector<8x32xbf16>
    %cst_64 = arith.constant dense<0.000000e+00> : vector<8x8xf32>
    %206 = tpu.matmul %204, %205, %cst_64 {dimension_numbers = #tpu.dot_dimension_numbers<[1], [1], [0], [0], [0, 0, 1, 0], [], []>} : vector<8x32xbf16>, vector<8x32xbf16>, vector<8x8xf32> -> vector<8x8xf32>
    %cst_65 = arith.constant 0.176776692 : f32
    %207 = vector.broadcast %cst_65 : f32 to vector<8x8xf32>
    %208 = arith.mulf %206, %207 : vector<8x8xf32>
    %209 = vector.broadcast %128 : vector<1x8xf32> to vector<8x8xf32>
    %210 = arith.addf %208, %209 : vector<8x8xf32>
    %cst_66 = arith.constant dense<0xFF800000> : vector<8xf32>
    %211 = vector.multi_reduction <maximumf>, %210, %cst_66 [1] : vector<8x8xf32> to vector<8xf32>
    %212 = vector.shape_cast %211 : vector<8xf32> to vector<8x1xf32>
    %213 = vector.broadcast %212 : vector<8x1xf32> to vector<8x8xf32>
    %214 = arith.subf %210, %213 : vector<8x8xf32>
    %215 = math.exp %214 : vector<8x8xf32>
    %cst_67 = arith.constant dense<0.000000e+00> : vector<8xf32>
    %216 = vector.multi_reduction <add>, %215, %cst_67 [1] : vector<8x8xf32> to vector<8xf32>
    %217 = vector.shape_cast %216 : vector<8xf32> to vector<8x1xf32>
    %218 = tpu.reciprocal %217 {approx = true} : vector<8x1xf32> -> vector<8x1xf32>
    %219 = vector.broadcast %218 : vector<8x1xf32> to vector<8x8xf32>
    %220 = arith.mulf %215, %219 : vector<8x8xf32>
    %221 = arith.truncf %220 : vector<8x8xf32> to vector<8x8xbf16>
    %222 = arith.truncf %203 : vector<8x32xf32> to vector<8x32xbf16>
    %cst_68 = arith.constant dense<0.000000e+00> : vector<8x32xf32>
    %223 = tpu.matmul %221, %222, %cst_68 {dimension_numbers = #tpu.dot_dimension_numbers<[1], [0], [0], [1], [0, 0, 1, 1], [], []>} : vector<8x8xbf16>, vector<8x32xbf16>, vector<8x32xf32> -> vector<8x32xf32>
    %c8_69 = arith.constant 8 : index
    %c96_70 = arith.constant 96 : index
    %224 = vector.load %arg19[%c8_69, %c96_70] : memref<16x128xf32, #tpu.memory_space<vmem>>, vector<8x32xf32>
    tpu.vector_store %arg19[%c8_69, %c96_70], %223 {strides = array<i32>} : memref<16x128xf32, #tpu.memory_space<vmem>>, vector<8x32xf32>,
    %c0_71 = arith.constant 0 : index
    %c0_72 = arith.constant 0 : index
    %225 = vector.load %arg19[%c0_71, %c0_72] : memref<16x128xf32, #tpu.memory_space<vmem>>, vector<16x128xf32>
    %226 = arith.truncf %225 : vector<16x128xf32> to vector<16x128xbf16>
    %c0_73 = arith.constant 0 : index
    %c0_74 = arith.constant 0 : index
    %c0_75 = arith.constant 0 : index
    %227 = vector.load %arg6[%c0_73, %c0_74, %c0_75] : memref<2x128x128xbf16, #tpu.memory_space<vmem>>, vector<1x128x128xbf16>
    %228 = vector.shape_cast %227 : vector<1x128x128xbf16> to vector<128x128xbf16>
    %cst_76 = arith.constant dense<0.000000e+00> : vector<16x128xf32>
    %229 = tpu.matmul %226, %228, %cst_76 {dimension_numbers = #tpu.dot_dimension_numbers<[1], [0], [0], [1], [0, 0, 1, 1], [], []>} : vector<16x128xbf16>, vector<128x128xbf16>, vector<16x128xf32> -> vector<16x128xf32>
    %c0_77 = arith.constant 0 : index
    %c0_78 = arith.constant 0 : index
    %c0_79 = arith.constant 0 : index
    %230 = vector.load %arg7[%c0_77, %c0_78, %c0_79] : memref<2x1x128xf32, #tpu.memory_space<vmem>>, vector<1x1x128xf32>
    %231 = vector.shape_cast %230 : vector<1x1x128xf32> to vector<1x128xf32>
    %232 = vector.broadcast %231 : vector<1x128xf32> to vector<16x128xf32>
    %233 = arith.addf %229, %232 : vector<16x128xf32>
    %234 = arith.addf %22, %233 : vector<16x128xf32>
    %c0_80 = arith.constant 0 : index
    %c0_81 = arith.constant 0 : index
    %c0_82 = arith.constant 0 : index
    %235 = vector.load %arg8[%c0_80, %c0_81, %c0_82] : memref<2x1x128xf32, #tpu.memory_space<vmem>>, vector<1x1x128xf32>
    %236 = vector.shape_cast %235 : vector<1x1x128xf32> to vector<1x128xf32>
    %c0_83 = arith.constant 0 : index
    %c0_84 = arith.constant 0 : index
    %c0_85 = arith.constant 0 : index
    %237 = vector.load %arg9[%c0_83, %c0_84, %c0_85] : memref<2x1x128xf32, #tpu.memory_space<vmem>>, vector<1x1x128xf32>
    %238 = vector.shape_cast %237 : vector<1x1x128xf32> to vector<1x128xf32>
    %cst_86 = arith.constant dense<0.000000e+00> : vector<16xf32>
    %239 = vector.multi_reduction <add>, %234, %cst_86 [1] : vector<16x128xf32> to vector<16xf32>
    %240 = vector.shape_cast %239 : vector<16xf32> to vector<16x1xf32>
    %cst_87 = arith.constant 1.280000e+02 : f32
    %241 = vector.broadcast %cst_87 : f32 to vector<16x1xf32>
    %242 = arith.divf %240, %241 : vector<16x1xf32>
    %243 = vector.broadcast %242 : vector<16x1xf32> to vector<16x128xf32>
    %244 = arith.subf %234, %243 : vector<16x128xf32>
    %245 = arith.mulf %244, %244 : vector<16x128xf32>
    %cst_88 = arith.constant dense<0.000000e+00> : vector<16xf32>
    %246 = vector.multi_reduction <add>, %245, %cst_88 [1] : vector<16x128xf32> to vector<16xf32>
    %247 = vector.shape_cast %246 : vector<16xf32> to vector<16x1xf32>
    %cst_89 = arith.constant 1.280000e+02 : f32
    %248 = vector.broadcast %cst_89 : f32 to vector<16x1xf32>
    %249 = arith.divf %247, %248 : vector<16x1xf32>
    %cst_90 = arith.constant 9.99999974E-6 : f32
    %250 = vector.broadcast %cst_90 : f32 to vector<16x1xf32>
    %251 = arith.addf %249, %250 : vector<16x1xf32>
    %252 = math.rsqrt %251 : vector<16x1xf32>
    %253 = vector.broadcast %252 : vector<16x1xf32> to vector<16x128xf32>
    %254 = arith.mulf %244, %253 : vector<16x128xf32>
    %255 = vector.broadcast %236 : vector<1x128xf32> to vector<16x128xf32>
    %256 = arith.mulf %254, %255 : vector<16x128xf32>
    %257 = vector.broadcast %238 : vector<1x128xf32> to vector<16x128xf32>
    %258 = arith.addf %256, %257 : vector<16x128xf32>
    %259 = arith.truncf %258 : vector<16x128xf32> to vector<16x128xbf16>
    %c0_91 = arith.constant 0 : index
    %c0_92 = arith.constant 0 : index
    %c0_93 = arith.constant 0 : index
    %260 = vector.load %arg10[%c0_91, %c0_92, %c0_93] : memref<2x128x256xbf16, #tpu.memory_space<vmem>>, vector<1x128x256xbf16>
    %261 = vector.shape_cast %260 : vector<1x128x256xbf16> to vector<128x256xbf16>
    %cst_94 = arith.constant dense<0.000000e+00> : vector<16x256xf32>
    %262 = tpu.matmul %259, %261, %cst_94 {dimension_numbers = #tpu.dot_dimension_numbers<[1], [0], [0], [1], [0, 0, 1, 1], [], []>} : vector<16x128xbf16>, vector<128x256xbf16>, vector<16x256xf32> -> vector<16x256xf32>
    %c0_95 = arith.constant 0 : index
    %c0_96 = arith.constant 0 : index
    %c0_97 = arith.constant 0 : index
    %263 = vector.load %arg11[%c0_95, %c0_96, %c0_97] : memref<2x1x256xf32, #tpu.memory_space<vmem>>, vector<1x1x256xf32>
    %264 = vector.shape_cast %263 : vector<1x1x256xf32> to vector<1x256xf32>
    %265 = vector.broadcast %264 : vector<1x256xf32> to vector<16x256xf32>
    %266 = arith.addf %262, %265 : vector<16x256xf32>
    %cst_98 = arith.constant 5.000000e-01 : f32
    %267 = vector.broadcast %cst_98 : f32 to vector<16x256xf32>
    %268 = arith.mulf %267, %266 : vector<16x256xf32>
    %cst_99 = arith.constant 4.471500e-02 : f32
    %269 = vector.broadcast %cst_99 : f32 to vector<16x256xf32>
    %270 = arith.mulf %269, %266 : vector<16x256xf32>
    %271 = arith.mulf %270, %266 : vector<16x256xf32>
    %272 = arith.mulf %271, %266 : vector<16x256xf32>
    %273 = arith.addf %266, %272 : vector<16x256xf32>
    %cst_100 = arith.constant 0.797884583 : f32
    %274 = vector.broadcast %cst_100 : f32 to vector<16x256xf32>
    %275 = arith.mulf %274, %273 : vector<16x256xf32>
    %276 = math.tanh %275 : vector<16x256xf32>
    %cst_101 = arith.constant 1.000000e+00 : f32
    %277 = vector.broadcast %cst_101 : f32 to vector<16x256xf32>
    %278 = arith.addf %277, %276 : vector<16x256xf32>
    %279 = arith.mulf %268, %278 : vector<16x256xf32>
    %280 = arith.truncf %279 : vector<16x256xf32> to vector<16x256xbf16>
    %c0_102 = arith.constant 0 : index
    %c0_103 = arith.constant 0 : index
    %c0_104 = arith.constant 0 : index
    %281 = vector.load %arg12[%c0_102, %c0_103, %c0_104] : memref<2x256x128xbf16, #tpu.memory_space<vmem>>, vector<1x256x128xbf16>
    %282 = vector.shape_cast %281 : vector<1x256x128xbf16> to vector<256x128xbf16>
    %cst_105 = arith.constant dense<0.000000e+00> : vector<16x128xf32>
    %283 = tpu.matmul %280, %282, %cst_105 {dimension_numbers = #tpu.dot_dimension_numbers<[1], [0], [0], [1], [0, 0, 1, 1], [], []>} : vector<16x256xbf16>, vector<256x128xbf16>, vector<16x128xf32> -> vector<16x128xf32>
    %c0_106 = arith.constant 0 : index
    %c0_107 = arith.constant 0 : index
    %c0_108 = arith.constant 0 : index
    %284 = vector.load %arg13[%c0_106, %c0_107, %c0_108] : memref<2x1x128xf32, #tpu.memory_space<vmem>>, vector<1x1x128xf32>
    %285 = vector.shape_cast %284 : vector<1x1x128xf32> to vector<1x128xf32>
    %286 = vector.broadcast %285 : vector<1x128xf32> to vector<16x128xf32>
    %287 = arith.addf %283, %286 : vector<16x128xf32>
    %288 = arith.addf %258, %287 : vector<16x128xf32>
    %c0_109 = arith.constant 0 : index
    %c0_110 = arith.constant 0 : index
    %c0_111 = arith.constant 0 : index
    %289 = vector.load %arg14[%c0_109, %c0_110, %c0_111] : memref<2x1x128xf32, #tpu.memory_space<vmem>>, vector<1x1x128xf32>
    %290 = vector.shape_cast %289 : vector<1x1x128xf32> to vector<1x128xf32>
    %c0_112 = arith.constant 0 : index
    %c0_113 = arith.constant 0 : index
    %c0_114 = arith.constant 0 : index
    %291 = vector.load %arg15[%c0_112, %c0_113, %c0_114] : memref<2x1x128xf32, #tpu.memory_space<vmem>>, vector<1x1x128xf32>
    %292 = vector.shape_cast %291 : vector<1x1x128xf32> to vector<1x128xf32>
    %cst_115 = arith.constant dense<0.000000e+00> : vector<16xf32>
    %293 = vector.multi_reduction <add>, %288, %cst_115 [1] : vector<16x128xf32> to vector<16xf32>
    %294 = vector.shape_cast %293 : vector<16xf32> to vector<16x1xf32>
    %cst_116 = arith.constant 1.280000e+02 : f32
    %295 = vector.broadcast %cst_116 : f32 to vector<16x1xf32>
    %296 = arith.divf %294, %295 : vector<16x1xf32>
    %297 = vector.broadcast %296 : vector<16x1xf32> to vector<16x128xf32>
    %298 = arith.subf %288, %297 : vector<16x128xf32>
    %299 = arith.mulf %298, %298 : vector<16x128xf32>
    %cst_117 = arith.constant dense<0.000000e+00> : vector<16xf32>
    %300 = vector.multi_reduction <add>, %299, %cst_117 [1] : vector<16x128xf32> to vector<16xf32>
    %301 = vector.shape_cast %300 : vector<16xf32> to vector<16x1xf32>
    %cst_118 = arith.constant 1.280000e+02 : f32
    %302 = vector.broadcast %cst_118 : f32 to vector<16x1xf32>
    %303 = arith.divf %301, %302 : vector<16x1xf32>
    %cst_119 = arith.constant 9.99999974E-6 : f32
    %304 = vector.broadcast %cst_119 : f32 to vector<16x1xf32>
    %305 = arith.addf %303, %304 : vector<16x1xf32>
    %306 = math.rsqrt %305 : vector<16x1xf32>
    %307 = vector.broadcast %306 : vector<16x1xf32> to vector<16x128xf32>
    %308 = arith.mulf %298, %307 : vector<16x128xf32>
    %309 = vector.broadcast %290 : vector<1x128xf32> to vector<16x128xf32>
    %310 = arith.mulf %308, %309 : vector<16x128xf32>
    %311 = vector.broadcast %292 : vector<1x128xf32> to vector<16x128xf32>
    %312 = arith.addf %310, %311 : vector<16x128xf32>
    %313 = arith.truncf %312 : vector<16x128xf32> to vector<16x128xbf16>
    %c1_120 = arith.constant 1 : index
    %c0_121 = arith.constant 0 : index
    %c0_122 = arith.constant 0 : index
    %314 = vector.load %arg4[%c1_120, %c0_121, %c0_122] : memref<2x128x384xbf16, #tpu.memory_space<vmem>>, vector<1x128x384xbf16>
    %315 = vector.shape_cast %314 : vector<1x128x384xbf16> to vector<128x384xbf16>
    %cst_123 = arith.constant dense<0.000000e+00> : vector<16x384xf32>
    %316 = tpu.matmul %313, %315, %cst_123 {dimension_numbers = #tpu.dot_dimension_numbers<[1], [0], [0], [1], [0, 0, 1, 1], [], []>} : vector<16x128xbf16>, vector<128x384xbf16>, vector<16x384xf32> -> vector<16x384xf32>
    %c1_124 = arith.constant 1 : index
    %c0_125 = arith.constant 0 : index
    %c0_126 = arith.constant 0 : index
    %317 = vector.load %arg5[%c1_124, %c0_125, %c0_126] : memref<2x1x384xf32, #tpu.memory_space<vmem>>, vector<1x1x384xf32>
    %318 = vector.shape_cast %317 : vector<1x1x384xf32> to vector<1x384xf32>
    %319 = vector.broadcast %318 : vector<1x384xf32> to vector<16x384xf32>
    %320 = arith.addf %316, %319 : vector<16x384xf32>
    %c0_127 = arith.constant 0 : index
    %c0_128 = arith.constant 0 : index
    %321 = vector.load %arg1[%c0_127, %c0_128] : memref<2x8xf32, #tpu.memory_space<vmem>>, vector<1x8xf32>
    %322 = vector.extract_strided_slice %320 {offsets = [0, 0], sizes = [8, 32], strides = [1, 1]} : vector<16x384xf32> to vector<8x32xf32>
    %323 = vector.extract_strided_slice %320 {offsets = [0, 128], sizes = [8, 32], strides = [1, 1]} : vector<16x384xf32> to vector<8x32xf32>
    %324 = vector.extract_strided_slice %320 {offsets = [0, 256], sizes = [8, 32], strides = [1, 1]} : vector<16x384xf32> to vector<8x32xf32>
    %325 = arith.truncf %322 : vector<8x32xf32> to vector<8x32xbf16>
    %326 = arith.truncf %323 : vector<8x32xf32> to vector<8x32xbf16>
    %cst_129 = arith.constant dense<0.000000e+00> : vector<8x8xf32>
    %327 = tpu.matmul %325, %326, %cst_129 {dimension_numbers = #tpu.dot_dimension_numbers<[1], [1], [0], [0], [0, 0, 1, 0], [], []>} : vector<8x32xbf16>, vector<8x32xbf16>, vector<8x8xf32> -> vector<8x8xf32>
    %cst_130 = arith.constant 0.176776692 : f32
    %328 = vector.broadcast %cst_130 : f32 to vector<8x8xf32>
    %329 = arith.mulf %327, %328 : vector<8x8xf32>
    %330 = vector.broadcast %321 : vector<1x8xf32> to vector<8x8xf32>
    %331 = arith.addf %329, %330 : vector<8x8xf32>
    %cst_131 = arith.constant dense<0xFF800000> : vector<8xf32>
    %332 = vector.multi_reduction <maximumf>, %331, %cst_131 [1] : vector<8x8xf32> to vector<8xf32>
    %333 = vector.shape_cast %332 : vector<8xf32> to vector<8x1xf32>
    %334 = vector.broadcast %333 : vector<8x1xf32> to vector<8x8xf32>
    %335 = arith.subf %331, %334 : vector<8x8xf32>
    %336 = math.exp %335 : vector<8x8xf32>
    %cst_132 = arith.constant dense<0.000000e+00> : vector<8xf32>
    %337 = vector.multi_reduction <add>, %336, %cst_132 [1] : vector<8x8xf32> to vector<8xf32>
    %338 = vector.shape_cast %337 : vector<8xf32> to vector<8x1xf32>
    %339 = tpu.reciprocal %338 {approx = true} : vector<8x1xf32> -> vector<8x1xf32>
    %340 = vector.broadcast %339 : vector<8x1xf32> to vector<8x8xf32>
    %341 = arith.mulf %336, %340 : vector<8x8xf32>
    %342 = arith.truncf %341 : vector<8x8xf32> to vector<8x8xbf16>
    %343 = arith.truncf %324 : vector<8x32xf32> to vector<8x32xbf16>
    %cst_133 = arith.constant dense<0.000000e+00> : vector<8x32xf32>
    %344 = tpu.matmul %342, %343, %cst_133 {dimension_numbers = #tpu.dot_dimension_numbers<[1], [0], [0], [1], [0, 0, 1, 1], [], []>} : vector<8x8xbf16>, vector<8x32xbf16>, vector<8x32xf32> -> vector<8x32xf32>
    %c0_134 = arith.constant 0 : index
    %c0_135 = arith.constant 0 : index
    %345 = vector.load %arg19[%c0_134, %c0_135] : memref<16x128xf32, #tpu.memory_space<vmem>>, vector<8x32xf32>
    tpu.vector_store %arg19[%c0_134, %c0_135], %344 {strides = array<i32>} : memref<16x128xf32, #tpu.memory_space<vmem>>, vector<8x32xf32>,
    %346 = vector.extract_strided_slice %320 {offsets = [0, 32], sizes = [8, 32], strides = [1, 1]} : vector<16x384xf32> to vector<8x32xf32>
    %347 = vector.extract_strided_slice %320 {offsets = [0, 160], sizes = [8, 32], strides = [1, 1]} : vector<16x384xf32> to vector<8x32xf32>
    %348 = vector.extract_strided_slice %320 {offsets = [0, 288], sizes = [8, 32], strides = [1, 1]} : vector<16x384xf32> to vector<8x32xf32>
    %349 = arith.truncf %346 : vector<8x32xf32> to vector<8x32xbf16>
    %350 = arith.truncf %347 : vector<8x32xf32> to vector<8x32xbf16>
    %cst_136 = arith.constant dense<0.000000e+00> : vector<8x8xf32>
    %351 = tpu.matmul %349, %350, %cst_136 {dimension_numbers = #tpu.dot_dimension_numbers<[1], [1], [0], [0], [0, 0, 1, 0], [], []>} : vector<8x32xbf16>, vector<8x32xbf16>, vector<8x8xf32> -> vector<8x8xf32>
    %cst_137 = arith.constant 0.176776692 : f32
    %352 = vector.broadcast %cst_137 : f32 to vector<8x8xf32>
    %353 = arith.mulf %351, %352 : vector<8x8xf32>
    %354 = vector.broadcast %321 : vector<1x8xf32> to vector<8x8xf32>
    %355 = arith.addf %353, %354 : vector<8x8xf32>
    %cst_138 = arith.constant dense<0xFF800000> : vector<8xf32>
    %356 = vector.multi_reduction <maximumf>, %355, %cst_138 [1] : vector<8x8xf32> to vector<8xf32>
    %357 = vector.shape_cast %356 : vector<8xf32> to vector<8x1xf32>
    %358 = vector.broadcast %357 : vector<8x1xf32> to vector<8x8xf32>
    %359 = arith.subf %355, %358 : vector<8x8xf32>
    %360 = math.exp %359 : vector<8x8xf32>
    %cst_139 = arith.constant dense<0.000000e+00> : vector<8xf32>
    %361 = vector.multi_reduction <add>, %360, %cst_139 [1] : vector<8x8xf32> to vector<8xf32>
    %362 = vector.shape_cast %361 : vector<8xf32> to vector<8x1xf32>
    %363 = tpu.reciprocal %362 {approx = true} : vector<8x1xf32> -> vector<8x1xf32>
    %364 = vector.broadcast %363 : vector<8x1xf32> to vector<8x8xf32>
    %365 = arith.mulf %360, %364 : vector<8x8xf32>
    %366 = arith.truncf %365 : vector<8x8xf32> to vector<8x8xbf16>
    %367 = arith.truncf %348 : vector<8x32xf32> to vector<8x32xbf16>
    %cst_140 = arith.constant dense<0.000000e+00> : vector<8x32xf32>
    %368 = tpu.matmul %366, %367, %cst_140 {dimension_numbers = #tpu.dot_dimension_numbers<[1], [0], [0], [1], [0, 0, 1, 1], [], []>} : vector<8x8xbf16>, vector<8x32xbf16>, vector<8x32xf32> -> vector<8x32xf32>
    %c0_141 = arith.constant 0 : index
    %c32_142 = arith.constant 32 : index
    %369 = vector.load %arg19[%c0_141, %c32_142] : memref<16x128xf32, #tpu.memory_space<vmem>>, vector<8x32xf32>
    tpu.vector_store %arg19[%c0_141, %c32_142], %368 {strides = array<i32>} : memref<16x128xf32, #tpu.memory_space<vmem>>, vector<8x32xf32>,
    %370 = vector.extract_strided_slice %320 {offsets = [0, 64], sizes = [8, 32], strides = [1, 1]} : vector<16x384xf32> to vector<8x32xf32>
    %371 = vector.extract_strided_slice %320 {offsets = [0, 192], sizes = [8, 32], strides = [1, 1]} : vector<16x384xf32> to vector<8x32xf32>
    %372 = vector.extract_strided_slice %320 {offsets = [0, 320], sizes = [8, 32], strides = [1, 1]} : vector<16x384xf32> to vector<8x32xf32>
    %373 = arith.truncf %370 : vector<8x32xf32> to vector<8x32xbf16>
    %374 = arith.truncf %371 : vector<8x32xf32> to vector<8x32xbf16>
    %cst_143 = arith.constant dense<0.000000e+00> : vector<8x8xf32>
    %375 = tpu.matmul %373, %374, %cst_143 {dimension_numbers = #tpu.dot_dimension_numbers<[1], [1], [0], [0], [0, 0, 1, 0], [], []>} : vector<8x32xbf16>, vector<8x32xbf16>, vector<8x8xf32> -> vector<8x8xf32>
    %cst_144 = arith.constant 0.176776692 : f32
    %376 = vector.broadcast %cst_144 : f32 to vector<8x8xf32>
    %377 = arith.mulf %375, %376 : vector<8x8xf32>
    %378 = vector.broadcast %321 : vector<1x8xf32> to vector<8x8xf32>
    %379 = arith.addf %377, %378 : vector<8x8xf32>
    %cst_145 = arith.constant dense<0xFF800000> : vector<8xf32>
    %380 = vector.multi_reduction <maximumf>, %379, %cst_145 [1] : vector<8x8xf32> to vector<8xf32>
    %381 = vector.shape_cast %380 : vector<8xf32> to vector<8x1xf32>
    %382 = vector.broadcast %381 : vector<8x1xf32> to vector<8x8xf32>
    %383 = arith.subf %379, %382 : vector<8x8xf32>
    %384 = math.exp %383 : vector<8x8xf32>
    %cst_146 = arith.constant dense<0.000000e+00> : vector<8xf32>
    %385 = vector.multi_reduction <add>, %384, %cst_146 [1] : vector<8x8xf32> to vector<8xf32>
    %386 = vector.shape_cast %385 : vector<8xf32> to vector<8x1xf32>
    %387 = tpu.reciprocal %386 {approx = true} : vector<8x1xf32> -> vector<8x1xf32>
    %388 = vector.broadcast %387 : vector<8x1xf32> to vector<8x8xf32>
    %389 = arith.mulf %384, %388 : vector<8x8xf32>
    %390 = arith.truncf %389 : vector<8x8xf32> to vector<8x8xbf16>
    %391 = arith.truncf %372 : vector<8x32xf32> to vector<8x32xbf16>
    %cst_147 = arith.constant dense<0.000000e+00> : vector<8x32xf32>
    %392 = tpu.matmul %390, %391, %cst_147 {dimension_numbers = #tpu.dot_dimension_numbers<[1], [0], [0], [1], [0, 0, 1, 1], [], []>} : vector<8x8xbf16>, vector<8x32xbf16>, vector<8x32xf32> -> vector<8x32xf32>
    %c0_148 = arith.constant 0 : index
    %c64_149 = arith.constant 64 : index
    %393 = vector.load %arg19[%c0_148, %c64_149] : memref<16x128xf32, #tpu.memory_space<vmem>>, vector<8x32xf32>
    tpu.vector_store %arg19[%c0_148, %c64_149], %392 {strides = array<i32>} : memref<16x128xf32, #tpu.memory_space<vmem>>, vector<8x32xf32>,
    %394 = vector.extract_strided_slice %320 {offsets = [0, 96], sizes = [8, 32], strides = [1, 1]} : vector<16x384xf32> to vector<8x32xf32>
    %395 = vector.extract_strided_slice %320 {offsets = [0, 224], sizes = [8, 32], strides = [1, 1]} : vector<16x384xf32> to vector<8x32xf32>
    %396 = vector.extract_strided_slice %320 {offsets = [0, 352], sizes = [8, 32], strides = [1, 1]} : vector<16x384xf32> to vector<8x32xf32>
    %397 = arith.truncf %394 : vector<8x32xf32> to vector<8x32xbf16>
    %398 = arith.truncf %395 : vector<8x32xf32> to vector<8x32xbf16>
    %cst_150 = arith.constant dense<0.000000e+00> : vector<8x8xf32>
    %399 = tpu.matmul %397, %398, %cst_150 {dimension_numbers = #tpu.dot_dimension_numbers<[1], [1], [0], [0], [0, 0, 1, 0], [], []>} : vector<8x32xbf16>, vector<8x32xbf16>, vector<8x8xf32> -> vector<8x8xf32>
    %cst_151 = arith.constant 0.176776692 : f32
    %400 = vector.broadcast %cst_151 : f32 to vector<8x8xf32>
    %401 = arith.mulf %399, %400 : vector<8x8xf32>
    %402 = vector.broadcast %321 : vector<1x8xf32> to vector<8x8xf32>
    %403 = arith.addf %401, %402 : vector<8x8xf32>
    %cst_152 = arith.constant dense<0xFF800000> : vector<8xf32>
    %404 = vector.multi_reduction <maximumf>, %403, %cst_152 [1] : vector<8x8xf32> to vector<8xf32>
    %405 = vector.shape_cast %404 : vector<8xf32> to vector<8x1xf32>
    %406 = vector.broadcast %405 : vector<8x1xf32> to vector<8x8xf32>
    %407 = arith.subf %403, %406 : vector<8x8xf32>
    %408 = math.exp %407 : vector<8x8xf32>
    %cst_153 = arith.constant dense<0.000000e+00> : vector<8xf32>
    %409 = vector.multi_reduction <add>, %408, %cst_153 [1] : vector<8x8xf32> to vector<8xf32>
    %410 = vector.shape_cast %409 : vector<8xf32> to vector<8x1xf32>
    %411 = tpu.reciprocal %410 {approx = true} : vector<8x1xf32> -> vector<8x1xf32>
    %412 = vector.broadcast %411 : vector<8x1xf32> to vector<8x8xf32>
    %413 = arith.mulf %408, %412 : vector<8x8xf32>
    %414 = arith.truncf %413 : vector<8x8xf32> to vector<8x8xbf16>
    %415 = arith.truncf %396 : vector<8x32xf32> to vector<8x32xbf16>
    %cst_154 = arith.constant dense<0.000000e+00> : vector<8x32xf32>
    %416 = tpu.matmul %414, %415, %cst_154 {dimension_numbers = #tpu.dot_dimension_numbers<[1], [0], [0], [1], [0, 0, 1, 1], [], []>} : vector<8x8xbf16>, vector<8x32xbf16>, vector<8x32xf32> -> vector<8x32xf32>
    %c0_155 = arith.constant 0 : index
    %c96_156 = arith.constant 96 : index
    %417 = vector.load %arg19[%c0_155, %c96_156] : memref<16x128xf32, #tpu.memory_space<vmem>>, vector<8x32xf32>
    tpu.vector_store %arg19[%c0_155, %c96_156], %416 {strides = array<i32>} : memref<16x128xf32, #tpu.memory_space<vmem>>, vector<8x32xf32>,
    %c1_157 = arith.constant 1 : index
    %c0_158 = arith.constant 0 : index
    %418 = vector.load %arg1[%c1_157, %c0_158] : memref<2x8xf32, #tpu.memory_space<vmem>>, vector<1x8xf32>
    %419 = vector.extract_strided_slice %320 {offsets = [8, 0], sizes = [8, 32], strides = [1, 1]} : vector<16x384xf32> to vector<8x32xf32>
    %420 = vector.extract_strided_slice %320 {offsets = [8, 128], sizes = [8, 32], strides = [1, 1]} : vector<16x384xf32> to vector<8x32xf32>
    %421 = vector.extract_strided_slice %320 {offsets = [8, 256], sizes = [8, 32], strides = [1, 1]} : vector<16x384xf32> to vector<8x32xf32>
    %422 = arith.truncf %419 : vector<8x32xf32> to vector<8x32xbf16>
    %423 = arith.truncf %420 : vector<8x32xf32> to vector<8x32xbf16>
    %cst_159 = arith.constant dense<0.000000e+00> : vector<8x8xf32>
    %424 = tpu.matmul %422, %423, %cst_159 {dimension_numbers = #tpu.dot_dimension_numbers<[1], [1], [0], [0], [0, 0, 1, 0], [], []>} : vector<8x32xbf16>, vector<8x32xbf16>, vector<8x8xf32> -> vector<8x8xf32>
    %cst_160 = arith.constant 0.176776692 : f32
    %425 = vector.broadcast %cst_160 : f32 to vector<8x8xf32>
    %426 = arith.mulf %424, %425 : vector<8x8xf32>
    %427 = vector.broadcast %418 : vector<1x8xf32> to vector<8x8xf32>
    %428 = arith.addf %426, %427 : vector<8x8xf32>
    %cst_161 = arith.constant dense<0xFF800000> : vector<8xf32>
    %429 = vector.multi_reduction <maximumf>, %428, %cst_161 [1] : vector<8x8xf32> to vector<8xf32>
    %430 = vector.shape_cast %429 : vector<8xf32> to vector<8x1xf32>
    %431 = vector.broadcast %430 : vector<8x1xf32> to vector<8x8xf32>
    %432 = arith.subf %428, %431 : vector<8x8xf32>
    %433 = math.exp %432 : vector<8x8xf32>
    %cst_162 = arith.constant dense<0.000000e+00> : vector<8xf32>
    %434 = vector.multi_reduction <add>, %433, %cst_162 [1] : vector<8x8xf32> to vector<8xf32>
    %435 = vector.shape_cast %434 : vector<8xf32> to vector<8x1xf32>
    %436 = tpu.reciprocal %435 {approx = true} : vector<8x1xf32> -> vector<8x1xf32>
    %437 = vector.broadcast %436 : vector<8x1xf32> to vector<8x8xf32>
    %438 = arith.mulf %433, %437 : vector<8x8xf32>
    %439 = arith.truncf %438 : vector<8x8xf32> to vector<8x8xbf16>
    %440 = arith.truncf %421 : vector<8x32xf32> to vector<8x32xbf16>
    %cst_163 = arith.constant dense<0.000000e+00> : vector<8x32xf32>
    %441 = tpu.matmul %439, %440, %cst_163 {dimension_numbers = #tpu.dot_dimension_numbers<[1], [0], [0], [1], [0, 0, 1, 1], [], []>} : vector<8x8xbf16>, vector<8x32xbf16>, vector<8x32xf32> -> vector<8x32xf32>
    %c8_164 = arith.constant 8 : index
    %c0_165 = arith.constant 0 : index
    %442 = vector.load %arg19[%c8_164, %c0_165] : memref<16x128xf32, #tpu.memory_space<vmem>>, vector<8x32xf32>
    tpu.vector_store %arg19[%c8_164, %c0_165], %441 {strides = array<i32>} : memref<16x128xf32, #tpu.memory_space<vmem>>, vector<8x32xf32>,
    %443 = vector.extract_strided_slice %320 {offsets = [8, 32], sizes = [8, 32], strides = [1, 1]} : vector<16x384xf32> to vector<8x32xf32>
    %444 = vector.extract_strided_slice %320 {offsets = [8, 160], sizes = [8, 32], strides = [1, 1]} : vector<16x384xf32> to vector<8x32xf32>
    %445 = vector.extract_strided_slice %320 {offsets = [8, 288], sizes = [8, 32], strides = [1, 1]} : vector<16x384xf32> to vector<8x32xf32>
    %446 = arith.truncf %443 : vector<8x32xf32> to vector<8x32xbf16>
    %447 = arith.truncf %444 : vector<8x32xf32> to vector<8x32xbf16>
    %cst_166 = arith.constant dense<0.000000e+00> : vector<8x8xf32>
    %448 = tpu.matmul %446, %447, %cst_166 {dimension_numbers = #tpu.dot_dimension_numbers<[1], [1], [0], [0], [0, 0, 1, 0], [], []>} : vector<8x32xbf16>, vector<8x32xbf16>, vector<8x8xf32> -> vector<8x8xf32>
    %cst_167 = arith.constant 0.176776692 : f32
    %449 = vector.broadcast %cst_167 : f32 to vector<8x8xf32>
    %450 = arith.mulf %448, %449 : vector<8x8xf32>
    %451 = vector.broadcast %418 : vector<1x8xf32> to vector<8x8xf32>
    %452 = arith.addf %450, %451 : vector<8x8xf32>
    %cst_168 = arith.constant dense<0xFF800000> : vector<8xf32>
    %453 = vector.multi_reduction <maximumf>, %452, %cst_168 [1] : vector<8x8xf32> to vector<8xf32>
    %454 = vector.shape_cast %453 : vector<8xf32> to vector<8x1xf32>
    %455 = vector.broadcast %454 : vector<8x1xf32> to vector<8x8xf32>
    %456 = arith.subf %452, %455 : vector<8x8xf32>
    %457 = math.exp %456 : vector<8x8xf32>
    %cst_169 = arith.constant dense<0.000000e+00> : vector<8xf32>
    %458 = vector.multi_reduction <add>, %457, %cst_169 [1] : vector<8x8xf32> to vector<8xf32>
    %459 = vector.shape_cast %458 : vector<8xf32> to vector<8x1xf32>
    %460 = tpu.reciprocal %459 {approx = true} : vector<8x1xf32> -> vector<8x1xf32>
    %461 = vector.broadcast %460 : vector<8x1xf32> to vector<8x8xf32>
    %462 = arith.mulf %457, %461 : vector<8x8xf32>
    %463 = arith.truncf %462 : vector<8x8xf32> to vector<8x8xbf16>
    %464 = arith.truncf %445 : vector<8x32xf32> to vector<8x32xbf16>
    %cst_170 = arith.constant dense<0.000000e+00> : vector<8x32xf32>
    %465 = tpu.matmul %463, %464, %cst_170 {dimension_numbers = #tpu.dot_dimension_numbers<[1], [0], [0], [1], [0, 0, 1, 1], [], []>} : vector<8x8xbf16>, vector<8x32xbf16>, vector<8x32xf32> -> vector<8x32xf32>
    %c8_171 = arith.constant 8 : index
    %c32_172 = arith.constant 32 : index
    %466 = vector.load %arg19[%c8_171, %c32_172] : memref<16x128xf32, #tpu.memory_space<vmem>>, vector<8x32xf32>
    tpu.vector_store %arg19[%c8_171, %c32_172], %465 {strides = array<i32>} : memref<16x128xf32, #tpu.memory_space<vmem>>, vector<8x32xf32>,
    %467 = vector.extract_strided_slice %320 {offsets = [8, 64], sizes = [8, 32], strides = [1, 1]} : vector<16x384xf32> to vector<8x32xf32>
    %468 = vector.extract_strided_slice %320 {offsets = [8, 192], sizes = [8, 32], strides = [1, 1]} : vector<16x384xf32> to vector<8x32xf32>
    %469 = vector.extract_strided_slice %320 {offsets = [8, 320], sizes = [8, 32], strides = [1, 1]} : vector<16x384xf32> to vector<8x32xf32>
    %470 = arith.truncf %467 : vector<8x32xf32> to vector<8x32xbf16>
    %471 = arith.truncf %468 : vector<8x32xf32> to vector<8x32xbf16>
    %cst_173 = arith.constant dense<0.000000e+00> : vector<8x8xf32>
    %472 = tpu.matmul %470, %471, %cst_173 {dimension_numbers = #tpu.dot_dimension_numbers<[1], [1], [0], [0], [0, 0, 1, 0], [], []>} : vector<8x32xbf16>, vector<8x32xbf16>, vector<8x8xf32> -> vector<8x8xf32>
    %cst_174 = arith.constant 0.176776692 : f32
    %473 = vector.broadcast %cst_174 : f32 to vector<8x8xf32>
    %474 = arith.mulf %472, %473 : vector<8x8xf32>
    %475 = vector.broadcast %418 : vector<1x8xf32> to vector<8x8xf32>
    %476 = arith.addf %474, %475 : vector<8x8xf32>
    %cst_175 = arith.constant dense<0xFF800000> : vector<8xf32>
    %477 = vector.multi_reduction <maximumf>, %476, %cst_175 [1] : vector<8x8xf32> to vector<8xf32>
    %478 = vector.shape_cast %477 : vector<8xf32> to vector<8x1xf32>
    %479 = vector.broadcast %478 : vector<8x1xf32> to vector<8x8xf32>
    %480 = arith.subf %476, %479 : vector<8x8xf32>
    %481 = math.exp %480 : vector<8x8xf32>
    %cst_176 = arith.constant dense<0.000000e+00> : vector<8xf32>
    %482 = vector.multi_reduction <add>, %481, %cst_176 [1] : vector<8x8xf32> to vector<8xf32>
    %483 = vector.shape_cast %482 : vector<8xf32> to vector<8x1xf32>
    %484 = tpu.reciprocal %483 {approx = true} : vector<8x1xf32> -> vector<8x1xf32>
    %485 = vector.broadcast %484 : vector<8x1xf32> to vector<8x8xf32>
    %486 = arith.mulf %481, %485 : vector<8x8xf32>
    %487 = arith.truncf %486 : vector<8x8xf32> to vector<8x8xbf16>
    %488 = arith.truncf %469 : vector<8x32xf32> to vector<8x32xbf16>
    %cst_177 = arith.constant dense<0.000000e+00> : vector<8x32xf32>
    %489 = tpu.matmul %487, %488, %cst_177 {dimension_numbers = #tpu.dot_dimension_numbers<[1], [0], [0], [1], [0, 0, 1, 1], [], []>} : vector<8x8xbf16>, vector<8x32xbf16>, vector<8x32xf32> -> vector<8x32xf32>
    %c8_178 = arith.constant 8 : index
    %c64_179 = arith.constant 64 : index
    %490 = vector.load %arg19[%c8_178, %c64_179] : memref<16x128xf32, #tpu.memory_space<vmem>>, vector<8x32xf32>
    tpu.vector_store %arg19[%c8_178, %c64_179], %489 {strides = array<i32>} : memref<16x128xf32, #tpu.memory_space<vmem>>, vector<8x32xf32>,
    %491 = vector.extract_strided_slice %320 {offsets = [8, 96], sizes = [8, 32], strides = [1, 1]} : vector<16x384xf32> to vector<8x32xf32>
    %492 = vector.extract_strided_slice %320 {offsets = [8, 224], sizes = [8, 32], strides = [1, 1]} : vector<16x384xf32> to vector<8x32xf32>
    %493 = vector.extract_strided_slice %320 {offsets = [8, 352], sizes = [8, 32], strides = [1, 1]} : vector<16x384xf32> to vector<8x32xf32>
    %494 = arith.truncf %491 : vector<8x32xf32> to vector<8x32xbf16>
    %495 = arith.truncf %492 : vector<8x32xf32> to vector<8x32xbf16>
    %cst_180 = arith.constant dense<0.000000e+00> : vector<8x8xf32>
    %496 = tpu.matmul %494, %495, %cst_180 {dimension_numbers = #tpu.dot_dimension_numbers<[1], [1], [0], [0], [0, 0, 1, 0], [], []>} : vector<8x32xbf16>, vector<8x32xbf16>, vector<8x8xf32> -> vector<8x8xf32>
    %cst_181 = arith.constant 0.176776692 : f32
    %497 = vector.broadcast %cst_181 : f32 to vector<8x8xf32>
    %498 = arith.mulf %496, %497 : vector<8x8xf32>
    %499 = vector.broadcast %418 : vector<1x8xf32> to vector<8x8xf32>
    %500 = arith.addf %498, %499 : vector<8x8xf32>
    %cst_182 = arith.constant dense<0xFF800000> : vector<8xf32>
    %501 = vector.multi_reduction <maximumf>, %500, %cst_182 [1] : vector<8x8xf32> to vector<8xf32>
    %502 = vector.shape_cast %501 : vector<8xf32> to vector<8x1xf32>
    %503 = vector.broadcast %502 : vector<8x1xf32> to vector<8x8xf32>
    %504 = arith.subf %500, %503 : vector<8x8xf32>
    %505 = math.exp %504 : vector<8x8xf32>
    %cst_183 = arith.constant dense<0.000000e+00> : vector<8xf32>
    %506 = vector.multi_reduction <add>, %505, %cst_183 [1] : vector<8x8xf32> to vector<8xf32>
    %507 = vector.shape_cast %506 : vector<8xf32> to vector<8x1xf32>
    %508 = tpu.reciprocal %507 {approx = true} : vector<8x1xf32> -> vector<8x1xf32>
    %509 = vector.broadcast %508 : vector<8x1xf32> to vector<8x8xf32>
    %510 = arith.mulf %505, %509 : vector<8x8xf32>
    %511 = arith.truncf %510 : vector<8x8xf32> to vector<8x8xbf16>
    %512 = arith.truncf %493 : vector<8x32xf32> to vector<8x32xbf16>
    %cst_184 = arith.constant dense<0.000000e+00> : vector<8x32xf32>
    %513 = tpu.matmul %511, %512, %cst_184 {dimension_numbers = #tpu.dot_dimension_numbers<[1], [0], [0], [1], [0, 0, 1, 1], [], []>} : vector<8x8xbf16>, vector<8x32xbf16>, vector<8x32xf32> -> vector<8x32xf32>
    %c8_185 = arith.constant 8 : index
    %c96_186 = arith.constant 96 : index
    %514 = vector.load %arg19[%c8_185, %c96_186] : memref<16x128xf32, #tpu.memory_space<vmem>>, vector<8x32xf32>
    tpu.vector_store %arg19[%c8_185, %c96_186], %513 {strides = array<i32>} : memref<16x128xf32, #tpu.memory_space<vmem>>, vector<8x32xf32>,
    %c0_187 = arith.constant 0 : index
    %c0_188 = arith.constant 0 : index
    %515 = vector.load %arg19[%c0_187, %c0_188] : memref<16x128xf32, #tpu.memory_space<vmem>>, vector<16x128xf32>
    %516 = arith.truncf %515 : vector<16x128xf32> to vector<16x128xbf16>
    %c1_189 = arith.constant 1 : index
    %c0_190 = arith.constant 0 : index
    %c0_191 = arith.constant 0 : index
    %517 = vector.load %arg6[%c1_189, %c0_190, %c0_191] : memref<2x128x128xbf16, #tpu.memory_space<vmem>>, vector<1x128x128xbf16>
    %518 = vector.shape_cast %517 : vector<1x128x128xbf16> to vector<128x128xbf16>
    %cst_192 = arith.constant dense<0.000000e+00> : vector<16x128xf32>
    %519 = tpu.matmul %516, %518, %cst_192 {dimension_numbers = #tpu.dot_dimension_numbers<[1], [0], [0], [1], [0, 0, 1, 1], [], []>} : vector<16x128xbf16>, vector<128x128xbf16>, vector<16x128xf32> -> vector<16x128xf32>
    %c1_193 = arith.constant 1 : index
    %c0_194 = arith.constant 0 : index
    %c0_195 = arith.constant 0 : index
    %520 = vector.load %arg7[%c1_193, %c0_194, %c0_195] : memref<2x1x128xf32, #tpu.memory_space<vmem>>, vector<1x1x128xf32>
    %521 = vector.shape_cast %520 : vector<1x1x128xf32> to vector<1x128xf32>
    %522 = vector.broadcast %521 : vector<1x128xf32> to vector<16x128xf32>
    %523 = arith.addf %519, %522 : vector<16x128xf32>
    %524 = arith.addf %312, %523 : vector<16x128xf32>
    %c1_196 = arith.constant 1 : index
    %c0_197 = arith.constant 0 : index
    %c0_198 = arith.constant 0 : index
    %525 = vector.load %arg8[%c1_196, %c0_197, %c0_198] : memref<2x1x128xf32, #tpu.memory_space<vmem>>, vector<1x1x128xf32>
    %526 = vector.shape_cast %525 : vector<1x1x128xf32> to vector<1x128xf32>
    %c1_199 = arith.constant 1 : index
    %c0_200 = arith.constant 0 : index
    %c0_201 = arith.constant 0 : index
    %527 = vector.load %arg9[%c1_199, %c0_200, %c0_201] : memref<2x1x128xf32, #tpu.memory_space<vmem>>, vector<1x1x128xf32>
    %528 = vector.shape_cast %527 : vector<1x1x128xf32> to vector<1x128xf32>
    %cst_202 = arith.constant dense<0.000000e+00> : vector<16xf32>
    %529 = vector.multi_reduction <add>, %524, %cst_202 [1] : vector<16x128xf32> to vector<16xf32>
    %530 = vector.shape_cast %529 : vector<16xf32> to vector<16x1xf32>
    %cst_203 = arith.constant 1.280000e+02 : f32
    %531 = vector.broadcast %cst_203 : f32 to vector<16x1xf32>
    %532 = arith.divf %530, %531 : vector<16x1xf32>
    %533 = vector.broadcast %532 : vector<16x1xf32> to vector<16x128xf32>
    %534 = arith.subf %524, %533 : vector<16x128xf32>
    %535 = arith.mulf %534, %534 : vector<16x128xf32>
    %cst_204 = arith.constant dense<0.000000e+00> : vector<16xf32>
    %536 = vector.multi_reduction <add>, %535, %cst_204 [1] : vector<16x128xf32> to vector<16xf32>
    %537 = vector.shape_cast %536 : vector<16xf32> to vector<16x1xf32>
    %cst_205 = arith.constant 1.280000e+02 : f32
    %538 = vector.broadcast %cst_205 : f32 to vector<16x1xf32>
    %539 = arith.divf %537, %538 : vector<16x1xf32>
    %cst_206 = arith.constant 9.99999974E-6 : f32
    %540 = vector.broadcast %cst_206 : f32 to vector<16x1xf32>
    %541 = arith.addf %539, %540 : vector<16x1xf32>
    %542 = math.rsqrt %541 : vector<16x1xf32>
    %543 = vector.broadcast %542 : vector<16x1xf32> to vector<16x128xf32>
    %544 = arith.mulf %534, %543 : vector<16x128xf32>
    %545 = vector.broadcast %526 : vector<1x128xf32> to vector<16x128xf32>
    %546 = arith.mulf %544, %545 : vector<16x128xf32>
    %547 = vector.broadcast %528 : vector<1x128xf32> to vector<16x128xf32>
    %548 = arith.addf %546, %547 : vector<16x128xf32>
    %549 = arith.truncf %548 : vector<16x128xf32> to vector<16x128xbf16>
    %c1_207 = arith.constant 1 : index
    %c0_208 = arith.constant 0 : index
    %c0_209 = arith.constant 0 : index
    %550 = vector.load %arg10[%c1_207, %c0_208, %c0_209] : memref<2x128x256xbf16, #tpu.memory_space<vmem>>, vector<1x128x256xbf16>
    %551 = vector.shape_cast %550 : vector<1x128x256xbf16> to vector<128x256xbf16>
    %cst_210 = arith.constant dense<0.000000e+00> : vector<16x256xf32>
    %552 = tpu.matmul %549, %551, %cst_210 {dimension_numbers = #tpu.dot_dimension_numbers<[1], [0], [0], [1], [0, 0, 1, 1], [], []>} : vector<16x128xbf16>, vector<128x256xbf16>, vector<16x256xf32> -> vector<16x256xf32>
    %c1_211 = arith.constant 1 : index
    %c0_212 = arith.constant 0 : index
    %c0_213 = arith.constant 0 : index
    %553 = vector.load %arg11[%c1_211, %c0_212, %c0_213] : memref<2x1x256xf32, #tpu.memory_space<vmem>>, vector<1x1x256xf32>
    %554 = vector.shape_cast %553 : vector<1x1x256xf32> to vector<1x256xf32>
    %555 = vector.broadcast %554 : vector<1x256xf32> to vector<16x256xf32>
    %556 = arith.addf %552, %555 : vector<16x256xf32>
    %cst_214 = arith.constant 5.000000e-01 : f32
    %557 = vector.broadcast %cst_214 : f32 to vector<16x256xf32>
    %558 = arith.mulf %557, %556 : vector<16x256xf32>
    %cst_215 = arith.constant 4.471500e-02 : f32
    %559 = vector.broadcast %cst_215 : f32 to vector<16x256xf32>
    %560 = arith.mulf %559, %556 : vector<16x256xf32>
    %561 = arith.mulf %560, %556 : vector<16x256xf32>
    %562 = arith.mulf %561, %556 : vector<16x256xf32>
    %563 = arith.addf %556, %562 : vector<16x256xf32>
    %cst_216 = arith.constant 0.797884583 : f32
    %564 = vector.broadcast %cst_216 : f32 to vector<16x256xf32>
    %565 = arith.mulf %564, %563 : vector<16x256xf32>
    %566 = math.tanh %565 : vector<16x256xf32>
    %cst_217 = arith.constant 1.000000e+00 : f32
    %567 = vector.broadcast %cst_217 : f32 to vector<16x256xf32>
    %568 = arith.addf %567, %566 : vector<16x256xf32>
    %569 = arith.mulf %558, %568 : vector<16x256xf32>
    %570 = arith.truncf %569 : vector<16x256xf32> to vector<16x256xbf16>
    %c1_218 = arith.constant 1 : index
    %c0_219 = arith.constant 0 : index
    %c0_220 = arith.constant 0 : index
    %571 = vector.load %arg12[%c1_218, %c0_219, %c0_220] : memref<2x256x128xbf16, #tpu.memory_space<vmem>>, vector<1x256x128xbf16>
    %572 = vector.shape_cast %571 : vector<1x256x128xbf16> to vector<256x128xbf16>
    %cst_221 = arith.constant dense<0.000000e+00> : vector<16x128xf32>
    %573 = tpu.matmul %570, %572, %cst_221 {dimension_numbers = #tpu.dot_dimension_numbers<[1], [0], [0], [1], [0, 0, 1, 1], [], []>} : vector<16x256xbf16>, vector<256x128xbf16>, vector<16x128xf32> -> vector<16x128xf32>
    %c1_222 = arith.constant 1 : index
    %c0_223 = arith.constant 0 : index
    %c0_224 = arith.constant 0 : index
    %574 = vector.load %arg13[%c1_222, %c0_223, %c0_224] : memref<2x1x128xf32, #tpu.memory_space<vmem>>, vector<1x1x128xf32>
    %575 = vector.shape_cast %574 : vector<1x1x128xf32> to vector<1x128xf32>
    %576 = vector.broadcast %575 : vector<1x128xf32> to vector<16x128xf32>
    %577 = arith.addf %573, %576 : vector<16x128xf32>
    %578 = arith.addf %548, %577 : vector<16x128xf32>
    %c1_225 = arith.constant 1 : index
    %c0_226 = arith.constant 0 : index
    %c0_227 = arith.constant 0 : index
    %579 = vector.load %arg14[%c1_225, %c0_226, %c0_227] : memref<2x1x128xf32, #tpu.memory_space<vmem>>, vector<1x1x128xf32>
    %580 = vector.shape_cast %579 : vector<1x1x128xf32> to vector<1x128xf32>
    %c1_228 = arith.constant 1 : index
    %c0_229 = arith.constant 0 : index
    %c0_230 = arith.constant 0 : index
    %581 = vector.load %arg15[%c1_228, %c0_229, %c0_230] : memref<2x1x128xf32, #tpu.memory_space<vmem>>, vector<1x1x128xf32>
    %582 = vector.shape_cast %581 : vector<1x1x128xf32> to vector<1x128xf32>
    %cst_231 = arith.constant dense<0.000000e+00> : vector<16xf32>
    %583 = vector.multi_reduction <add>, %578, %cst_231 [1] : vector<16x128xf32> to vector<16xf32>
    %584 = vector.shape_cast %583 : vector<16xf32> to vector<16x1xf32>
    %cst_232 = arith.constant 1.280000e+02 : f32
    %585 = vector.broadcast %cst_232 : f32 to vector<16x1xf32>
    %586 = arith.divf %584, %585 : vector<16x1xf32>
    %587 = vector.broadcast %586 : vector<16x1xf32> to vector<16x128xf32>
    %588 = arith.subf %578, %587 : vector<16x128xf32>
    %589 = arith.mulf %588, %588 : vector<16x128xf32>
    %cst_233 = arith.constant dense<0.000000e+00> : vector<16xf32>
    %590 = vector.multi_reduction <add>, %589, %cst_233 [1] : vector<16x128xf32> to vector<16xf32>
    %591 = vector.shape_cast %590 : vector<16xf32> to vector<16x1xf32>
    %cst_234 = arith.constant 1.280000e+02 : f32
    %592 = vector.broadcast %cst_234 : f32 to vector<16x1xf32>
    %593 = arith.divf %591, %592 : vector<16x1xf32>
    %cst_235 = arith.constant 9.99999974E-6 : f32
    %594 = vector.broadcast %cst_235 : f32 to vector<16x1xf32>
    %595 = arith.addf %593, %594 : vector<16x1xf32>
    %596 = math.rsqrt %595 : vector<16x1xf32>
    %597 = vector.broadcast %596 : vector<16x1xf32> to vector<16x128xf32>
    %598 = arith.mulf %588, %597 : vector<16x128xf32>
    %599 = vector.broadcast %580 : vector<1x128xf32> to vector<16x128xf32>
    %600 = arith.mulf %598, %599 : vector<16x128xf32>
    %601 = vector.broadcast %582 : vector<1x128xf32> to vector<16x128xf32>
    %602 = arith.addf %600, %601 : vector<16x128xf32>
    %603 = vector.extract_strided_slice %602 {offsets = [0, 0], sizes = [1, 128], strides = [1, 1]} : vector<16x128xf32> to vector<1x128xf32>
    %604 = arith.truncf %603 : vector<1x128xf32> to vector<1x128xbf16>
    %c0_236 = arith.constant 0 : index
    %c0_237 = arith.constant 0 : index
    %605 = vector.load %arg16[%c0_236, %c0_237] : memref<128x128xbf16, #tpu.memory_space<vmem>>, vector<128x128xbf16>
    %cst_238 = arith.constant dense<0.000000e+00> : vector<1x128xf32>
    %606 = tpu.matmul %604, %605, %cst_238 {dimension_numbers = #tpu.dot_dimension_numbers<[1], [0], [0], [1], [0, 0, 1, 1], [], []>} : vector<1x128xbf16>, vector<128x128xbf16>, vector<1x128xf32> -> vector<1x128xf32>
    %c0_239 = arith.constant 0 : index
    %c0_240 = arith.constant 0 : index
    %607 = vector.load %arg17[%c0_239, %c0_240] : memref<1x128xf32, #tpu.memory_space<vmem>>, vector<1x128xf32>
    %608 = arith.addf %606, %607 : vector<1x128xf32>
    %609 = math.tanh %608 : vector<1x128xf32>
    %c0_241 = arith.constant 0 : index
    %c0_242 = arith.constant 0 : index
    %610 = vector.load %arg18[%c0_241, %c0_242] : memref<2x128xf32, #tpu.memory_space<vmem>>, vector<1x128xf32>
    tpu.vector_store %arg18[%c0_241, %c0_242], %609 {strides = array<i32>} : memref<2x128xf32, #tpu.memory_space<vmem>>, vector<1x128xf32>,
    %611 = vector.extract_strided_slice %602 {offsets = [8, 0], sizes = [1, 128], strides = [1, 1]} : vector<16x128xf32> to vector<1x128xf32>
    %612 = arith.truncf %611 : vector<1x128xf32> to vector<1x128xbf16>
    %c0_243 = arith.constant 0 : index
    %c0_244 = arith.constant 0 : index
    %613 = vector.load %arg16[%c0_243, %c0_244] : memref<128x128xbf16, #tpu.memory_space<vmem>>, vector<128x128xbf16>
    %cst_245 = arith.constant dense<0.000000e+00> : vector<1x128xf32>
    %614 = tpu.matmul %612, %613, %cst_245 {dimension_numbers = #tpu.dot_dimension_numbers<[1], [0], [0], [1], [0, 0, 1, 1], [], []>} : vector<1x128xbf16>, vector<128x128xbf16>, vector<1x128xf32> -> vector<1x128xf32>
    %c0_246 = arith.constant 0 : index
    %c0_247 = arith.constant 0 : index
    %615 = vector.load %arg17[%c0_246, %c0_247] : memref<1x128xf32, #tpu.memory_space<vmem>>, vector<1x128xf32>
    %616 = arith.addf %614, %615 : vector<1x128xf32>
    %617 = math.tanh %616 : vector<1x128xf32>
    %c1_248 = arith.constant 1 : index
    %c0_249 = arith.constant 0 : index
    %618 = vector.load %arg18[%c1_248, %c0_249] : memref<2x128xf32, #tpu.memory_space<vmem>>, vector<1x128xf32>
    tpu.vector_store %arg18[%c1_248, %c0_249], %617 {strides = array<i32>} : memref<2x128xf32, #tpu.memory_space<vmem>>, vector<1x128xf32>,
    return
  }
}

</mosaic_0001>

<bundles_post_ra>
// kernel: tpu_custom_call.1
= control target key start
LH: loop header
LB: loop body
LE: loop exit
PB: predicated region body
PF: predicated region fallthrough
CT: control target
= control target key end

     0   :  { %s5980_s0 = inlined_call_operand.hbm [shape: f32[16,128], index: 0, kind: input, shape index: {}]   ;;  %s5981_s1 = inlined_call_operand.hbm [shape: f32[2,8], index: 1, kind: input, shape index: {}]   ;;  %s5982_s2 = inlined_call_operand.hbm [shape: f32[1,128], index: 2, kind: input, shape index: {}]   ;;  %s5983_s3 = inlined_call_operand.hbm [shape: f32[1,128], index: 3, kind: input, shape index: {}]   ;;  %s5984_s4 = inlined_call_operand.hbm [shape: bf16[2,128,384], index: 4, kind: input, shape index: {}]   ;;  %s5985_s5 = inlined_call_operand.vmem [shape: f32[2,1,384], index: 5, kind: input, shape index: {}]   ;;  %s5986_s6 = inlined_call_operand.hbm [shape: bf16[2,128,128], index: 6, kind: input, shape index: {}]   ;;  %s5987_s7 = inlined_call_operand.vmem [shape: f32[2,1,128], index: 7, kind: input, shape index: {}]   ;;  %s5988_s8 = inlined_call_operand.vmem [shape: f32[2,1,128], index: 8, kind: input, shape index: {}]   ;;  %s5989_s9 = inlined_call_operand.vmem [shape: f32[2,1,128], index: 9, kind: input, shape index: {}]   ;;  %s5990_s10 = inlined_call_operand.hbm [shape: bf16[2,128,256], index: 10, kind: input, shape index: {}]   ;;  %s5991_s11 = inlined_call_operand.vmem [shape: f32[2,1,256], index: 11, kind: input, shape index: {}]   ;;  %s5992_s12 = inlined_call_operand.hbm [shape: bf16[2,256,128], index: 12, kind: input, shape index: {}]   ;;  %s5993_s13 = inlined_call_operand.vmem [shape: f32[2,1,128], index: 13, kind: input, shape index: {}]   ;;  %s5994_s14 = inlined_call_operand.vmem [shape: f32[2,1,128], index: 14, kind: input, shape index: {}]   ;;  %s5995_s15 = inlined_call_operand.vmem [shape: f32[2,1,128], index: 15, kind: input, shape index: {}]   ;;  %s5996_s16 = inlined_call_operand.hbm [shape: bf16[128,128], index: 16, kind: input, shape index: {}]   ;;  %s5997_s17 = inlined_call_operand.vmem [shape: f32[1,128], index: 17, kind: input, shape index: {}]   ;;  %s5998_s18 = inlined_call_operand.hbm [shape: f32[2,128], index: 18, kind: output, shape index: {}]  }
   0x1   :  { %6005 = sst [smem:[#allocation25_spill]] %s5980_s0 }
   0x2   :  { %6006 = sst [smem:[#allocation26_spill]] %s5981_s1 }
   0x3   :  { %6007 = sst [smem:[#allocation27_spill]] %s5982_s2 }
   0x4   :  { %23 = vsyncpa [#allocation4], 0 }
   0x5   :  { %24 = vsyncpa [#allocation7], 0 }
   0x6   :  { %25 = vsyncpa [#allocation10], 0 }
   0x7   :  { %26 = vsyncpa [#allocation13], 0 }
   0x8   :  { %27 = vsyncpa [#allocation16], 0 }
   0x9   :  { %28 = vsyncpa [#allocation5], 0  ;;  %s5212_s27 = smov [#allocation6]   ;;  %s5213_s29 = smov [#allocation9]  }
   0xa   :  { %s47_s28 = sshll.u32 %s5212_s27, 4  ;;  %s67_s30 = sshll.u32 %s5213_s29, 4  ;;  %s48_s28 = int_to_ptr.vmem [resolvable:$true] %s47_s28  ;;  %s68_s30 = int_to_ptr.vmem [resolvable:$true] %s67_s30 }
   0xb   :  { %s6008_s1 = sld [smem:[#allocation26_spill]] }
  0x11   :  { %s4980_s20 = scalar_lea.hbm %s6008_s1, 32 }
  0x12   :  { %p4981_p0 = scmp.ne.s32.totalorder %s6008_s1, %s4980_s20  ;;  %p4984_p1 = scmp.lt.u32.totalorder %s4980_s20, %s6008_s1 }
  0x14   :  { %p4986_p2 = pnand %p4984_p1, %p4981_p0 }
  0x16   :  { %4989 = shalt.err (!%p4986_p2)
}
  0x17   :  { %s4990_s24 = scalar_lea.vmem %s48_s28, 32  ;;  %p4995_p4 = scmp.lt.s32.totalorder %s48_s28, %s48_s28 }
  0x18   :  { %p4991_p3 = scmp.ne.s32.totalorder %s48_s28, %s4990_s24  ;;  %p4996_p5 = scmp.lt.s32.totalorder %s4990_s24, %s4990_s24 }
  0x1a   :  { %p4997_p6 = por %p4996_p5, %p4995_p4 }
  0x1c   :  { %p4998_p7 = pnand %p4997_p6, %p4991_p3 }
  0x1e   :  { %5001 = shalt.err (!%p4998_p7)
}
  0x1f   :  { %50 = dma.hbm_to_vmem [thread:$0]  %s6008_s1, 32, %s48_s28, [#allocation7]  }
  0x20   :  { %s5002_s0 = scalar_lea.hbm %s5983_s3, 16 }
  0x21   :  { %p5003_p8 = scmp.ne.s32.totalorder %s5983_s3, %s5002_s0  ;;  %p5006_p9 = scmp.lt.u32.totalorder %s5002_s0, %s5983_s3 }
  0x23   :  { %p5008_p10 = pnand %p5006_p9, %p5003_p8 }
  0x25   :  { %5011 = shalt.err (!%p5008_p10)
}
  0x26   :  { %s5012_s2 = scalar_lea.vmem %s68_s30, 16  ;;  %s5016_s23 = scalar_lea.vmem %s68_s30, 32 }
  0x27   :  { %p5013_p11 = scmp.ne.s32.totalorder %s68_s30, %s5012_s2  ;;  %p5017_p12 = scmp.lt.s32.totalorder %s68_s30, %s68_s30 }
  0x28   :  { %p5018_p13 = scmp.lt.s32.totalorder %s5016_s23, %s5012_s2 }
  0x2a   :  { %p5019_p0 = por %p5018_p13, %p5017_p12 }
  0x2c   :  { %p5020_p1 = pnand %p5019_p0, %p5013_p11 }
  0x2e   :  { %5023 = shalt.err (!%p5020_p1)
}
  0x2f   :  { %70 = dma.hbm_to_vmem [thread:$0]  %s5983_s3, 16, %s68_s30, [#allocation10]  }
  0x30   :  { %s5214_s24 = smov [#allocation12]   ;;  %s5024_s29 = scalar_lea.hbm %s5986_s6, 2048 }
  0x31   :  { %s90_s25 = sshll.u32 %s5214_s24, 4  ;;  %p5025_p2 = scmp.ne.s32.totalorder %s5986_s6, %s5024_s29  ;;  %s91_s25 = int_to_ptr.vmem [resolvable:$true] %s90_s25 }
  0x32   :  { %p5028_p3 = scmp.lt.u32.totalorder %s5024_s29, %s5986_s6 }
  0x34   :  { %p5030_p4 = pnand %p5028_p3, %p5025_p2 }
  0x36   :  { %5033 = shalt.err (!%p5030_p4)
}
  0x37   :  { %s5034_s22 = scalar_lea.vmem %s91_s25, 2048  ;;  %p5039_p6 = scmp.lt.s32.totalorder %s91_s25, %s91_s25 }
  0x38   :  { %p5035_p5 = scmp.ne.s32.totalorder %s91_s25, %s5034_s22  ;;  %p5040_p7 = scmp.lt.s32.totalorder %s5034_s22, %s5034_s22 }
  0x3a   :  { %p5041_p8 = por %p5040_p7, %p5039_p6 }
  0x3c   :  { %p5042_p9 = pnand %p5041_p8, %p5035_p5 }
  0x3e   :  { %5045 = shalt.err (!%p5042_p9)
}
  0x3f   :  { %s6002_s3 = smov 64   ;;  %s6004_s30 = smov 4  }
  0x40   :  { %96 = dma.hbm_to_vmem [thread:$0]  %s5986_s6, 2048, %s91_s25, [#allocation13], %s6002_s3, %s6002_s3, %s6004_s30  }
  0x41   :  { %s5217_s28 = smov [#allocation15]   ;;  %s5218_s24 = smov [#allocation3]  }
  0x42   :  { %s122_s1 = sshll.u32 %s5217_s28, 4  ;;  %s34_s26 = sshll.u32 %s5218_s24, 4  ;;  %s123_s1 = int_to_ptr.vmem [resolvable:$true] %s122_s1  ;;  %s35_s26 = int_to_ptr.vmem [resolvable:$true] %s34_s26 }
  0x43   :  { %s5046_s0 = scalar_lea.hbm %s5992_s12, 4096 }
  0x44   :  { %p5047_p10 = scmp.ne.s32.totalorder %s5992_s12, %s5046_s0  ;;  %p5050_p11 = scmp.lt.u32.totalorder %s5046_s0, %s5992_s12 }
  0x46   :  { %p5052_p12 = pnand %p5050_p11, %p5047_p10 }
  0x48   :  { %5055 = shalt.err (!%p5052_p12)
}
  0x49   :  { %s5056_s6 = scalar_lea.vmem %s123_s1, 4096  ;;  %p5061_p0 = scmp.lt.s32.totalorder %s123_s1, %s123_s1 }
  0x4a   :  { %p5057_p13 = scmp.ne.s32.totalorder %s123_s1, %s5056_s6  ;;  %p5062_p1 = scmp.lt.s32.totalorder %s5056_s6, %s5056_s6 }
  0x4c   :  { %p5063_p2 = por %p5062_p1, %p5061_p0 }
  0x4e   :  { %p5064_p3 = pnand %p5063_p2, %p5057_p13 }
  0x50   :  { %5067 = shalt.err (!%p5064_p3)
}
  0x51   :  { %128 = dma.hbm_to_vmem [thread:$0]  %s5992_s12, 4096, %s123_s1, [#allocation16], %s6002_s3, %s6002_s3, %s6004_s30  }
  0x52   :  { %s6009_s24 = sld [smem:[#allocation25_spill]] }
  0x58   :  { %s5068_s27 = scalar_lea.hbm %s6009_s24, 256 }
  0x59   :  { %p5069_p4 = scmp.ne.s32.totalorder %s6009_s24, %s5068_s27  ;;  %p5072_p5 = scmp.lt.u32.totalorder %s5068_s27, %s6009_s24 }
  0x5b   :  { %p5074_p6 = pnand %p5072_p5, %p5069_p4 }
  0x5d   :  { %5077 = shalt.err (!%p5074_p6)
}
  0x5e   :  { %s5078_s20 = scalar_lea.vmem %s35_s26, 256  ;;  %p5083_p8 = scmp.lt.s32.totalorder %s35_s26, %s35_s26 }
  0x5f   :  { %p5079_p7 = scmp.ne.s32.totalorder %s35_s26, %s5078_s20  ;;  %p5084_p9 = scmp.lt.s32.totalorder %s5078_s20, %s5078_s20 }
  0x61   :  { %p5085_p10 = por %p5084_p9, %p5083_p8 }
  0x63   :  { %p5086_p11 = pnand %p5085_p10, %p5079_p7 }
  0x65   :  { %5089 = shalt.err (!%p5086_p11)
}
  0x66   :  { %s5219_s12 = smov 128   ;;  %s5220_s1 = smov 8  }
  0x67   :  { %40 = dma.hbm_to_vmem [thread:$0]  %s6009_s24, 256, %s35_s26, [#allocation4], %s5219_s12, %s5219_s12, %s5220_s1  }
  0x68   :  { %s5221_s25 = smov [#allocation8]   ;;  %s5222_s23 = smov [#allocation11]  }
  0x69   :  { %s57_s2 = sshll.u32 %s5221_s25, 4  ;;  %s76_s28 = sshll.u32 %s5222_s23, 4  ;;  %s58_s2 = int_to_ptr.vmem [resolvable:$true] %s57_s2  ;;  %s77_s28 = int_to_ptr.vmem [resolvable:$true] %s76_s28 }
  0x6a   :  { %s6010_s0 = sld [smem:[#allocation27_spill]] }
  0x70   :  { %s5090_s19 = scalar_lea.hbm %s6010_s0, 16 }
  0x71   :  { %p5091_p12 = scmp.ne.s32.totalorder %s6010_s0, %s5090_s19  ;;  %p5094_p13 = scmp.lt.u32.totalorder %s5090_s19, %s6010_s0 }
  0x73   :  { %p5096_p0 = pnand %p5094_p13, %p5091_p12 }
  0x75   :  { %5099 = shalt.err (!%p5096_p0)
}
  0x76   :  { %s5100_s26 = scalar_lea.vmem %s58_s2, 16  ;;  %s5104_s24 = scalar_lea.vmem %s58_s2, 32 }
  0x77   :  { %p5101_p1 = scmp.ne.s32.totalorder %s58_s2, %s5100_s26  ;;  %p5105_p2 = scmp.lt.s32.totalorder %s58_s2, %s58_s2 }
  0x78   :  { %p5106_p3 = scmp.lt.s32.totalorder %s5104_s24, %s5100_s26 }
  0x7a   :  { %p5107_p4 = por %p5106_p3, %p5105_p2 }
  0x7c   :  { %p5108_p5 = pnand %p5107_p4, %p5101_p1 }
  0x7e   :  { %5111 = shalt.err (!%p5108_p5)
}
  0x7f   :  { %60 = dma.hbm_to_vmem [thread:$0]  %s6010_s0, 16, %s58_s2, [#allocation7]  }
  0x80   :  { %s5112_s3 = scalar_lea.hbm %s5984_s4, 6144 }
  0x81   :  { %p5113_p6 = scmp.ne.s32.totalorder %s5984_s4, %s5112_s3  ;;  %p5116_p7 = scmp.lt.u32.totalorder %s5112_s3, %s5984_s4 }
  0x83   :  { %p5118_p8 = pnand %p5116_p7, %p5113_p6 }
  0x85   :  { %5121 = shalt.err (!%p5118_p8)
}
  0x86   :  { %s5122_s21 = scalar_lea.vmem %s77_s28, 6144  ;;  %p5127_p10 = scmp.lt.s32.totalorder %s77_s28, %s77_s28 }
  0x87   :  { %p5123_p9 = scmp.ne.s32.totalorder %s77_s28, %s5122_s21  ;;  %p5128_p11 = scmp.lt.s32.totalorder %s5122_s21, %s5122_s21 }
  0x89   :  { %p5129_p12 = por %p5128_p11, %p5127_p10 }
  0x8b   :  { %p5130_p13 = pnand %p5129_p12, %p5123_p9 }
  0x8d   :  { %5133 = shalt.err (!%p5130_p13)
}
  0x8e   :  { %s5223_s2 = smov 192   ;;  %s5224_s0 = smov 12  }
  0x8f   :  { %82 = dma.hbm_to_vmem [thread:$0]  %s5984_s4, 6144, %s77_s28, [#allocation10], %s5223_s2, %s5223_s2, %s5224_s0  }
  0x90   :  { %s5225_s24 = smov [#allocation14]   ;;  %s5226_s6 = smov [#allocation17]  }
  0x91   :  { %s108_s22 = sshll.u32 %s5225_s24, 4  ;;  %s140_s25 = sshll.u32 %s5226_s6, 4  ;;  %s109_s22 = int_to_ptr.vmem [resolvable:$true] %s108_s22  ;;  %s141_s25 = int_to_ptr.vmem [resolvable:$true] %s140_s25 }
  0x92   :  { %s5134_s30 = scalar_lea.hbm %s5990_s10, 4096 }
  0x93   :  { %p5135_p0 = scmp.ne.s32.totalorder %s5990_s10, %s5134_s30  ;;  %p5138_p1 = scmp.lt.u32.totalorder %s5134_s30, %s5990_s10 }
  0x95   :  { %p5140_p2 = pnand %p5138_p1, %p5135_p0 }
  0x97   :  { %5143 = shalt.err (!%p5140_p2)
}
  0x98   :  { %s5144_s4 = scalar_lea.vmem %s109_s22, 4096  ;;  %p5149_p4 = scmp.lt.s32.totalorder %s109_s22, %s109_s22 }
  0x99   :  { %p5145_p3 = scmp.ne.s32.totalorder %s109_s22, %s5144_s4  ;;  %p5150_p5 = scmp.lt.s32.totalorder %s5144_s4, %s5144_s4 }
  0x9b   :  { %p5151_p6 = por %p5150_p5, %p5149_p4 }
  0x9d   :  { %p5152_p7 = pnand %p5151_p6, %p5145_p3 }
  0x9f   :  { %5155 = shalt.err (!%p5152_p7)
}
  0xa0   :  { %114 = dma.hbm_to_vmem [thread:$0]  %s5990_s10, 4096, %s109_s22, [#allocation13], %s5219_s12, %s5219_s12, %s5220_s1  }
  0xa1   :  { %s5156_s26 = scalar_lea.hbm %s5996_s16, 1024 }
  0xa2   :  { %p5157_p8 = scmp.ne.s32.totalorder %s5996_s16, %s5156_s26  ;;  %p5160_p9 = scmp.lt.u32.totalorder %s5156_s26, %s5996_s16 }
  0xa4   :  { %p5162_p10 = pnand %p5160_p9, %p5157_p8 }
  0xa6   :  { %5165 = shalt.err (!%p5162_p10)
}
  0xa7   :  { %s5166_s30 = scalar_lea.vmem %s141_s25, 1024  ;;  %p5171_p12 = scmp.lt.s32.totalorder %s141_s25, %s141_s25 }
  0xa8   :  { %p5167_p11 = scmp.ne.s32.totalorder %s141_s25, %s5166_s30  ;;  %p5172_p13 = scmp.lt.s32.totalorder %s5166_s30, %s5166_s30 }
  0xaa   :  { %p5173_p0 = por %p5172_p13, %p5171_p12 }
  0xac   :  { %p5174_p1 = pnand %p5173_p0, %p5167_p11 }
  0xae   :  { %5177 = shalt.err (!%p5174_p1)
}
  0xaf   :  { %s6011_s10 = smov 4   ;;  %s6012_s12 = smov 64  }
  0xb0   :  { %146 = dma.hbm_to_vmem [thread:$0]  %s5996_s16, 1024, %s141_s25, [#allocation16], %s6012_s12, %s6012_s12, %s6011_s10  }
  0xb1   :  { %5200 = dma.done.wait [#allocation4], 256  }
  0xb2   :  { %5201 = vsyncadd [#allocation4], 4294967040 }
  0xb3   :  { %5202 = dma.done.wait [#allocation7], 48  }
  0xb4   :  { %5203 = vsyncadd [#allocation7], 4294967248 }
  0xb5   :  { %5204 = dma.done.wait [#allocation10], 6160  }
  0xb6   :  { %5205 = vsyncadd [#allocation10], 4294961136 }
  0xb7   :  { %5206 = dma.done.wait [#allocation13], 6144  }
  0xb8   :  { %5207 = vsyncadd [#allocation13], 4294961152 }
  0xb9   :  { %5208 = dma.done.wait [#allocation16], 5120  }
  0xba   :  { %5209 = vsyncadd [#allocation16], 4294962176  ;;  %v177_v0 = vld [vmem:[#allocation3] sm:$0xff]  ;;  %v178_v1 = vld [vmem:[#allocation3 + $0x8] sm:$0xff]  ;;  %v5227_v4 = vmov 0.0   ;;  %v5228_v30 = vmov 0   ;;  %v255_v53 = vlaneseq }
  0xbb   :  { %181 = vadd.xlane.f32.xlu0 %v177_v0  ;;  %v4700_v2 = vld [vmem:[#allocation11 + $0x4] ss:$12 sps:$4 sm:$0xff]   ;;  %v4702_v3 = vld [vmem:[#allocation11] ss:$12 sps:$4 sm:$0xff]   ;;  %4367 = vmatprep.subr.bf16.mxu1 %v5227_v4  ;;  %v4703_v5 = vld [vmem:[#allocation11 + $0x8] ss:$12 sps:$4 sm:$0xff]  }
  0xbc   :  { %v4704_v6 = vld [vmem:[#allocation11 + $0x1c] ss:$12 sps:$4 sm:$0xff]   ;;  %398 = vmatprep.subr.bf16.mxu0 %v4700_v2  ;;  %4368 = vmatpush3.bf16.msra.mxu1 %v4703_v5  ;;  %v4706_v15 = vld [vmem:[#allocation11 + $0x18] ss:$12 sps:$4 sm:$0xff]   ;;  %v4707_v16 = vld [vmem:[#allocation11 + $0x20] ss:$12 sps:$4 sm:$0xff]  }
  0xbd   :  { %399 = vmatpush1.bf16.msra.mxu0 %v4702_v3  ;;  %4369 = vmatprep.subr.bf16.mxu1 %v5227_v4  ;;  %v4708_v17 = vld [vmem:[#allocation11 + $0x34] ss:$12 sps:$4 sm:$0xff]   ;;  %v4710_v18 = vld [vmem:[#allocation11 + $0x30] ss:$12 sps:$4 sm:$0xff]   ;;  %v4711_v19 = vld [vmem:[#allocation11 + $0x38] ss:$12 sps:$4 sm:$0xff]  }
  0xbe   :  { %400 = vmatprep.subr.bf16.mxu0 %v4704_v6  ;;  %v4712_v20 = vld [vmem:[#allocation11 + $0x4c] ss:$12 sps:$4 sm:$0xff]   ;;  %v4714_v21 = vld [vmem:[#allocation11 + $0x48] ss:$12 sps:$4 sm:$0xff]   ;;  %v4715_v22 = vld [vmem:[#allocation11 + $0x50] ss:$12 sps:$4 sm:$0xff]   ;;  %430 = vmatprep.mubr.bf16.mxu0 %v5228_v30 }
  0xbf   :  { %183 = vadd.xlane.f32.xlu0 %v178_v1  ;;  %v4716_v23 = vld [vmem:[#allocation11 + $0x64] ss:$12 sps:$4 sm:$0xff]   ;;  %v4718_v24 = vld [vmem:[#allocation11 + $0x60] ss:$12 sps:$4 sm:$0xff]   ;;  %v4719_v25 = vld [vmem:[#allocation11 + $0x68] ss:$12 sps:$4 sm:$0xff]  }
  0xc0   :  { %4370 = vmatpush3.bf16.msra.mxu1 %v4707_v16  ;;  %v4720_v26 = vld [vmem:[#allocation11 + $0x7c] ss:$12 sps:$4 sm:$0xff]   ;;  %v4722_v27 = vld [vmem:[#allocation11 + $0x78] ss:$12 sps:$4 sm:$0xff]   ;;  %v4723_v28 = vld [vmem:[#allocation11 + $0x80] ss:$12 sps:$4 sm:$0xff]  }
  0xc1   :  { %401 = vmatpush1.bf16.msra.mxu0 %v4706_v15  ;;  %4371 = vmatprep.subr.bf16.mxu1 %v5227_v4  ;;  %v4724_v29 = vld [vmem:[#allocation11 + $0x94] ss:$12 sps:$4 sm:$0xff]   ;;  %vm5229_vm0 = vmmov 0   ;;  %v4726_v31 = vld [vmem:[#allocation11 + $0x90] ss:$12 sps:$4 sm:$0xff]   ;;  %v5484_v54 = vshrl.u32 %v255_v53, 7 }
  0xc2   :  { %402 = vmatprep.subr.bf16.mxu0 %v4708_v17  ;;  %4383 = vmatprep.mubr.msk.bf16.mxu1 %vm5229_vm0, %v5227_v4  ;;  %v4727_v32 = vld [vmem:[#allocation11 + $0x98] ss:$12 sps:$4 sm:$0xff]   ;;  %v4730_v34 = vld [vmem:[#allocation11 + $0xa8] ss:$12 sps:$4 sm:$0xff]   ;;  %v4731_v35 = vld [vmem:[#allocation11 + $0xb0] ss:$12 sps:$4 sm:$0xff]  }
  0xc3   :  { %v4728_v33 = vld [vmem:[#allocation11 + $0xac] ss:$12 sps:$4 sm:$0xff]   ;;  %v4003_v44 = vld [vmem:[#allocation8] ss:$0 sm:$0xff]  ;;  %v4004_v48 = vld [vmem:[#allocation9] ss:$0 sm:$0xff] }
  0xc4   :  { %4372 = vmatpush3.bf16.msra.mxu1 %v4711_v19  ;;  %v5487_v55 = vsub.s32 1, %v5484_v54  ;;  %v253_v56 = vld [vmem:[%s5985_s5] sm:$0x7]  ;;  %v5493_v57 = vsub.s32 0, %v5484_v54  ;;  %v265_v58 = vsub.s32 2, %v5484_v54  ;;  %vm485_vm1 = vcmask 261120  }
  0xc5   :  { %403 = vmatpush1.bf16.msra.mxu0 %v4710_v18  ;;  %4373 = vmatprep.subr.bf16.mxu1 %v5227_v4  ;;  %vm555_vm2 = vcmask 1043456   ;;  %v5512_v19 = vld [vmem:[#allocation6] ss:$0 sm:$0xff]  ;;  %vm538_vm3 = vcmask 64512   ;;  %s5230_s27 = smov 96   ;;  %s5231_s29 = smov 32  }
  0xc6   :  { %404 = vmatprep.subr.bf16.mxu0 %v4712_v20  ;;  %v262_v59 = vrot.slane %v253_v56, %v5487_v55  ;;  %v258_v62 = vrot.slane %v253_v56, %v5493_v57  ;;  %v266_v63 = vrot.slane %v253_v56, %v265_v58  ;;  %vm719_vm4 = vcmask 523520  }
  0xc7   :  { %vm837_vm5 = vcmask 785920   ;;  %vm955_vm6 = vcmask 1048320  }
  0xc8   :  { %4374 = vmatpush3.bf16.msra.mxu1 %v4715_v22 }
  0xc9   :  { %405 = vmatpush1.bf16.msra.mxu0 %v4714_v21  ;;  %4375 = vmatprep.subr.bf16.mxu1 %v5227_v4 }
  0xca   :  { %406 = vmatprep.subr.bf16.mxu0 %v4716_v23 }
  0xcc   :  { %4376 = vmatpush3.bf16.msra.mxu1 %v4719_v25 }
  0xcd   :  { %407 = vmatpush1.bf16.msra.mxu0 %v4718_v24  ;;  %4377 = vmatprep.subr.bf16.mxu1 %v5227_v4 }
  0xce   :  { %408 = vmatprep.subr.bf16.mxu0 %v4720_v26 }
  0xd0   :  { %4378 = vmatpush3.bf16.msra.mxu1 %v4723_v28 }
  0xd1   :  { %409 = vmatpush1.bf16.msra.mxu0 %v4722_v27  ;;  %4379 = vmatprep.subr.bf16.mxu1 %v5227_v4 }
  0xd2   :  { %410 = vmatprep.subr.bf16.mxu0 %v4724_v29 }
  0xd4   :  { %4380 = vmatpush3.bf16.msra.mxu1 %v4727_v32 }
  0xd5   :  { %411 = vmatpush1.bf16.msra.mxu0 %v4726_v31  ;;  %4381 = vmatprep.subr.bf16.mxu1 %v5227_v4 }
  0xd6   :  { %412 = vmatprep.subr.bf16.mxu0 %v4728_v33 }
  0xd8   :  { %4382 = vmatpush3.bf16.msra.mxu1 %v4731_v35 }
  0xd9   :  { %413 = vmatpush1.bf16.msra.mxu0 %v4730_v34  ;;  %4387 = vmatprep.subr.bf16.mxu1 %v5227_v4 }
  0xda   :  { %4411 = vmatprep.subr.bf16.mxu0 %v5227_v4 }
 0x148   :  { %v182_v7 = vpop.xlane.xlu0 %181 }
 0x149   :  { %v186_v8 = vmul.f32 0.0078125, %v182_v7 }
 0x14b   :  { %v5453_v9 = vsub.f32 %v177_v0, %v186_v8 }
 0x14c   :  { %v184_v10 = vpop.xlane.xlu0 %183 }
 0x14d   :  { %v187_v11 = vmul.f32 0.0078125, %v184_v10  ;;  %v190_v12 = vmul.f32 %v5453_v9, %v5453_v9 }
 0x14f   :  { %v5457_v13 = vsub.f32 %v178_v1, %v187_v11  ;;  %192 = vadd.xlane.f32.xlu1 %v190_v12 }
 0x151   :  { %v191_v14 = vmul.f32 %v5457_v13, %v5457_v13 }
 0x153   :  { %194 = vadd.xlane.f32.xlu1 %v191_v14 }
 0x1dc   :  { %v193_v36 = vpop.xlane.xlu1 %192 }
 0x1dd   :  { %v196_v37 = vmul.f32 0.0078125, %v193_v36 }
 0x1df   :  { %v198_v38 = vadd.f32 1e-05, %v196_v37 }
 0x1e0   :  { %v195_v39 = vpop.xlane.xlu1 %194 }
 0x1e1   :  { %4876 = vrsqrt.f32 %v198_v38  ;;  %v197_v40 = vmul.f32 0.0078125, %v195_v39 }
 0x1e3   :  { %v199_v41 = vadd.f32 1e-05, %v197_v40 }
 0x1e5   :  { %4878 = vrsqrt.f32 %v199_v41 }
 0x1eb   :  { %v4877_v42 = vpop.eup %4876 }
 0x1ec   :  { %v202_v43 = vmul.f32 %v4877_v42, %v5453_v9 }
 0x1ee   :  { %v210_v47 = vmul.f32 %v4003_v44, %v202_v43 }
 0x1ef   :  { %v4879_v45 = vpop.eup %4878 }
 0x1f0   :  { %v203_v46 = vmul.f32 %v4879_v45, %v5457_v13  ;;  %v5474_v50 = vadd.f32 %v4004_v48, %v210_v47 }
 0x1f2   :  { %v211_v49 = vmul.f32 %v4003_v44, %v203_v46 }
 0x1f4   :  { %v5476_v51 = vadd.f32 %v4004_v48, %v211_v49 }
 0x1f6   :  { %v220_v52 = vpack.c.bf16 %v5476_v51, %v5474_v50 }
 0x1f8   :  { %431 = vmatmul.mubr.bf16.vlgmr.msra.gmra.mrb[0].mxu0 %v220_v52  ;;  %4384 = vmatmul.mubr.bf16.vlgmr.msra.gmra.mrb[0].mxu1 %v220_v52 }
 0x1f9   :  { %4389 = vmatprep.mubr.msk.bf16.mxu1 %vm5229_vm0, %v5227_v4  ;;  %4413 = vmatprep.mubr.msk.bf16.mxu0 %vm5229_vm0, %v5227_v4 }
 0x2cb   :  { %v432_v60 = vpop.f32.mrb[0].mxu0  ;;  %v475_v61 = vpop.f32.mrb[0].mxu1 }
 0x2cc   :  { %v434_v0 = vpop.f32.mrb[1].mxu0  ;;  %v4385_v1 = vpop.f32.mrb[1].mxu1  ;;  %v476_v12 = vadd.f32 %v475_v61, %v266_v63  ;;  %v433_v14 = vadd.f32 %v432_v60, %v258_v62 }
 0x2cd   :  { %v435_v2 = vadd.f32 %v434_v0, %v262_v59  ;;  %v436_v3 = vpop.f32.mrb[2].mxu0  ;;  %v478_v5 = vpop.f32.mrb[2].mxu1 }
 0x2ce   :  { %v437_v6 = vadd.f32 %v436_v3, %v258_v62  ;;  %v5500_v7 = vadd.f32 %v478_v5, %v266_v63  ;;  %v438_v8 = vpop.f32.mrb[3].mxu0  ;;  %v4386_v9 = vpop.f32.mrb[3].mxu1  ;;  %v5504_v15 = vpack.c.bf16 %v476_v12, %v476_v12  ;;  %v483_v16 = vpack.c.bf16 %v433_v14, %v433_v14 }
 0x2cf   :  { %v484_v10 = vpack.c.bf16 %v435_v2, %v435_v2  ;;  %v439_v11 = vadd.f32 %v438_v8, %v262_v59 }
 0x2d0   :  { %v557_v17 = vsel %vm555_vm2, %v5504_v15, 0  ;;  %v958_v33 = vpack.c.bf16 %v437_v6, %v437_v6 }
 0x2d1   :  { %v490_v13 = vsel %vm485_vm1, %v484_v10, 0  ;;  %v959_v26 = vpack.c.bf16 %v439_v11, %v439_v11 }
 0x2d2   :  { %4388 = vmatpush3.bf16.xpose.msra.mxu1 %v490_v13 }
 0x2d3   :  { %4393 = vmatprep.subr.bf16.mxu1 %v5227_v4  ;;  %v964_v47 = vsel %vm485_vm1, %v959_v26, 0 }
 0x2d9   :  { %4390 = vmatmul.mubr.msk.bf16.vlgmr.msra.gmra.mrb[4].mxu1 %vm485_vm1, %v483_v16 }
 0x2da   :  { %4394 = vmatpush3.bf16.msra.mxu1 %v557_v17  ;;  %4395 = vmatprep.mubr.msk.bf16.mxu1 %vm5229_vm0, %v5227_v4 }
 0x2db   :  { %4399 = vmatprep.subr.bf16.mxu1 %v5227_v4 }
 0x3ac   :  { %v526_v18 = vpop.f32.mrb[4].mxu1 }
 0x3ad   :  { %v532_v20 = vmul.f32 0.17677669, %v526_v18  ;;  %v4391_v21 = vpop.f32.mrb[5].mxu1 }
 0x3ae   :  { %v529_v22 = vpop.f32.mrb[6].mxu1 }
 0x3af   :  { %v4392_v23 = vpop.f32.mrb[7].mxu1  ;;  %v537_v24 = vadd.f32 %v5512_v19, %v532_v20 }
 0x3b1   :  { %v539_v25 = vsel %vm538_vm3, %v537_v24, -inf }
 0x3b2   :  { %540 = vmax.xlane.f32.xlu0 %v539_v25 }
 0x3c8   :  { %604 = vrot.lane.b32.xlu0 %v484_v10, %s5230_s27 }
 0x3cc   :  { %841 = vrot.lane.b32.xlu0 %v484_v10, %s5231_s29 }
 0x3d0   :  { %1076 = vrot.lane.b32.xlu0 %v959_v26, %s5230_s27 }
 0x3d4   :  { %1194 = vrot.lane.b32.xlu0 %v959_v26, %s6012_s12 }
 0x3d8   :  { %1311 = vrot.lane.b32.xlu0 %v959_v26, %s5231_s29 }
 0x43f   :  { %v541_v27 = vpop.xlane.xlu0 %540 }
 0x440   :  { %v542_v28 = vsub.f32 %v537_v24, %v541_v27 }
 0x442   :  { %v543_v29 = vmul.f32 1.442695, %v542_v28 }
 0x443   :  { %v605_v36 = vpop.permute.xlu0 %604 }
 0x444   :  { %4880 = vpow2.f32 %v543_v29  ;;  %v610_v43 = vsel %vm485_vm1, %v605_v36, 0  ;;  %v4039_v29 = vld [vmem:[#allocation6 + $0x1] ss:$0 sm:$0xff] }
 0x447   :  { %v842_v41 = vpop.permute.xlu0 %841 }
 0x448   :  { %v847_v45 = vsel %vm485_vm1, %v842_v41, 0 }
 0x44b   :  { %v1077_v48 = vpop.permute.xlu0 %1076 }
 0x44c   :  { %v1082_v49 = vsel %vm485_vm1, %v1077_v48, 0 }
 0x44e   :  { %v4881_v31 = vpop.eup %4880 }
 0x44f   :  { %v545_v32 = vsel %vm538_vm3, %v4881_v31, 0.0  ;;  %v1195_v52 = vpop.permute.xlu0 %1194 }
 0x450   :  { %546 = vadd.xlane.f32.xlu1 %v545_v32  ;;  %v1200_v56 = vsel %vm485_vm1, %v1195_v52, 0 }
 0x453   :  { %v1312_v59 = vpop.permute.xlu0 %1311 }
 0x454   :  { %v1317_v61 = vsel %vm485_vm1, %v1312_v59, 0 }
 0x461   :  { %601 = vrot.lane.b32.xlu1 %v483_v16, %s5230_s27 }
 0x465   :  { %723 = vrot.lane.b32.xlu1 %v484_v10, %s6012_s12 }
 0x469   :  { %721 = vrot.lane.b32.xlu1 %v483_v16, %s6012_s12 }
 0x46d   :  { %839 = vrot.lane.b32.xlu1 %v483_v16, %s5231_s29 }
 0x471   :  { %1073 = vrot.lane.b32.xlu1 %v958_v33, %s5230_s27 }
 0x475   :  { %1192 = vrot.lane.b32.xlu1 %v958_v33, %s6012_s12 }
 0x479   :  { %1309 = vrot.lane.b32.xlu1 %v958_v33, %s5231_s29 }
 0x4dd   :  { %v547_v34 = vpop.xlane.xlu1 %546 }
 0x4de   :  { %4882 = vrcp.f32 %v547_v34 }
 0x4e1   :  { %v602_v35 = vpop.permute.xlu1 %601 }
 0x4e5   :  { %v724_v37 = vpop.permute.xlu1 %723 }
 0x4e6   :  { %v729_v38 = vsel %vm485_vm1, %v724_v37, 0 }
 0x4e7   :  { %4412 = vmatpush3.bf16.xpose.msra.mxu0 %v729_v38 }
 0x4e8   :  { %v4883_v39 = vpop.eup %4882  ;;  %4423 = vmatprep.subr.bf16.mxu0 %v5227_v4 }
 0x4e9   :  { %v549_v40 = vmul.f32 %v4883_v39, %v4881_v31  ;;  %v722_v44 = vpop.permute.xlu1 %721 }
 0x4eb   :  { %v550_v42 = vpack.c.bf16 %v549_v40, %v549_v40 }
 0x4ed   :  { %4396 = vmatmul.mubr.msk.bf16.vlgmr.msra.gmra.mrb[8].mxu1 %vm538_vm3, %v550_v42  ;;  %v840_v46 = vpop.permute.xlu1 %839 }
 0x4ee   :  { %4400 = vmatpush3.bf16.xpose.msra.mxu1 %v610_v43  ;;  %4414 = vmatmul.mubr.msk.bf16.vlgmr.msra.gmra.mrb[4].mxu0 %vm485_vm1, %v722_v44 }
 0x4ef   :  { %4424 = vmatpush3.bf16.xpose.msra.mxu0 %v847_v45  ;;  %4401 = vmatprep.mubr.msk.bf16.mxu1 %vm5229_vm0, %v5227_v4 }
 0x4f0   :  { %4425 = vmatprep.mubr.msk.bf16.mxu0 %vm5229_vm0, %v5227_v4  ;;  %4435 = vmatprep.subr.bf16.mxu0 %v5227_v4 }
 0x4f1   :  { %4405 = vmatprep.subr.bf16.mxu1 %v5227_v4  ;;  %v1074_v53 = vpop.permute.xlu1 %1073 }
 0x4f5   :  { %4402 = vmatmul.mubr.msk.bf16.vlgmr.msra.gmra.mrb[12].mxu1 %vm485_vm1, %v602_v35  ;;  %v1193_v60 = vpop.permute.xlu1 %1192 }
 0x4f6   :  { %4426 = vmatmul.mubr.msk.bf16.vlgmr.msra.gmra.mrb[8].mxu0 %vm485_vm1, %v840_v46  ;;  %4407 = vmatprep.mubr.msk.bf16.mxu1 %vm5229_vm0, %v5227_v4 }
 0x4f7   :  { %4436 = vmatpush3.bf16.xpose.msra.mxu0 %v964_v47  ;;  %4437 = vmatprep.mubr.msk.bf16.mxu0 %vm5229_vm0, %v5227_v4 }
 0x4f8   :  { %4447 = vmatprep.subr.bf16.mxu0 %v5227_v4 }
 0x4f9   :  { %v1310_v62 = vpop.permute.xlu1 %1309 }
 0x4fe   :  { %4438 = vmatmul.mubr.msk.bf16.vlgmr.msra.gmra.mrb[12].mxu0 %vm485_vm1, %v958_v33 }
 0x4ff   :  { %4448 = vmatpush3.bf16.xpose.msra.mxu0 %v1082_v49  ;;  %4449 = vmatprep.mubr.msk.bf16.mxu0 %vm5229_vm0, %v5227_v4 }
 0x500   :  { %4459 = vmatprep.subr.bf16.mxu0 %v5227_v4 }
 0x506   :  { %4450 = vmatmul.mubr.msk.bf16.vlgmr.msra.gmra.mrb[16].mxu0 %vm485_vm1, %v1074_v53 }
 0x507   :  { %4460 = vmatpush3.bf16.xpose.msra.mxu0 %v1200_v56  ;;  %4461 = vmatprep.mubr.msk.bf16.mxu0 %vm5229_vm0, %v5227_v4 }
 0x508   :  { %4471 = vmatprep.subr.bf16.mxu0 %v5227_v4 }
 0x50e   :  { %4462 = vmatmul.mubr.msk.bf16.vlgmr.msra.gmra.mrb[20].mxu0 %vm485_vm1, %v1193_v60 }
 0x50f   :  { %4472 = vmatpush3.bf16.xpose.msra.mxu0 %v1317_v61  ;;  %4473 = vmatprep.mubr.msk.bf16.mxu0 %vm5229_vm0, %v5227_v4 }
 0x510   :  { %4483 = vmatprep.subr.bf16.mxu0 %v5227_v4 }
 0x516   :  { %4474 = vmatmul.mubr.msk.bf16.vlgmr.msra.gmra.mrb[24].mxu0 %vm485_vm1, %v1310_v62 }
 0x517   :  { %4499 = vmatprep.mubr.msk.bf16.mxu0 %vm5229_vm0, %v5227_v4 }
 0x5c0   :  { %v593_v63 = vpop.f32.mrb[8].mxu1 }
 0x5c1   :  { %599 = vst.msk [vmem:[#allocation2] sm:$0xff] %vm485_vm1, %v593_v63  ;;  %v4397_v0 = vpop.f32.mrb[9].mxu1  ;;  %v765_v1 = vpop.f32.mrb[4].mxu0 }
 0x5c2   :  { %v771_v2 = vmul.f32 0.17677669, %v765_v1  ;;  %v596_v3 = vpop.f32.mrb[10].mxu1  ;;  %v4415_v5 = vpop.f32.mrb[5].mxu0 }
 0x5c3   :  { %v4398_v6 = vpop.f32.mrb[11].mxu1  ;;  %v768_v8 = vpop.f32.mrb[6].mxu0 }
 0x5c4   :  { %v4416_v9 = vpop.f32.mrb[7].mxu0  ;;  %v772_v10 = vadd.f32 %v5512_v19, %v771_v2 }
 0x5c6   :  { %v773_v11 = vsel %vm538_vm3, %v772_v10, -inf }
 0x5c7   :  { %774 = vmax.xlane.f32.xlu1 %v773_v11 }
 0x5c8   :  { %v646_v12 = vpop.f32.mrb[12].mxu1 }
 0x5c9   :  { %v652_v13 = vmul.f32 0.17677669, %v646_v12  ;;  %v4403_v14 = vpop.f32.mrb[13].mxu1  ;;  %v883_v16 = vpop.f32.mrb[8].mxu0 }
 0x5ca   :  { %v889_v17 = vmul.f32 0.17677669, %v883_v16  ;;  %v649_v18 = vpop.f32.mrb[14].mxu1  ;;  %v4427_v20 = vpop.f32.mrb[9].mxu0 }
 0x5cb   :  { %v4404_v21 = vpop.f32.mrb[15].mxu1  ;;  %v886_v22 = vpop.f32.mrb[10].mxu0  ;;  %v653_v23 = vadd.f32 %v5512_v19, %v652_v13 }
 0x5cc   :  { %v4428_v24 = vpop.f32.mrb[11].mxu0  ;;  %v890_v26 = vadd.f32 %v5512_v19, %v889_v17 }
 0x5cd   :  { %v654_v25 = vsel %vm538_vm3, %v653_v23, -inf }
 0x5ce   :  { %655 = vmax.xlane.f32.xlu0 %v654_v25  ;;  %v891_v28 = vsel %vm538_vm3, %v890_v26, -inf }
 0x5d1   :  { %v1000_v27 = vpop.f32.mrb[12].mxu0 }
 0x5d2   :  { %v1006_v31 = vmul.f32 0.17677669, %v1000_v27  ;;  %v4439_v32 = vpop.f32.mrb[13].mxu0  ;;  %892 = vmax.xlane.f32.xlu0 %v891_v28 }
 0x5d3   :  { %v1003_v33 = vpop.f32.mrb[14].mxu0 }
 0x5d4   :  { %v4440_v34 = vpop.f32.mrb[15].mxu0  ;;  %v1011_v35 = vadd.f32 %v4039_v29, %v1006_v31 }
 0x5d6   :  { %v1012_v36 = vsel %vm538_vm3, %v1011_v35, -inf }
 0x5d7   :  { %1013 = vmax.xlane.f32.xlu0 %v1012_v36 }
 0x5d9   :  { %v1118_v37 = vpop.f32.mrb[16].mxu0 }
 0x5da   :  { %v1124_v38 = vmul.f32 0.17677669, %v1118_v37  ;;  %v4451_v39 = vpop.f32.mrb[17].mxu0 }
 0x5db   :  { %v1121_v40 = vpop.f32.mrb[18].mxu0 }
 0x5dc   :  { %v4452_v41 = vpop.f32.mrb[19].mxu0  ;;  %v1125_v19 = vadd.f32 %v4039_v29, %v1124_v38 }
 0x5de   :  { %v1126_v42 = vsel %vm538_vm3, %v1125_v19, -inf }
 0x5df   :  { %1127 = vmax.xlane.f32.xlu0 %v1126_v42 }
 0x5e1   :  { %v1236_v43 = vpop.f32.mrb[20].mxu0 }
 0x5e2   :  { %v1242_v44 = vmul.f32 0.17677669, %v1236_v43  ;;  %v4463_v45 = vpop.f32.mrb[21].mxu0 }
 0x5e3   :  { %v1239_v46 = vpop.f32.mrb[22].mxu0 }
 0x5e4   :  { %v4464_v47 = vpop.f32.mrb[23].mxu0  ;;  %v1243_v48 = vadd.f32 %v4039_v29, %v1242_v44 }
 0x5e6   :  { %v1244_v49 = vsel %vm538_vm3, %v1243_v48, -inf }
 0x5e7   :  { %1245 = vmax.xlane.f32.xlu1 %v1244_v49 }
 0x5e9   :  { %v1353_v52 = vpop.f32.mrb[24].mxu0 }
 0x5ea   :  { %v1359_v53 = vmul.f32 0.17677669, %v1353_v52  ;;  %v4475_v56 = vpop.f32.mrb[25].mxu0 }
 0x5eb   :  { %v1356_v59 = vpop.f32.mrb[26].mxu0 }
 0x5ec   :  { %v4476_v60 = vpop.f32.mrb[27].mxu0  ;;  %v1360_v61 = vadd.f32 %v4039_v29, %v1359_v53 }
 0x5ee   :  { %v1361_v62 = vsel %vm538_vm3, %v1360_v61, -inf }
 0x5ef   :  { %1362 = vmax.xlane.f32.xlu0 %v1361_v62 }
 0x654   :  { %v775_v63 = vpop.xlane.xlu1 %774 }
 0x655   :  { %v776_v0 = vsub.f32 %v772_v10, %v775_v63 }
 0x657   :  { %v777_v1 = vmul.f32 1.442695, %v776_v0 }
 0x659   :  { %4884 = vpow2.f32 %v777_v1 }
 0x65b   :  { %v656_v2 = vpop.xlane.xlu0 %655 }
 0x65c   :  { %v657_v3 = vsub.f32 %v653_v23, %v656_v2 }
 0x65e   :  { %v658_v8 = vmul.f32 1.442695, %v657_v3 }
 0x65f   :  { %v893_v5 = vpop.xlane.xlu0 %892 }
 0x660   :  { %v894_v6 = vsub.f32 %v890_v26, %v893_v5 }
 0x662   :  { %v895_v9 = vmul.f32 1.442695, %v894_v6 }
 0x663   :  { %v5578_v11 = vpop.eup %4884 }
 0x664   :  { %4886 = vpow2.f32 %v895_v9  ;;  %v1014_v12 = vpop.xlane.xlu0 %1013  ;;  %v779_v13 = vsel %vm538_vm3, %v5578_v11, 0.0 }
 0x665   :  { %v1015_v14 = vsub.f32 %v1011_v35, %v1014_v12  ;;  %780 = vadd.xlane.f32.xlu0 %v779_v13  ;;  %4888 = vpow2.f32 %v658_v8 }
 0x667   :  { %v1016_v16 = vmul.f32 1.442695, %v1015_v14 }
 0x669   :  { %4890 = vpow2.f32 %v1016_v16 }
 0x66c   :  { %v1128_v10 = vpop.xlane.xlu0 %1127 }
 0x66d   :  { %v1129_v17 = vsub.f32 %v1125_v19, %v1128_v10 }
 0x66e   :  { %v5582_v18 = vpop.eup %4886 }
 0x66f   :  { %v1130_v20 = vmul.f32 1.442695, %v1129_v17  ;;  %v897_v21 = vsel %vm538_vm3, %v5582_v18, 0.0  ;;  %v4889_v22 = vpop.eup %4888 }
 0x670   :  { %898 = vadd.xlane.f32.xlu1 %v897_v21  ;;  %v660_v24 = vsel %vm538_vm3, %v4889_v22, 0.0 }
 0x671   :  { %4892 = vpow2.f32 %v1130_v20 }
 0x673   :  { %v5586_v23 = vpop.eup %4890 }
 0x674   :  { %661 = vadd.xlane.f32.xlu1 %v660_v24  ;;  %v1018_v25 = vsel %vm538_vm3, %v5586_v23, 0.0  ;;  %v1246_v28 = vpop.xlane.xlu1 %1245 }
 0x675   :  { %1019 = vadd.xlane.f32.xlu0 %v1018_v25  ;;  %v1247_v29 = vsub.f32 %v1243_v48, %v1246_v28 }
 0x677   :  { %v1248_v31 = vmul.f32 1.442695, %v1247_v29 }
 0x679   :  { %4894 = vpow2.f32 %v1248_v31 }
 0x67b   :  { %v5591_v26 = vpop.eup %4892 }
 0x67c   :  { %v1132_v27 = vsel %vm538_vm3, %v5591_v26, 0.0  ;;  %v1363_v32 = vpop.xlane.xlu0 %1362 }
 0x67d   :  { %1133 = vadd.xlane.f32.xlu0 %v1132_v27  ;;  %v1364_v33 = vsub.f32 %v1360_v61, %v1363_v32 }
 0x67f   :  { %v1365_v34 = vmul.f32 1.442695, %v1364_v33 }
 0x681   :  { %4896 = vpow2.f32 %v1365_v34 }
 0x683   :  { %v5601_v35 = vpop.eup %4894 }
 0x684   :  { %v1250_v36 = vsel %vm538_vm3, %v5601_v35, 0.0 }
 0x685   :  { %667 = vrot.lane.b32.xlu1 %v5504_v15, %s5230_s27 }
 0x68b   :  { %v5605_v37 = vpop.eup %4896 }
 0x68c   :  { %v1367_v38 = vsel %vm538_vm3, %v5605_v37, 0.0 }
 0x693   :  { %785 = vrot.lane.b32.xlu0 %v5504_v15, %s6012_s12 }
 0x697   :  { %903 = vrot.lane.b32.xlu0 %v5504_v15, %s5231_s29  ;;  %v1024_v15 = vpack.c.bf16 %v5500_v7, %v5500_v7 }
 0x699   :  { %v1029_v0 = vsel %vm555_vm2, %v1024_v15, 0 }
 0x6a9   :  { %1251 = vadd.xlane.f32.xlu1 %v1250_v36 }
 0x6b6   :  { %1368 = vadd.xlane.f32.xlu0 %v1367_v38 }
 0x6ba   :  { %1139 = vrot.lane.b32.xlu1 %v1024_v15, %s5230_s27 }
 0x6be   :  { %1373 = vrot.lane.b32.xlu1 %v1024_v15, %s5231_s29 }
 0x6cc   :  { %1256 = vrot.lane.b32.xlu0 %v1024_v15, %s6012_s12 }
 0x6f2   :  { %v781_v41 = vpop.xlane.xlu0 %780 }
 0x6fd   :  { %v899_v39 = vpop.xlane.xlu1 %898 }
 0x701   :  { %v662_v40 = vpop.xlane.xlu1 %661 }
 0x702   :  { %4898 = vrcp.f32 %v662_v40  ;;  %v1020_v42 = vpop.xlane.xlu0 %1019  ;;  %v4732_v40 = vld [vmem:[#allocation12] sm:$0xff]  }
 0x703   :  { %4900 = vrcp.f32 %v781_v41  ;;  %4484 = vmatpush3.bf16.msra.mxu0 %v4732_v40  ;;  %v4733_v41 = vld [vmem:[#allocation12 + $0x8] sm:$0xff]  }
 0x704   :  { %4902 = vrcp.f32 %v899_v39  ;;  %4485 = vmatprep.subr.bf16.mxu0 %v5227_v4  ;;  %v4760_v40 = vld [vmem:[#allocation14 + $0x64] ss:$8 sps:$4 sm:$0xff]  }
 0x705   :  { %v668_v19 = vpop.permute.xlu1 %667  ;;  %4904 = vrcp.f32 %v1020_v42  ;;  %v4735_v42 = vld [vmem:[#allocation12 + $0x18] sm:$0xff]  }
 0x706   :  { %v673_v43 = vsel %vm555_vm2, %v668_v19, 0  ;;  %v4734_v19 = vld [vmem:[#allocation12 + $0x10] sm:$0xff]  }
 0x707   :  { %4406 = vmatpush3.bf16.msra.mxu1 %v673_v43  ;;  %4486 = vmatpush3.bf16.msra.mxu0 %v4733_v41  ;;  %v4758_v41 = vld [vmem:[#allocation14 + $0x60] ss:$8 sps:$4 sm:$0xff]  }
 0x708   :  { %4417 = vmatprep.subr.bf16.mxu1 %v5227_v4  ;;  %4487 = vmatprep.subr.bf16.mxu0 %v5227_v4 }
 0x70a   :  { %v1134_v44 = vpop.xlane.xlu0 %1133 }
 0x70b   :  { %4906 = vrcp.f32 %v1134_v44  ;;  %4488 = vmatpush3.bf16.msra.mxu0 %v4734_v19  ;;  %v4763_v19 = vld [vmem:[#allocation14 + $0x74] ss:$8 sps:$4 sm:$0xff]  }
 0x70c   :  { %v4899_v7 = vpop.eup %4898  ;;  %4489 = vmatprep.subr.bf16.mxu0 %v5227_v4 }
 0x70d   :  { %v664_v45 = vmul.f32 %v4899_v7, %v4889_v22  ;;  %v4901_v49 = vpop.eup %4900  ;;  %v4736_v7 = vld [vmem:[#allocation12 + $0x20] sm:$0xff]  }
 0x70e   :  { %v786_v46 = vpop.permute.xlu0 %785  ;;  %v783_v52 = vmul.f32 %v4901_v49, %v5578_v11  ;;  %v4903_v59 = vpop.eup %4902 }
 0x70f   :  { %v791_v47 = vsel %vm555_vm2, %v786_v46, 0  ;;  %v665_v48 = vpack.c.bf16 %v664_v45, %v664_v45  ;;  %v901_v61 = vmul.f32 %v4903_v59, %v5582_v18  ;;  %v4905_v63 = vpop.eup %4904  ;;  %4490 = vmatpush3.bf16.msra.mxu0 %v4735_v42  ;;  %v4761_v42 = vld [vmem:[#allocation14 + $0x70] ss:$8 sps:$4 sm:$0xff]  }
 0x710   :  { %v784_v56 = vpack.c.bf16 %v783_v52, %v783_v52  ;;  %v1022_v1 = vmul.f32 %v4905_v63, %v5586_v23  ;;  %4491 = vmatprep.subr.bf16.mxu0 %v5227_v4  ;;  %v4739_v52 = vld [vmem:[#allocation12 + $0x38] sm:$0xff]  }
 0x711   :  { %4408 = vmatmul.mubr.msk.bf16.vlgmr.msra.gmra.mrb[16].mxu1 %vm538_vm3, %v665_v48  ;;  %v902_v62 = vpack.c.bf16 %v901_v61, %v901_v61  ;;  %v4738_v48 = vld [vmem:[#allocation12 + $0x30] sm:$0xff]  }
 0x712   :  { %4418 = vmatpush3.bf16.msra.mxu1 %v791_v47  ;;  %4419 = vmatprep.mubr.msk.bf16.mxu1 %vm5229_vm0, %v5227_v4  ;;  %v904_v53 = vpop.permute.xlu0 %903  ;;  %v1023_v2 = vpack.c.bf16 %v1022_v1, %v1022_v1  ;;  %v4737_v47 = vld [vmem:[#allocation12 + $0x28] sm:$0xff]  }
 0x713   :  { %4429 = vmatprep.subr.bf16.mxu1 %v5227_v4  ;;  %v909_v60 = vsel %vm555_vm2, %v904_v53, 0  ;;  %4492 = vmatpush3.bf16.msra.mxu0 %v4736_v7 }
 0x714   :  { %4493 = vmatprep.subr.bf16.mxu0 %v5227_v4 }
 0x715   :  { %v4907_v3 = vpop.eup %4906 }
 0x716   :  { %v1136_v6 = vmul.f32 %v4907_v3, %v5591_v26 }
 0x717   :  { %4494 = vmatpush3.bf16.msra.mxu0 %v4737_v47 }
 0x718   :  { %v1137_v11 = vpack.c.bf16 %v1136_v6, %v1136_v6  ;;  %4495 = vmatprep.subr.bf16.mxu0 %v5227_v4 }
 0x719   :  { %4420 = vmatmul.mubr.msk.bf16.vlgmr.msra.gmra.mrb[20].mxu1 %vm538_vm3, %v784_v56 }
 0x71a   :  { %4430 = vmatpush3.bf16.msra.mxu1 %v909_v60  ;;  %4431 = vmatprep.mubr.msk.bf16.mxu1 %vm5229_vm0, %v5227_v4 }
 0x71b   :  { %4441 = vmatprep.subr.bf16.mxu1 %v5227_v4  ;;  %4496 = vmatpush3.bf16.msra.mxu0 %v4738_v48 }
 0x71c   :  { %4497 = vmatprep.subr.bf16.mxu0 %v5227_v4 }
 0x71f   :  { %4498 = vmatpush3.bf16.msra.mxu0 %v4739_v52  ;;  %v4056_v52 = vld [vmem:[%s5988_s8] ss:$0 sm:$0xff] }
 0x721   :  { %4432 = vmatmul.mubr.msk.bf16.vlgmr.msra.gmra.mrb[24].mxu1 %vm538_vm3, %v902_v62 }
 0x722   :  { %4442 = vmatpush3.bf16.msra.mxu1 %v1029_v0  ;;  %4443 = vmatprep.mubr.msk.bf16.mxu1 %vm5229_vm0, %v5227_v4 }
 0x723   :  { %4453 = vmatprep.subr.bf16.mxu1 %v5227_v4 }
 0x729   :  { %4444 = vmatmul.mubr.msk.bf16.vlgmr.msra.gmra.mrb[28].mxu1 %vm538_vm3, %v1023_v2 }
 0x72a   :  { %4455 = vmatprep.mubr.msk.bf16.mxu1 %vm5229_vm0, %v5227_v4 }
 0x736   :  { %v1252_v5 = vpop.xlane.xlu1 %1251 }
 0x737   :  { %4908 = vrcp.f32 %v1252_v5 }
 0x73a   :  { %v1140_v8 = vpop.permute.xlu1 %1139 }
 0x73b   :  { %v1145_v9 = vsel %vm555_vm2, %v1140_v8, 0 }
 0x73c   :  { %4454 = vmatpush3.bf16.msra.mxu1 %v1145_v9 }
 0x73d   :  { %4465 = vmatprep.subr.bf16.mxu1 %v5227_v4 }
 0x73e   :  { %v1374_v17 = vpop.permute.xlu1 %1373 }
 0x73f   :  { %4456 = vmatmul.mubr.msk.bf16.vlgmr.msra.gmra.mrb[32].mxu1 %vm538_vm3, %v1137_v11  ;;  %v1379_v20 = vsel %vm555_vm2, %v1374_v17, 0 }
 0x740   :  { %4467 = vmatprep.mubr.msk.bf16.mxu1 %vm5229_vm0, %v5227_v4 }
 0x741   :  { %v4909_v12 = vpop.eup %4908 }
 0x742   :  { %v1254_v14 = vmul.f32 %v4909_v12, %v5601_v35  ;;  %v4047_v12 = vld [vmem:[%s5987_s7] ss:$0 sm:$0xff] }
 0x743   :  { %v1369_v13 = vpop.xlane.xlu0 %1368 }
 0x744   :  { %4910 = vrcp.f32 %v1369_v13  ;;  %v1255_v18 = vpack.c.bf16 %v1254_v14, %v1254_v14 }
 0x747   :  { %v1257_v16 = vpop.permute.xlu0 %1256 }
 0x748   :  { %v1262_v10 = vsel %vm555_vm2, %v1257_v16, 0 }
 0x749   :  { %4466 = vmatpush3.bf16.msra.mxu1 %v1262_v10 }
 0x74a   :  { %4477 = vmatprep.subr.bf16.mxu1 %v5227_v4 }
 0x74c   :  { %4468 = vmatmul.mubr.msk.bf16.vlgmr.msra.gmra.mrb[36].mxu1 %vm538_vm3, %v1255_v18 }
 0x74d   :  { %4478 = vmatpush3.bf16.msra.mxu1 %v1379_v20  ;;  %4479 = vmatprep.mubr.msk.bf16.mxu1 %vm5229_vm0, %v5227_v4 }
 0x74e   :  { %v4911_v21 = vpop.eup %4910 }
 0x74f   :  { %v1371_v22 = vmul.f32 %v4911_v21, %v5605_v37 }
 0x751   :  { %v1372_v23 = vpack.c.bf16 %v1371_v22, %v1371_v22  ;;  %v4740_v22 = vld [vmem:[#allocation14] ss:$8 sps:$4 sm:$0xff]  }
 0x754   :  { %4480 = vmatmul.mubr.msk.bf16.vlgmr.msra.gmra.mrb[40].mxu1 %vm538_vm3, %v1372_v23  ;;  %v4742_v23 = vld [vmem:[#allocation14 + $0x4] ss:$8 sps:$4 sm:$0xff]  }
 0x755   :  { %1724 = vmatprep.mubr.bf16.mxu1 %v5228_v30  ;;  %1692 = vmatprep.subr.bf16.mxu1 %v4742_v23 }
 0x756   :  { %1693 = vmatpush1.bf16.msra.mxu1 %v4740_v22 }
 0x7e4   :  { %v709_v24 = vpop.f32.mrb[16].mxu1 }
 0x7e5   :  { %716 = vrot.lane.b32.xlu1 %v709_v24, %s5231_s29  ;;  %v4409_v25 = vpop.f32.mrb[17].mxu1  ;;  %v4745_v24 = vld [vmem:[#allocation14 + $0x14] ss:$8 sps:$4 sm:$0xff]  }
 0x7e6   :  { %v712_v26 = vpop.f32.mrb[18].mxu1  ;;  %v4743_v25 = vld [vmem:[#allocation14 + $0x10] ss:$8 sps:$4 sm:$0xff]   ;;  %1694 = vmatprep.subr.bf16.mxu1 %v4745_v24 }
 0x7e7   :  { %v4410_v27 = vpop.f32.mrb[19].mxu1  ;;  %1695 = vmatpush1.bf16.msra.mxu1 %v4743_v25 }
 0x7ec   :  { %v827_v28 = vpop.f32.mrb[20].mxu1 }
 0x7ed   :  { %834 = vrot.lane.b32.xlu1 %v827_v28, %s6012_s12  ;;  %v4421_v29 = vpop.f32.mrb[21].mxu1 }
 0x7ee   :  { %v830_v31 = vpop.f32.mrb[22].mxu1 }
 0x7ef   :  { %v4422_v32 = vpop.f32.mrb[23].mxu1 }
 0x7f4   :  { %v945_v33 = vpop.f32.mrb[24].mxu1 }
 0x7f5   :  { %952 = vrot.lane.b32.xlu0 %v945_v33, %s5230_s27  ;;  %v4433_v34 = vpop.f32.mrb[25].mxu1 }
 0x7f6   :  { %v948_v35 = vpop.f32.mrb[26].mxu1  ;;  %v4746_v34 = vld [vmem:[#allocation14 + $0x20] ss:$8 sps:$4 sm:$0xff]  }
 0x7f7   :  { %v4434_v36 = vpop.f32.mrb[27].mxu1  ;;  %v4751_v35 = vld [vmem:[#allocation14 + $0x34] ss:$8 sps:$4 sm:$0xff]  }
 0x7f8   :  { %v4749_v36 = vld [vmem:[#allocation14 + $0x30] ss:$8 sps:$4 sm:$0xff]  }
 0x7fc   :  { %v1065_v37 = vpop.f32.mrb[28].mxu1 }
 0x7fd   :  { %1071 = vst.msk [vmem:[#allocation2 + $0x8] sm:$0xff] %vm485_vm1, %v1065_v37  ;;  %v4445_v38 = vpop.f32.mrb[29].mxu1  ;;  %v4754_v37 = vld [vmem:[#allocation14 + $0x44] ss:$8 sps:$4 sm:$0xff]  }
 0x7fe   :  { %v1068_v15 = vpop.f32.mrb[30].mxu1  ;;  %v4752_v38 = vld [vmem:[#allocation14 + $0x40] ss:$8 sps:$4 sm:$0xff]  }
 0x7ff   :  { %v4446_v39 = vpop.f32.mrb[31].mxu1  ;;  %v4757_v15 = vld [vmem:[#allocation14 + $0x54] ss:$8 sps:$4 sm:$0xff]  }
 0x800   :  { %v4755_v39 = vld [vmem:[#allocation14 + $0x50] ss:$8 sps:$4 sm:$0xff]  }
 0x812   :  { %v1181_v43 = vpop.f32.mrb[32].mxu1 }
 0x813   :  { %1188 = vrot.lane.b32.xlu1 %v1181_v43, %s5231_s29  ;;  %v4457_v44 = vpop.f32.mrb[33].mxu1 }
 0x814   :  { %v1184_v45 = vpop.f32.mrb[34].mxu1 }
 0x815   :  { %v4458_v46 = vpop.f32.mrb[35].mxu1 }
 0x81f   :  { %v1298_v49 = vpop.f32.mrb[36].mxu1 }
 0x820   :  { %1305 = vrot.lane.b32.xlu1 %v1298_v49, %s6012_s12  ;;  %v4469_v53 = vpop.f32.mrb[37].mxu1 }
 0x821   :  { %v1301_v56 = vpop.f32.mrb[38].mxu1 }
 0x822   :  { %v4470_v59 = vpop.f32.mrb[39].mxu1 }
 0x827   :  { %v1415_v60 = vpop.f32.mrb[40].mxu1 }
 0x828   :  { %1422 = vrot.lane.b32.xlu1 %v1415_v60, %s5230_s27  ;;  %v4481_v61 = vpop.f32.mrb[41].mxu1  ;;  %v4057_v60 = vld [vmem:[%s5989_s9] ss:$0 sm:$0xff] }
 0x829   :  { %v1418_v62 = vpop.f32.mrb[42].mxu1 }
 0x82a   :  { %v4482_v63 = vpop.f32.mrb[43].mxu1 }
 0x857   :  { %v717_v0 = vpop.permute.xlu1 %716 }
 0x858   :  { %720 = vst.msk [vmem:[#allocation2] sm:$0xff] %vm719_vm4, %v717_v0 }
 0x85f   :  { %v835_v1 = vpop.permute.xlu1 %834 }
 0x860   :  { %838 = vst.msk [vmem:[#allocation2] sm:$0xff] %vm837_vm5, %v835_v1  ;;  %v4764_v1 = vld [vmem:[#allocation15 + $0x40] sm:$0xff]  }
 0x861   :  { %4255 = vmatprep.subr.bf16.mxu0 %v4764_v1 }
 0x867   :  { %v953_v2 = vpop.permute.xlu0 %952 }
 0x868   :  { %956 = vst.msk [vmem:[#allocation2] sm:$0xff] %vm955_vm6, %v953_v2  ;;  %v4765_v2 = vld [vmem:[#allocation15] sm:$0xff]  }
 0x86f   :  { %v1426_v8 = vld [vmem:[#allocation2] sm:$0xff] }
 0x885   :  { %v1189_v3 = vpop.permute.xlu1 %1188 }
 0x886   :  { %1191 = vst.msk [vmem:[#allocation2 + $0x8] sm:$0xff] %vm719_vm4, %v1189_v3  ;;  %v4766_v3 = vld [vmem:[#allocation15 + $0x48] sm:$0xff]  }
 0x892   :  { %v1306_v5 = vpop.permute.xlu1 %1305 }
 0x893   :  { %1308 = vst.msk [vmem:[#allocation2 + $0x8] sm:$0xff] %vm837_vm5, %v1306_v5  ;;  %v4767_v5 = vld [vmem:[#allocation15 + $0x8] sm:$0xff]  }
 0x89a   :  { %v1423_v6 = vpop.permute.xlu1 %1422 }
 0x89b   :  { %1425 = vst.msk [vmem:[#allocation2 + $0x8] sm:$0xff] %vm955_vm6, %v1423_v6  ;;  %v4768_v6 = vld [vmem:[#allocation15 + $0x50] sm:$0xff]  }
 0x8a2   :  { %v1427_v9 = vld [vmem:[#allocation2 + $0x8] sm:$0xff] }
 0x8a3   :  { %v1428_v11 = vpack.c.bf16 %v1427_v9, %v1426_v8  ;;  %v4769_v8 = vld [vmem:[#allocation15 + $0x10] sm:$0xff]   ;;  %v4770_v9 = vld [vmem:[#allocation15 + $0x58] sm:$0xff]  }
 0x8a5   :  { %4500 = vmatmul.mubr.bf16.vlgmr.msra.gmra.mrb[28].mxu0 %v1428_v11  ;;  %v4771_v11 = vld [vmem:[#allocation15 + $0x18] sm:$0xff]  }
 0x8a6   :  { %4256 = vmatpush3.bf16.msra.mxu0 %v4765_v2 }
 0x8a7   :  { %4257 = vmatprep.subr.bf16.mxu0 %v4766_v3 }
 0x8aa   :  { %4258 = vmatpush3.bf16.msra.mxu0 %v4767_v5 }
 0x8ab   :  { %4259 = vmatprep.subr.bf16.mxu0 %v4768_v6 }
 0x8ae   :  { %4260 = vmatpush3.bf16.msra.mxu0 %v4769_v8 }
 0x8af   :  { %4261 = vmatprep.subr.bf16.mxu0 %v4770_v9 }
 0x8b2   :  { %4262 = vmatpush3.bf16.msra.mxu0 %v4771_v11 }
 0x978   :  { %v1534_v13 = vpop.f32.mrb[28].mxu0 }
 0x979   :  { %v1535_v14 = vadd.f32 %v4047_v12, %v1534_v13  ;;  %v4501_v16 = vpop.f32.mrb[29].mxu0  ;;  %v4773_v13 = vld [vmem:[#allocation15 + $0x20] sm:$0xff]  }
 0x97a   :  { %v1537_v10 = vpop.f32.mrb[30].mxu0  ;;  %v4775_v16 = vld [vmem:[#allocation15 + $0x28] sm:$0xff]  }
 0x97b   :  { %v1538_v17 = vadd.f32 %v4047_v12, %v1537_v10  ;;  %v4502_v18 = vpop.f32.mrb[31].mxu0  ;;  %v1541_v20 = vadd.f32 %v1535_v14, %v5474_v50  ;;  %v4772_v12 = vld [vmem:[#allocation15 + $0x60] sm:$0xff]   ;;  %v4774_v14 = vld [vmem:[#allocation15 + $0x68] sm:$0xff]   ;;  %v4776_v10 = vld [vmem:[#allocation15 + $0x70] sm:$0xff]  }
 0x97c   :  { %4263 = vmatprep.subr.bf16.mxu0 %v4772_v12  ;;  %v4778_v18 = vld [vmem:[#allocation15 + $0x78] sm:$0xff]  }
 0x97d   :  { %1545 = vadd.xlane.f32.xlu0 %v1541_v20  ;;  %v1542_v21 = vadd.f32 %v1538_v17, %v5476_v51  ;;  %v4748_v51 = vld [vmem:[#allocation14 + $0x24] ss:$8 sps:$4 sm:$0xff]   ;;  %4264 = vmatpush3.bf16.msra.mxu0 %v4773_v13  ;;  %v4777_v17 = vld [vmem:[#allocation15 + $0x30] sm:$0xff]  }
 0x97e   :  { %1696 = vmatprep.subr.bf16.mxu1 %v4748_v51  ;;  %4265 = vmatprep.subr.bf16.mxu0 %v4774_v14  ;;  %v4074_v14 = vld [vmem:[%s5993_s13] ss:$0 sm:$0xff] }
 0x97f   :  { %1547 = vadd.xlane.f32.xlu1 %v1542_v21  ;;  %1697 = vmatpush1.bf16.msra.mxu1 %v4746_v34 }
 0x980   :  { %1698 = vmatprep.subr.bf16.mxu1 %v4751_v35 }
 0x981   :  { %4266 = vmatpush3.bf16.msra.mxu0 %v4775_v16 }
 0x982   :  { %4267 = vmatprep.subr.bf16.mxu0 %v4776_v10 }
 0x983   :  { %1699 = vmatpush1.bf16.msra.mxu1 %v4749_v36 }
 0x984   :  { %1700 = vmatprep.subr.bf16.mxu1 %v4754_v37 }
 0x985   :  { %4268 = vmatpush3.bf16.msra.mxu0 %v4777_v17 }
 0x986   :  { %4269 = vmatprep.subr.bf16.mxu0 %v4778_v18 }
 0x987   :  { %1701 = vmatpush1.bf16.msra.mxu1 %v4752_v38 }
 0x988   :  { %1702 = vmatprep.subr.bf16.mxu1 %v4757_v15 }
 0x98b   :  { %1703 = vmatpush1.bf16.msra.mxu1 %v4755_v39 }
 0x98c   :  { %1704 = vmatprep.subr.bf16.mxu1 %v4760_v40 }
 0x98f   :  { %1705 = vmatpush1.bf16.msra.mxu1 %v4758_v41 }
 0x990   :  { %1706 = vmatprep.subr.bf16.mxu1 %v4763_v19 }
 0x993   :  { %1707 = vmatpush1.bf16.msra.mxu1 %v4761_v42 }
 0xa0a   :  { %v1546_v26 = vpop.xlane.xlu0 %1545 }
 0xa0b   :  { %v1549_v27 = vmul.f32 0.0078125, %v1546_v26 }
 0xa0c   :  { %v1548_v28 = vpop.xlane.xlu1 %1547 }
 0xa0d   :  { %v1551_v29 = vsub.f32 %v1541_v20, %v1549_v27  ;;  %v1550_v31 = vmul.f32 0.0078125, %v1548_v28  ;;  %v4779_v20 = vld [vmem:[#allocation15 + $0x38] sm:$0xff]  }
 0xa0e   :  { %4270 = vmatpush3.bf16.msra.mxu0 %v4779_v20 }
 0xa0f   :  { %v1552_v32 = vsub.f32 %v1542_v21, %v1550_v31  ;;  %v1553_v33 = vmul.f32 %v1551_v29, %v1551_v29  ;;  %4503 = vmatprep.subr.bf16.mxu0 %v5227_v4  ;;  %v1600_v21 = vld [vmem:[%s5991_s11] sm:$0x3] }
 0xa10   :  { %v1605_v22 = vrot.slane %v1600_v21, %v5493_v57  ;;  %v1609_v23 = vrot.slane %v1600_v21, %v5487_v55 }
 0xa11   :  { %1555 = vadd.xlane.f32.xlu0 %v1553_v33  ;;  %v1554_v50 = vmul.f32 %v1552_v32, %v1552_v32 }
 0xa15   :  { %1557 = vadd.xlane.f32.xlu0 %v1554_v50 }
 0xa9e   :  { %v1556_v43 = vpop.xlane.xlu0 %1555 }
 0xa9f   :  { %v1559_v44 = vmul.f32 0.0078125, %v1556_v43 }
 0xaa1   :  { %v1561_v7 = vadd.f32 1e-05, %v1559_v44 }
 0xaa2   :  { %v1558_v45 = vpop.xlane.xlu0 %1557 }
 0xaa3   :  { %4912 = vrsqrt.f32 %v1561_v7  ;;  %v1560_v46 = vmul.f32 0.0078125, %v1558_v45 }
 0xaa5   :  { %v1562_v47 = vadd.f32 1e-05, %v1560_v46 }
 0xaa7   :  { %4914 = vrsqrt.f32 %v1562_v47 }
 0xaad   :  { %v4913_v48 = vpop.eup %4912 }
 0xaae   :  { %v1565_v49 = vmul.f32 %v4913_v48, %v1551_v29 }
 0xab0   :  { %v1573_v59 = vmul.f32 %v4056_v52, %v1565_v49 }
 0xab1   :  { %v4915_v53 = vpop.eup %4914 }
 0xab2   :  { %v1566_v56 = vmul.f32 %v4915_v53, %v1552_v32  ;;  %v5684_v62 = vadd.f32 %v4057_v60, %v1573_v59 }
 0xab4   :  { %v1574_v61 = vmul.f32 %v4056_v52, %v1566_v56 }
 0xab6   :  { %v5686_v63 = vadd.f32 %v4057_v60, %v1574_v61 }
 0xab8   :  { %v1583_v0 = vpack.c.bf16 %v5686_v63, %v5684_v62 }
 0xaba   :  { %1725 = vmatmul.mubr.bf16.vlgmr.msra.gmra.mrb[44].mxu1 %v1583_v0 }
 0xabb   :  { %2203 = vmatprep.mubr.bf16.mxu1 %v5228_v30 }
 0xb8d   :  { %v1726_v24 = vpop.f32.mrb[44].mxu1 }
 0xb8e   :  { %v1727_v25 = vadd.f32 %v1726_v24, %v1605_v22  ;;  %v1728_v26 = vpop.f32.mrb[45].mxu1 }
 0xb8f   :  { %v1729_v27 = vadd.f32 %v1728_v26, %v1609_v23  ;;  %v1730_v28 = vpop.f32.mrb[46].mxu1  ;;  %v4782_v26 = vld [vmem:[#allocation11 + $0xc4] ss:$12 sps:$4 sm:$0xff]  }
 0xb90   :  { %v1739_v29 = vmul.f32 0.044715, %v1727_v25  ;;  %v1731_v31 = vadd.f32 %v1730_v28, %v1605_v22  ;;  %v1732_v32 = vpop.f32.mrb[47].mxu1  ;;  %v1735_v60 = vmul.f32 0.5, %v1727_v25  ;;  %v4786_v28 = vld [vmem:[#allocation11 + $0xdc] ss:$12 sps:$4 sm:$0xff]   ;;  %2171 = vmatprep.subr.bf16.mxu1 %v4782_v26 }
 0xb91   :  { %v1740_v33 = vmul.f32 0.044715, %v1729_v27  ;;  %v1733_v50 = vadd.f32 %v1732_v32, %v1609_v23  ;;  %v1736_v1 = vmul.f32 0.5, %v1729_v27 }
 0xb92   :  { %v1743_v51 = vmul.f32 %v1739_v29, %v1727_v25  ;;  %v1741_v34 = vmul.f32 0.044715, %v1731_v31  ;;  %v1737_v61 = vmul.f32 0.5, %v1731_v31  ;;  %v4787_v29 = vld [vmem:[#allocation11 + $0xe0] ss:$12 sps:$4 sm:$0xff]  }
 0xb93   :  { %v1744_v35 = vmul.f32 %v1740_v33, %v1729_v27  ;;  %v1742_v36 = vmul.f32 0.044715, %v1733_v50  ;;  %v1738_v2 = vmul.f32 0.5, %v1733_v50 }
 0xb94   :  { %v1747_v37 = vmul.f32 %v1743_v51, %v1727_v25  ;;  %v1745_v38 = vmul.f32 %v1741_v34, %v1731_v31 }
 0xb95   :  { %v1748_v15 = vmul.f32 %v1744_v35, %v1729_v27  ;;  %v1746_v39 = vmul.f32 %v1742_v36, %v1733_v50  ;;  %v4790_v36 = vld [vmem:[#allocation11 + $0xf4] ss:$12 sps:$4 sm:$0xff]  }
 0xb96   :  { %v1751_v40 = vadd.f32 %v1747_v37, %v1727_v25  ;;  %v1749_v41 = vmul.f32 %v1745_v38, %v1731_v31  ;;  %v4780_v25 = vld [vmem:[#allocation11 + $0xc0] ss:$12 sps:$4 sm:$0xff]   ;;  %v4788_v37 = vld [vmem:[#allocation11 + $0xf0] ss:$12 sps:$4 sm:$0xff]   ;;  %v4791_v38 = vld [vmem:[#allocation11 + $0xf8] ss:$12 sps:$4 sm:$0xff]  }
 0xb97   :  { %v1750_v19 = vmul.f32 %v1746_v39, %v1733_v50  ;;  %v1752_v42 = vadd.f32 %v1748_v15, %v1729_v27  ;;  %v4783_v27 = vld [vmem:[#allocation11 + $0xc8] ss:$12 sps:$4 sm:$0xff]   ;;  %2172 = vmatpush1.bf16.msra.mxu1 %v4780_v25  ;;  %v4794_v15 = vld [vmem:[#allocation11 + $0x10c] ss:$12 sps:$4 sm:$0xff]  }
 0xb98   :  { %v1755_v43 = vmul.f32 0.7978846, %v1751_v40  ;;  %v1753_v44 = vadd.f32 %v1749_v41, %v1731_v31  ;;  %v4784_v31 = vld [vmem:[#allocation11 + $0xd8] ss:$12 sps:$4 sm:$0xff]   ;;  %2173 = vmatprep.subr.bf16.mxu1 %v4786_v28  ;;  %v4792_v39 = vld [vmem:[#allocation11 + $0x108] ss:$12 sps:$4 sm:$0xff]  }
 0xb99   :  { %v1754_v7 = vadd.f32 %v1750_v19, %v1733_v50  ;;  %v1756_v45 = vmul.f32 0.7978846, %v1752_v42  ;;  %v4795_v40 = vld [vmem:[#allocation11 + $0x110] ss:$12 sps:$4 sm:$0xff]   ;;  %v4796_v19 = vld [vmem:[#allocation11 + $0x120] ss:$12 sps:$4 sm:$0xff]  }
 0xb9a   :  { %4916 = vtanh.f32 %v1755_v43  ;;  %v1757_v46 = vmul.f32 0.7978846, %v1753_v44  ;;  %v4798_v41 = vld [vmem:[#allocation11 + $0x124] ss:$12 sps:$4 sm:$0xff]   ;;  %v4799_v42 = vld [vmem:[#allocation11 + $0x128] ss:$12 sps:$4 sm:$0xff]  }
 0xb9b   :  { %v1758_v47 = vmul.f32 0.7978846, %v1754_v7  ;;  %4918 = vtanh.f32 %v1756_v45  ;;  %2174 = vmatpush1.bf16.msra.mxu1 %v4784_v31  ;;  %v4802_v43 = vld [vmem:[#allocation11 + $0x13c] ss:$12 sps:$4 sm:$0xff]   ;;  %v4800_v44 = vld [vmem:[#allocation11 + $0x138] ss:$12 sps:$4 sm:$0xff]  }
 0xb9c   :  { %4920 = vtanh.f32 %v1757_v46  ;;  %2175 = vmatprep.subr.bf16.mxu1 %v4790_v36  ;;  %v4803_v7 = vld [vmem:[#allocation11 + $0x140] ss:$12 sps:$4 sm:$0xff]   ;;  %v4804_v46 = vld [vmem:[#allocation11 + $0x150] ss:$12 sps:$4 sm:$0xff]  }
 0xb9d   :  { %4922 = vtanh.f32 %v1758_v47  ;;  %v4806_v45 = vld [vmem:[#allocation11 + $0x154] ss:$12 sps:$4 sm:$0xff]   ;;  %v4807_v47 = vld [vmem:[#allocation11 + $0x158] ss:$12 sps:$4 sm:$0xff]  }
 0xb9f   :  { %2176 = vmatpush1.bf16.msra.mxu1 %v4788_v37 }
 0xba0   :  { %2177 = vmatprep.subr.bf16.mxu1 %v4794_v15 }
 0xba3   :  { %2178 = vmatpush1.bf16.msra.mxu1 %v4792_v39 }
 0xba4   :  { %v4917_v48 = vpop.eup %4916  ;;  %2179 = vmatprep.subr.bf16.mxu1 %v4798_v41 }
 0xba5   :  { %v4919_v49 = vpop.eup %4918  ;;  %v1763_v52 = vadd.f32 1.0, %v4917_v48  ;;  %v4810_v48 = vld [vmem:[#allocation11 + $0x16c] ss:$12 sps:$4 sm:$0xff]  }
 0xba6   :  { %v4921_v53 = vpop.eup %4920  ;;  %v1764_v56 = vadd.f32 1.0, %v4919_v49  ;;  %v4808_v49 = vld [vmem:[#allocation11 + $0x168] ss:$12 sps:$4 sm:$0xff]  }
 0xba7   :  { %v4923_v59 = vpop.eup %4922  ;;  %v1765_v0 = vadd.f32 1.0, %v4921_v53  ;;  %v1767_v5 = vmul.f32 %v1763_v52, %v1735_v60  ;;  %2180 = vmatpush1.bf16.msra.mxu1 %v4796_v19  ;;  %v4811_v52 = vld [vmem:[#allocation11 + $0x170] ss:$12 sps:$4 sm:$0xff]  }
 0xba8   :  { %v1766_v3 = vadd.f32 1.0, %v4923_v59  ;;  %v1768_v8 = vmul.f32 %v1764_v56, %v1736_v1  ;;  %2181 = vmatprep.subr.bf16.mxu1 %v4802_v43 }
 0xba9   :  { %v1769_v6 = vmul.f32 %v1765_v0, %v1737_v61 }
 0xbaa   :  { %v1770_v9 = vmul.f32 %v1766_v3, %v1738_v2  ;;  %v4091_v2 = vld [vmem:[%s5994_s14] ss:$0 sm:$0xff] }
 0xbab   :  { %v1771_v11 = vpack.c.bf16 %v1769_v6, %v1767_v5  ;;  %2182 = vmatpush1.bf16.msra.mxu1 %v4800_v44 }
 0xbac   :  { %v1772_v12 = vpack.c.bf16 %v1770_v9, %v1768_v8  ;;  %2183 = vmatprep.subr.bf16.mxu1 %v4806_v45  ;;  %v4092_v9 = vld [vmem:[%s5995_s15] ss:$0 sm:$0xff] }
 0xbae   :  { %1940 = vmatprep.mubr.bf16.mxu0 %v1772_v12 }
 0xbaf   :  { %1941 = vmatmul.mubr.bf16.vlgmr.msra.gmra.mrb[32].mxu0 %v1771_v11  ;;  %2184 = vmatpush1.bf16.msra.mxu1 %v4804_v46 }
 0xbb0   :  { %4519 = vmatprep.mubr.msk.bf16.mxu0 %vm5229_vm0, %v5227_v4  ;;  %4504 = vmatpush3.bf16.msra.mxu0 %v4783_v27 }
 0xbb1   :  { %4505 = vmatprep.subr.bf16.mxu0 %v5227_v4  ;;  %2185 = vmatprep.subr.bf16.mxu1 %v4810_v48 }
 0xbb3   :  { %2186 = vmatpush1.bf16.msra.mxu1 %v4808_v49 }
 0xbb4   :  { %4506 = vmatpush3.bf16.msra.mxu0 %v4787_v29  ;;  %4523 = vmatprep.subr.bf16.mxu1 %v5227_v4 }
 0xbb5   :  { %4507 = vmatprep.subr.bf16.mxu0 %v5227_v4 }
 0xbb8   :  { %4508 = vmatpush3.bf16.msra.mxu0 %v4791_v38 }
 0xbb9   :  { %4509 = vmatprep.subr.bf16.mxu0 %v5227_v4 }
 0xbbc   :  { %4510 = vmatpush3.bf16.msra.mxu0 %v4795_v40 }
 0xbbd   :  { %4511 = vmatprep.subr.bf16.mxu0 %v5227_v4 }
 0xbc0   :  { %4512 = vmatpush3.bf16.msra.mxu0 %v4799_v42 }
 0xbc1   :  { %4513 = vmatprep.subr.bf16.mxu0 %v5227_v4 }
 0xbc4   :  { %4514 = vmatpush3.bf16.msra.mxu0 %v4803_v7 }
 0xbc5   :  { %4515 = vmatprep.subr.bf16.mxu0 %v5227_v4 }
 0xbc8   :  { %4516 = vmatpush3.bf16.msra.mxu0 %v4807_v47 }
 0xbc9   :  { %4517 = vmatprep.subr.bf16.mxu0 %v5227_v4 }
 0xbcc   :  { %4518 = vmatpush3.bf16.msra.mxu0 %v4811_v52 }
 0xbcd   :  { %4547 = vmatprep.subr.bf16.mxu0 %v5227_v4 }
 0xc82   :  { %v4271_v13 = vpop.f32.mrb[32].mxu0 }
 0xc83   :  { %v4272_v16 = vpop.f32.mrb[33].mxu0 }
 0xc84   :  { %v4273_v10 = vadd.f32 %v4272_v16, %v4271_v13  ;;  %v4274_v17 = vpop.f32.mrb[34].mxu0  ;;  %v4093_v16 = vld [vmem:[%s5985_s5 + $0x3] sm:$0x7] }
 0xc85   :  { %v4275_v18 = vpop.f32.mrb[35].mxu0 }
 0xc86   :  { %v1943_v20 = vadd.f32 %v4273_v10, %v4074_v14  ;;  %v4276_v21 = vadd.f32 %v4275_v18, %v4274_v17  ;;  %v2035_v10 = vrot.slane %v4093_v16, %v5487_v55 }
 0xc88   :  { %v1946_v22 = vadd.f32 %v4276_v21, %v4074_v14  ;;  %v1949_v23 = vadd.f32 %v1943_v20, %v5684_v62  ;;  %v2031_v20 = vrot.slane %v4093_v16, %v5493_v57  ;;  %v2039_v21 = vrot.slane %v4093_v16, %v265_v58 }
 0xc8a   :  { %1953 = vadd.xlane.f32.xlu0 %v1949_v23  ;;  %v1950_v24 = vadd.f32 %v1946_v22, %v5686_v63 }
 0xc8c   :  { %1955 = vadd.xlane.f32.xlu1 %v1950_v24 }
 0xd17   :  { %v1954_v62 = vpop.xlane.xlu0 %1953 }
 0xd18   :  { %v1957_v32 = vmul.f32 0.0078125, %v1954_v62 }
 0xd19   :  { %v1956_v63 = vpop.xlane.xlu1 %1955 }
 0xd1a   :  { %v1959_v33 = vsub.f32 %v1949_v23, %v1957_v32  ;;  %v1958_v50 = vmul.f32 0.0078125, %v1956_v63 }
 0xd1c   :  { %v1960_v51 = vsub.f32 %v1950_v24, %v1958_v50  ;;  %v1961_v34 = vmul.f32 %v1959_v33, %v1959_v33 }
 0xd1e   :  { %1963 = vadd.xlane.f32.xlu0 %v1961_v34  ;;  %v1962_v35 = vmul.f32 %v1960_v51, %v1960_v51 }
 0xd20   :  { %1965 = vadd.xlane.f32.xlu1 %v1962_v35  ;;  %v5748_v35 = vld [vmem:[#allocation6] ss:$0 sm:$0xff] }
 0xdab   :  { %v1964_v53 = vpop.xlane.xlu0 %1963 }
 0xdac   :  { %v1967_v56 = vmul.f32 0.0078125, %v1964_v53 }
 0xdad   :  { %v1966_v59 = vpop.xlane.xlu1 %1965 }
 0xdae   :  { %v1969_v60 = vadd.f32 1e-05, %v1967_v56  ;;  %v1968_v61 = vmul.f32 0.0078125, %v1966_v59 }
 0xdb0   :  { %4924 = vrsqrt.f32 %v1969_v60  ;;  %v1970_v0 = vadd.f32 1e-05, %v1968_v61 }
 0xdb2   :  { %4926 = vrsqrt.f32 %v1970_v0 }
 0xdba   :  { %v4925_v1 = vpop.eup %4924 }
 0xdbb   :  { %v1973_v3 = vmul.f32 %v4925_v1, %v1959_v33 }
 0xdbc   :  { %v4927_v5 = vpop.eup %4926 }
 0xdbd   :  { %v1974_v6 = vmul.f32 %v4927_v5, %v1960_v51  ;;  %v1981_v8 = vmul.f32 %v4091_v2, %v1973_v3 }
 0xdbf   :  { %v1982_v11 = vmul.f32 %v4091_v2, %v1974_v6  ;;  %v5719_v12 = vadd.f32 %v4092_v9, %v1981_v8 }
 0xdc1   :  { %v5721_v13 = vadd.f32 %v4092_v9, %v1982_v11 }
 0xdc3   :  { %v1991_v14 = vpack.c.bf16 %v5721_v13, %v5719_v12 }
 0xdc5   :  { %2204 = vmatmul.mubr.bf16.vlgmr.msra.gmra.mrb[48].mxu1 %v1991_v14  ;;  %4520 = vmatmul.mubr.bf16.vlgmr.msra.gmra.mrb[36].mxu0 %v1991_v14 }
 0xdc6   :  { %4525 = vmatprep.mubr.msk.bf16.mxu1 %vm5229_vm0, %v5227_v4  ;;  %4549 = vmatprep.mubr.msk.bf16.mxu0 %vm5229_vm0, %v5227_v4 }
 0xe98   :  { %v2205_v17 = vpop.f32.mrb[48].mxu1  ;;  %v2248_v18 = vpop.f32.mrb[36].mxu0 }
 0xe99   :  { %v2207_v22 = vpop.f32.mrb[49].mxu1  ;;  %v4521_v23 = vpop.f32.mrb[37].mxu0  ;;  %v2249_v63 = vadd.f32 %v2248_v18, %v2039_v21  ;;  %v2206_v50 = vadd.f32 %v2205_v17, %v2031_v20 }
 0xe9a   :  { %v2208_v24 = vadd.f32 %v2207_v22, %v2035_v10  ;;  %v2209_v25 = vpop.f32.mrb[50].mxu1  ;;  %v2251_v26 = vpop.f32.mrb[38].mxu0 }
 0xe9b   :  { %v2210_v27 = vadd.f32 %v2209_v25, %v2031_v20  ;;  %v5736_v28 = vadd.f32 %v2251_v26, %v2039_v21  ;;  %v2211_v29 = vpop.f32.mrb[51].mxu1  ;;  %v4522_v31 = vpop.f32.mrb[39].mxu0  ;;  %v5740_v54 = vpack.c.bf16 %v2249_v63, %v2249_v63  ;;  %v2256_v58 = vpack.c.bf16 %v2206_v50, %v2206_v50 }
 0xe9c   :  { %v2257_v62 = vpack.c.bf16 %v2208_v24, %v2208_v24  ;;  %v2212_v32 = vadd.f32 %v2211_v29, %v2035_v10 }
 0xe9d   :  { %v2327_v51 = vsel %vm555_vm2, %v5740_v54, 0  ;;  %v2725_v45 = vpack.c.bf16 %v2210_v27, %v2210_v27 }
 0xe9e   :  { %v2262_v33 = vsel %vm485_vm1, %v2257_v62, 0  ;;  %v2726_v41 = vpack.c.bf16 %v2212_v32, %v2212_v32 }
 0xe9f   :  { %4524 = vmatpush3.bf16.xpose.msra.mxu1 %v2262_v33 }
 0xea0   :  { %4529 = vmatprep.subr.bf16.mxu1 %v5227_v4  ;;  %v2731_v3 = vsel %vm485_vm1, %v2726_v41, 0 }
 0xea6   :  { %4526 = vmatmul.mubr.msk.bf16.vlgmr.msra.gmra.mrb[52].mxu1 %vm485_vm1, %v2256_v58 }
 0xea7   :  { %4530 = vmatpush3.bf16.msra.mxu1 %v2327_v51  ;;  %4531 = vmatprep.mubr.msk.bf16.mxu1 %vm5229_vm0, %v5227_v4 }
 0xea8   :  { %4535 = vmatprep.subr.bf16.mxu1 %v5227_v4 }
 0xf79   :  { %v2298_v34 = vpop.f32.mrb[52].mxu1 }
 0xf7a   :  { %v2304_v36 = vmul.f32 0.17677669, %v2298_v34  ;;  %v4527_v37 = vpop.f32.mrb[53].mxu1 }
 0xf7b   :  { %v2301_v38 = vpop.f32.mrb[54].mxu1 }
 0xf7c   :  { %v4528_v15 = vpop.f32.mrb[55].mxu1  ;;  %v2309_v39 = vadd.f32 %v5748_v35, %v2304_v36 }
 0xf7e   :  { %v2310_v40 = vsel %vm538_vm3, %v2309_v39, -inf }
 0xf7f   :  { %2311 = vmax.xlane.f32.xlu0 %v2310_v40 }
 0xf95   :  { %2374 = vrot.lane.b32.xlu0 %v2257_v62, %s5230_s27 }
 0xf99   :  { %2609 = vrot.lane.b32.xlu0 %v2257_v62, %s5231_s29 }
 0xf9d   :  { %2843 = vrot.lane.b32.xlu0 %v2726_v41, %s5230_s27 }
 0xfa1   :  { %2961 = vrot.lane.b32.xlu0 %v2726_v41, %s6012_s12 }
 0xfa5   :  { %3078 = vrot.lane.b32.xlu0 %v2726_v41, %s5231_s29 }
0x100c   :  { %v2312_v19 = vpop.xlane.xlu0 %2311 }
0x100d   :  { %v2313_v42 = vsub.f32 %v2309_v39, %v2312_v19  ;;  %v4128_v19 = vld [vmem:[#allocation6 + $0x1] ss:$0 sm:$0xff] }
0x100f   :  { %v2314_v43 = vmul.f32 1.442695, %v2313_v42 }
0x1010   :  { %v2375_v48 = vpop.permute.xlu0 %2374 }
0x1011   :  { %4928 = vpow2.f32 %v2314_v43  ;;  %v2380_v61 = vsel %vm485_vm1, %v2375_v48, 0 }
0x1014   :  { %v2610_v59 = vpop.permute.xlu0 %2609 }
0x1015   :  { %v2615_v1 = vsel %vm485_vm1, %v2610_v59, 0 }
0x1018   :  { %v2844_v5 = vpop.permute.xlu0 %2843 }
0x1019   :  { %v2849_v6 = vsel %vm485_vm1, %v2844_v5, 0 }
0x101b   :  { %v4929_v44 = vpop.eup %4928 }
0x101c   :  { %v2316_v7 = vsel %vm538_vm3, %v4929_v44, 0.0  ;;  %v2962_v8 = vpop.permute.xlu0 %2961 }
0x101d   :  { %2317 = vadd.xlane.f32.xlu1 %v2316_v7  ;;  %v2967_v11 = vsel %vm485_vm1, %v2962_v8, 0 }
0x1020   :  { %v3079_v14 = vpop.permute.xlu0 %3078 }
0x1021   :  { %v3084_v10 = vsel %vm485_vm1, %v3079_v14, 0 }
0x102e   :  { %2371 = vrot.lane.b32.xlu1 %v2256_v58, %s5230_s27 }
0x1032   :  { %2492 = vrot.lane.b32.xlu1 %v2257_v62, %s6012_s12 }
0x1036   :  { %2490 = vrot.lane.b32.xlu1 %v2256_v58, %s6012_s12 }
0x103a   :  { %2607 = vrot.lane.b32.xlu1 %v2256_v58, %s5231_s29 }
0x103e   :  { %2840 = vrot.lane.b32.xlu1 %v2725_v45, %s5230_s27 }
0x1042   :  { %2959 = vrot.lane.b32.xlu1 %v2725_v45, %s6012_s12 }
0x1046   :  { %3076 = vrot.lane.b32.xlu1 %v2725_v45, %s5231_s29 }
0x10aa   :  { %v2318_v46 = vpop.xlane.xlu1 %2317 }
0x10ab   :  { %4930 = vrcp.f32 %v2318_v46 }
0x10ae   :  { %v2372_v47 = vpop.permute.xlu1 %2371 }
0x10b2   :  { %v2493_v49 = vpop.permute.xlu1 %2492 }
0x10b3   :  { %v2498_v52 = vsel %vm485_vm1, %v2493_v49, 0 }
0x10b4   :  { %4548 = vmatpush3.bf16.xpose.msra.mxu0 %v2498_v52 }
0x10b5   :  { %v4931_v53 = vpop.eup %4930  ;;  %4559 = vmatprep.subr.bf16.mxu0 %v5227_v4 }
0x10b6   :  { %v2320_v56 = vmul.f32 %v4931_v53, %v4929_v44  ;;  %v2491_v0 = vpop.permute.xlu1 %2490 }
0x10b8   :  { %v2321_v60 = vpack.c.bf16 %v2320_v56, %v2320_v56 }
0x10ba   :  { %4532 = vmatmul.mubr.msk.bf16.vlgmr.msra.gmra.mrb[56].mxu1 %vm538_vm3, %v2321_v60  ;;  %v2608_v2 = vpop.permute.xlu1 %2607 }
0x10bb   :  { %4536 = vmatpush3.bf16.xpose.msra.mxu1 %v2380_v61  ;;  %4550 = vmatmul.mubr.msk.bf16.vlgmr.msra.gmra.mrb[40].mxu0 %vm485_vm1, %v2491_v0 }
0x10bc   :  { %4560 = vmatpush3.bf16.xpose.msra.mxu0 %v2615_v1  ;;  %4537 = vmatprep.mubr.msk.bf16.mxu1 %vm5229_vm0, %v5227_v4 }
0x10bd   :  { %4561 = vmatprep.mubr.msk.bf16.mxu0 %vm5229_vm0, %v5227_v4  ;;  %4571 = vmatprep.subr.bf16.mxu0 %v5227_v4 }
0x10be   :  { %4541 = vmatprep.subr.bf16.mxu1 %v5227_v4  ;;  %v2841_v9 = vpop.permute.xlu1 %2840 }
0x10c2   :  { %4538 = vmatmul.mubr.msk.bf16.vlgmr.msra.gmra.mrb[60].mxu1 %vm485_vm1, %v2372_v47  ;;  %v2960_v16 = vpop.permute.xlu1 %2959 }
0x10c3   :  { %4562 = vmatmul.mubr.msk.bf16.vlgmr.msra.gmra.mrb[44].mxu0 %vm485_vm1, %v2608_v2  ;;  %4543 = vmatprep.mubr.msk.bf16.mxu1 %vm5229_vm0, %v5227_v4 }
0x10c4   :  { %4572 = vmatpush3.bf16.xpose.msra.mxu0 %v2731_v3  ;;  %4573 = vmatprep.mubr.msk.bf16.mxu0 %vm5229_vm0, %v5227_v4 }
0x10c5   :  { %4583 = vmatprep.subr.bf16.mxu0 %v5227_v4 }
0x10c6   :  { %v3077_v17 = vpop.permute.xlu1 %3076 }
0x10cb   :  { %4574 = vmatmul.mubr.msk.bf16.vlgmr.msra.gmra.mrb[48].mxu0 %vm485_vm1, %v2725_v45 }
0x10cc   :  { %4584 = vmatpush3.bf16.xpose.msra.mxu0 %v2849_v6  ;;  %4585 = vmatprep.mubr.msk.bf16.mxu0 %vm5229_vm0, %v5227_v4 }
0x10cd   :  { %4595 = vmatprep.subr.bf16.mxu0 %v5227_v4 }
0x10d3   :  { %4586 = vmatmul.mubr.msk.bf16.vlgmr.msra.gmra.mrb[52].mxu0 %vm485_vm1, %v2841_v9 }
0x10d4   :  { %4596 = vmatpush3.bf16.xpose.msra.mxu0 %v2967_v11  ;;  %4597 = vmatprep.mubr.msk.bf16.mxu0 %vm5229_vm0, %v5227_v4 }
0x10d5   :  { %4607 = vmatprep.subr.bf16.mxu0 %v5227_v4 }
0x10db   :  { %4598 = vmatmul.mubr.msk.bf16.vlgmr.msra.gmra.mrb[56].mxu0 %vm485_vm1, %v2960_v16 }
0x10dc   :  { %4608 = vmatpush3.bf16.xpose.msra.mxu0 %v3084_v10  ;;  %4609 = vmatprep.mubr.msk.bf16.mxu0 %vm5229_vm0, %v5227_v4 }
0x10dd   :  { %4619 = vmatprep.subr.bf16.mxu0 %v5227_v4 }
0x10e3   :  { %4610 = vmatmul.mubr.msk.bf16.vlgmr.msra.gmra.mrb[60].mxu0 %vm485_vm1, %v3077_v17 }
0x10e4   :  { %4635 = vmatprep.mubr.msk.bf16.mxu0 %vm5229_vm0, %v5227_v4 }
0x118d   :  { %v2363_v18 = vpop.f32.mrb[56].mxu1 }
0x118e   :  { %2369 = vst.msk [vmem:[#allocation2] sm:$0xff] %vm485_vm1, %v2363_v18  ;;  %v4533_v20 = vpop.f32.mrb[57].mxu1  ;;  %v2534_v21 = vpop.f32.mrb[40].mxu0 }
0x118f   :  { %v2540_v22 = vmul.f32 0.17677669, %v2534_v21  ;;  %v2366_v23 = vpop.f32.mrb[58].mxu1  ;;  %v4551_v24 = vpop.f32.mrb[41].mxu0 }
0x1190   :  { %v4534_v25 = vpop.f32.mrb[59].mxu1  ;;  %v2537_v26 = vpop.f32.mrb[42].mxu0 }
0x1191   :  { %v4552_v27 = vpop.f32.mrb[43].mxu0  ;;  %v2541_v29 = vadd.f32 %v5748_v35, %v2540_v22 }
0x1193   :  { %v2542_v31 = vsel %vm538_vm3, %v2541_v29, -inf }
0x1194   :  { %2543 = vmax.xlane.f32.xlu1 %v2542_v31 }
0x1195   :  { %v2416_v62 = vpop.f32.mrb[60].mxu1 }
0x1196   :  { %v2422_v32 = vmul.f32 0.17677669, %v2416_v62  ;;  %v4539_v63 = vpop.f32.mrb[61].mxu1  ;;  %v2651_v33 = vpop.f32.mrb[44].mxu0 }
0x1197   :  { %v2657_v50 = vmul.f32 0.17677669, %v2651_v33  ;;  %v2419_v58 = vpop.f32.mrb[62].mxu1  ;;  %v4563_v51 = vpop.f32.mrb[45].mxu0 }
0x1198   :  { %v4540_v34 = vpop.f32.mrb[63].mxu1  ;;  %v2654_v36 = vpop.f32.mrb[46].mxu0  ;;  %v2423_v37 = vadd.f32 %v5748_v35, %v2422_v32 }
0x1199   :  { %v4564_v38 = vpop.f32.mrb[47].mxu0  ;;  %v2658_v39 = vadd.f32 %v5748_v35, %v2657_v50 }
0x119a   :  { %v2424_v15 = vsel %vm538_vm3, %v2423_v37, -inf }
0x119b   :  { %2425 = vmax.xlane.f32.xlu0 %v2424_v15  ;;  %v2659_v41 = vsel %vm538_vm3, %v2658_v39, -inf }
0x119e   :  { %v2767_v40 = vpop.f32.mrb[48].mxu0 }
0x119f   :  { %v2773_v42 = vmul.f32 0.17677669, %v2767_v40  ;;  %v4575_v43 = vpop.f32.mrb[49].mxu0  ;;  %2660 = vmax.xlane.f32.xlu0 %v2659_v41 }
0x11a0   :  { %v2770_v44 = vpop.f32.mrb[50].mxu0 }
0x11a1   :  { %v4576_v7 = vpop.f32.mrb[51].mxu0  ;;  %v2778_v45 = vadd.f32 %v4128_v19, %v2773_v42 }
0x11a3   :  { %v2779_v46 = vsel %vm538_vm3, %v2778_v45, -inf }
0x11a4   :  { %2780 = vmax.xlane.f32.xlu0 %v2779_v46 }
0x11a6   :  { %v2885_v47 = vpop.f32.mrb[52].mxu0 }
0x11a7   :  { %v2891_v48 = vmul.f32 0.17677669, %v2885_v47  ;;  %v4587_v49 = vpop.f32.mrb[53].mxu0 }
0x11a8   :  { %v2888_v52 = vpop.f32.mrb[54].mxu0 }
0x11a9   :  { %v4588_v53 = vpop.f32.mrb[55].mxu0  ;;  %v2892_v35 = vadd.f32 %v4128_v19, %v2891_v48 }
0x11ab   :  { %v2893_v56 = vsel %vm538_vm3, %v2892_v35, -inf }
0x11ac   :  { %2894 = vmax.xlane.f32.xlu0 %v2893_v56 }
0x11ae   :  { %v3003_v59 = vpop.f32.mrb[56].mxu0 }
0x11af   :  { %v3009_v60 = vmul.f32 0.17677669, %v3003_v59  ;;  %v4599_v61 = vpop.f32.mrb[57].mxu0 }
0x11b0   :  { %v3006_v0 = vpop.f32.mrb[58].mxu0 }
0x11b1   :  { %v4600_v1 = vpop.f32.mrb[59].mxu0  ;;  %v3010_v2 = vadd.f32 %v4128_v19, %v3009_v60 }
0x11b3   :  { %v3011_v3 = vsel %vm538_vm3, %v3010_v2, -inf }
0x11b4   :  { %3012 = vmax.xlane.f32.xlu1 %v3011_v3 }
0x11b6   :  { %v3120_v5 = vpop.f32.mrb[60].mxu0 }
0x11b7   :  { %v3126_v6 = vmul.f32 0.17677669, %v3120_v5  ;;  %v4611_v8 = vpop.f32.mrb[61].mxu0 }
0x11b8   :  { %v3123_v9 = vpop.f32.mrb[62].mxu0 }
0x11b9   :  { %v4612_v11 = vpop.f32.mrb[63].mxu0  ;;  %v3127_v14 = vadd.f32 %v4128_v19, %v3126_v6 }
0x11bb   :  { %v3128_v16 = vsel %vm538_vm3, %v3127_v14, -inf }
0x11bc   :  { %3129 = vmax.xlane.f32.xlu0 %v3128_v16 }
0x1221   :  { %v2544_v10 = vpop.xlane.xlu1 %2543 }
0x1222   :  { %v2545_v17 = vsub.f32 %v2541_v29, %v2544_v10 }
0x1224   :  { %v2546_v18 = vmul.f32 1.442695, %v2545_v17 }
0x1226   :  { %4932 = vpow2.f32 %v2546_v18 }
0x1228   :  { %v2426_v20 = vpop.xlane.xlu0 %2425 }
0x1229   :  { %v2427_v21 = vsub.f32 %v2423_v37, %v2426_v20 }
0x122b   :  { %v2428_v24 = vmul.f32 1.442695, %v2427_v21 }
0x122c   :  { %v2661_v22 = vpop.xlane.xlu0 %2660 }
0x122d   :  { %v2662_v23 = vsub.f32 %v2658_v39, %v2661_v22 }
0x122f   :  { %v2663_v25 = vmul.f32 1.442695, %v2662_v23 }
0x1230   :  { %v5814_v26 = vpop.eup %4932 }
0x1231   :  { %4934 = vpow2.f32 %v2663_v25  ;;  %v2781_v27 = vpop.xlane.xlu0 %2780  ;;  %v2548_v31 = vsel %vm538_vm3, %v5814_v26, 0.0 }
0x1232   :  { %v2782_v62 = vsub.f32 %v2778_v45, %v2781_v27  ;;  %2549 = vadd.xlane.f32.xlu0 %v2548_v31  ;;  %4936 = vpow2.f32 %v2428_v24 }
0x1234   :  { %v2783_v32 = vmul.f32 1.442695, %v2782_v62 }
0x1236   :  { %4938 = vpow2.f32 %v2783_v32 }
0x1239   :  { %v2895_v29 = vpop.xlane.xlu0 %2894 }
0x123a   :  { %v2896_v63 = vsub.f32 %v2892_v35, %v2895_v29 }
0x123b   :  { %v5818_v33 = vpop.eup %4934 }
0x123c   :  { %v2897_v50 = vmul.f32 1.442695, %v2896_v63  ;;  %v2665_v58 = vsel %vm538_vm3, %v5818_v33, 0.0  ;;  %v4937_v51 = vpop.eup %4936 }
0x123d   :  { %2666 = vadd.xlane.f32.xlu1 %v2665_v58  ;;  %v2430_v36 = vsel %vm538_vm3, %v4937_v51, 0.0 }
0x123e   :  { %4940 = vpow2.f32 %v2897_v50 }
0x1240   :  { %v5822_v34 = vpop.eup %4938 }
0x1241   :  { %2431 = vadd.xlane.f32.xlu1 %v2430_v36  ;;  %v2785_v37 = vsel %vm538_vm3, %v5822_v34, 0.0  ;;  %v3013_v39 = vpop.xlane.xlu1 %3012 }
0x1242   :  { %2786 = vadd.xlane.f32.xlu0 %v2785_v37  ;;  %v3014_v40 = vsub.f32 %v3010_v2, %v3013_v39 }
0x1244   :  { %v3015_v41 = vmul.f32 1.442695, %v3014_v40 }
0x1246   :  { %4942 = vpow2.f32 %v3015_v41 }
0x1248   :  { %v5827_v38 = vpop.eup %4940 }
0x1249   :  { %v2899_v15 = vsel %vm538_vm3, %v5827_v38, 0.0  ;;  %v3130_v19 = vpop.xlane.xlu0 %3129 }
0x124a   :  { %2900 = vadd.xlane.f32.xlu0 %v2899_v15  ;;  %v3131_v42 = vsub.f32 %v3127_v14, %v3130_v19 }
0x124c   :  { %v3132_v43 = vmul.f32 1.442695, %v3131_v42 }
0x124e   :  { %4944 = vpow2.f32 %v3132_v43 }
0x1250   :  { %v5837_v44 = vpop.eup %4942 }
0x1251   :  { %v3017_v7 = vsel %vm538_vm3, %v5837_v44, 0.0 }
0x1252   :  { %2437 = vrot.lane.b32.xlu1 %v5740_v54, %s5230_s27 }
0x1258   :  { %v5841_v45 = vpop.eup %4944 }
0x1259   :  { %v3134_v46 = vsel %vm538_vm3, %v5841_v45, 0.0 }
0x1260   :  { %2554 = vrot.lane.b32.xlu0 %v5740_v54, %s6012_s12 }
0x1264   :  { %2671 = vrot.lane.b32.xlu0 %v5740_v54, %s5231_s29  ;;  %v2791_v54 = vpack.c.bf16 %v5736_v28, %v5736_v28 }
0x1266   :  { %v2796_v16 = vsel %vm555_vm2, %v2791_v54, 0 }
0x1276   :  { %3018 = vadd.xlane.f32.xlu1 %v3017_v7 }
0x1283   :  { %3135 = vadd.xlane.f32.xlu0 %v3134_v46  ;;  %v4812_v46 = vld [vmem:[#allocation12 + $0x40] sm:$0xff]  }
0x1284   :  { %4620 = vmatpush3.bf16.msra.mxu0 %v4812_v46  ;;  %v4841_v46 = vld [vmem:[#allocation14 + $0xf0] ss:$8 sps:$4 sm:$0xff]  }
0x1285   :  { %4621 = vmatprep.subr.bf16.mxu0 %v5227_v4 }
0x1287   :  { %2906 = vrot.lane.b32.xlu1 %v2791_v54, %s5230_s27 }
0x128b   :  { %3140 = vrot.lane.b32.xlu1 %v2791_v54, %s5231_s29 }
0x1299   :  { %3023 = vrot.lane.b32.xlu0 %v2791_v54, %s6012_s12  ;;  %v4813_v54 = vld [vmem:[#allocation12 + $0x48] sm:$0xff]  }
0x129a   :  { %4622 = vmatpush3.bf16.msra.mxu0 %v4813_v54 }
0x129b   :  { %4623 = vmatprep.subr.bf16.mxu0 %v5227_v4 }
0x12bf   :  { %v2550_v49 = vpop.xlane.xlu0 %2549 }
0x12ca   :  { %v2667_v47 = vpop.xlane.xlu1 %2666 }
0x12ce   :  { %v2432_v48 = vpop.xlane.xlu1 %2431 }
0x12cf   :  { %4946 = vrcp.f32 %v2432_v48  ;;  %v2787_v53 = vpop.xlane.xlu0 %2786  ;;  %v4815_v48 = vld [vmem:[#allocation12 + $0x58] sm:$0xff]  }
0x12d0   :  { %4948 = vrcp.f32 %v2550_v49 }
0x12d1   :  { %4950 = vrcp.f32 %v2667_v47  ;;  %v4814_v47 = vld [vmem:[#allocation12 + $0x50] sm:$0xff]  }
0x12d2   :  { %v2438_v52 = vpop.permute.xlu1 %2437  ;;  %4952 = vrcp.f32 %v2787_v53  ;;  %4624 = vmatpush3.bf16.msra.mxu0 %v4814_v47  ;;  %v4816_v53 = vld [vmem:[#allocation12 + $0x60] sm:$0xff]  }
0x12d3   :  { %v2443_v35 = vsel %vm555_vm2, %v2438_v52, 0  ;;  %4625 = vmatprep.subr.bf16.mxu0 %v5227_v4 }
0x12d4   :  { %4542 = vmatpush3.bf16.msra.mxu1 %v2443_v35 }
0x12d5   :  { %4553 = vmatprep.subr.bf16.mxu1 %v5227_v4 }
0x12d6   :  { %4626 = vmatpush3.bf16.msra.mxu0 %v4815_v48 }
0x12d7   :  { %v2901_v56 = vpop.xlane.xlu0 %2900  ;;  %4627 = vmatprep.subr.bf16.mxu0 %v5227_v4 }
0x12d8   :  { %4954 = vrcp.f32 %v2901_v56 }
0x12d9   :  { %v4947_v28 = vpop.eup %4946 }
0x12da   :  { %v2434_v59 = vmul.f32 %v4947_v28, %v4937_v51  ;;  %v4949_v1 = vpop.eup %4948  ;;  %4628 = vmatpush3.bf16.msra.mxu0 %v4816_v53  ;;  %v4817_v28 = vld [vmem:[#allocation12 + $0x68] sm:$0xff]  }
0x12db   :  { %v2555_v60 = vpop.permute.xlu0 %2554  ;;  %v2552_v2 = vmul.f32 %v4949_v1, %v5814_v26  ;;  %v4951_v6 = vpop.eup %4950  ;;  %4629 = vmatprep.subr.bf16.mxu0 %v5227_v4 }
0x12dc   :  { %v2560_v61 = vsel %vm555_vm2, %v2555_v60, 0  ;;  %v2435_v0 = vpack.c.bf16 %v2434_v59, %v2434_v59  ;;  %v2669_v9 = vmul.f32 %v4951_v6, %v5818_v33  ;;  %v4953_v14 = vpop.eup %4952  ;;  %v4818_v59 = vld [vmem:[#allocation12 + $0x70] sm:$0xff]  }
0x12dd   :  { %v2553_v5 = vpack.c.bf16 %v2552_v2, %v2552_v2  ;;  %v2789_v10 = vmul.f32 %v4953_v14, %v5822_v34 }
0x12de   :  { %4544 = vmatmul.mubr.msk.bf16.vlgmr.msra.gmra.mrb[64].mxu1 %vm538_vm3, %v2435_v0  ;;  %v2670_v11 = vpack.c.bf16 %v2669_v9, %v2669_v9  ;;  %4630 = vmatpush3.bf16.msra.mxu0 %v4817_v28  ;;  %v4148_v28 = vld [vmem:[%s5988_s8 + $0x1] ss:$0 sm:$0xff] }
0x12df   :  { %4554 = vmatpush3.bf16.msra.mxu1 %v2560_v61  ;;  %4555 = vmatprep.mubr.msk.bf16.mxu1 %vm5229_vm0, %v5227_v4  ;;  %v2672_v3 = vpop.permute.xlu0 %2671  ;;  %v2790_v17 = vpack.c.bf16 %v2789_v10, %v2789_v10  ;;  %v4819_v61 = vld [vmem:[#allocation12 + $0x78] sm:$0xff]  }
0x12e0   :  { %4565 = vmatprep.subr.bf16.mxu1 %v5227_v4  ;;  %v2677_v8 = vsel %vm555_vm2, %v2672_v3, 0  ;;  %4631 = vmatprep.subr.bf16.mxu0 %v5227_v4 }
0x12e2   :  { %v4955_v18 = vpop.eup %4954  ;;  %4632 = vmatpush3.bf16.msra.mxu0 %v4818_v59 }
0x12e3   :  { %v2903_v21 = vmul.f32 %v4955_v18, %v5827_v38  ;;  %4633 = vmatprep.subr.bf16.mxu0 %v5227_v4 }
0x12e5   :  { %v2904_v24 = vpack.c.bf16 %v2903_v21, %v2903_v21 }
0x12e6   :  { %4556 = vmatmul.mubr.msk.bf16.vlgmr.msra.gmra.mrb[68].mxu1 %vm538_vm3, %v2553_v5  ;;  %4634 = vmatpush3.bf16.msra.mxu0 %v4819_v61 }
0x12e7   :  { %4566 = vmatpush3.bf16.msra.mxu1 %v2677_v8  ;;  %4567 = vmatprep.mubr.msk.bf16.mxu1 %vm5229_vm0, %v5227_v4 }
0x12e8   :  { %4577 = vmatprep.subr.bf16.mxu1 %v5227_v4 }
0x12ee   :  { %4568 = vmatmul.mubr.msk.bf16.vlgmr.msra.gmra.mrb[72].mxu1 %vm538_vm3, %v2670_v11 }
0x12ef   :  { %4578 = vmatpush3.bf16.msra.mxu1 %v2796_v16  ;;  %4579 = vmatprep.mubr.msk.bf16.mxu1 %vm5229_vm0, %v5227_v4 }
0x12f0   :  { %4589 = vmatprep.subr.bf16.mxu1 %v5227_v4 }
0x12f6   :  { %4580 = vmatmul.mubr.msk.bf16.vlgmr.msra.gmra.mrb[76].mxu1 %vm538_vm3, %v2790_v17 }
0x12f7   :  { %4591 = vmatprep.mubr.msk.bf16.mxu1 %vm5229_vm0, %v5227_v4 }
0x1303   :  { %v3019_v20 = vpop.xlane.xlu1 %3018 }
0x1304   :  { %4956 = vrcp.f32 %v3019_v20 }
0x1307   :  { %v2907_v22 = vpop.permute.xlu1 %2906 }
0x1308   :  { %v2912_v23 = vsel %vm555_vm2, %v2907_v22, 0  ;;  %v4137_v22 = vld [vmem:[%s5987_s7 + $0x1] ss:$0 sm:$0xff] }
0x1309   :  { %4590 = vmatpush3.bf16.msra.mxu1 %v2912_v23 }
0x130a   :  { %4601 = vmatprep.subr.bf16.mxu1 %v5227_v4 }
0x130b   :  { %v3141_v32 = vpop.permute.xlu1 %3140 }
0x130c   :  { %4592 = vmatmul.mubr.msk.bf16.vlgmr.msra.gmra.mrb[80].mxu1 %vm538_vm3, %v2904_v24  ;;  %v3146_v63 = vsel %vm555_vm2, %v3141_v32, 0 }
0x130d   :  { %4603 = vmatprep.mubr.msk.bf16.mxu1 %vm5229_vm0, %v5227_v4 }
0x130e   :  { %v4957_v25 = vpop.eup %4956 }
0x130f   :  { %v3021_v27 = vmul.f32 %v4957_v25, %v5837_v44 }
0x1310   :  { %v3136_v26 = vpop.xlane.xlu0 %3135 }
0x1311   :  { %4958 = vrcp.f32 %v3136_v26  ;;  %v3022_v29 = vpack.c.bf16 %v3021_v27, %v3021_v27 }
0x1314   :  { %v3024_v31 = vpop.permute.xlu0 %3023 }
0x1315   :  { %v3029_v62 = vsel %vm555_vm2, %v3024_v31, 0 }
0x1316   :  { %4602 = vmatpush3.bf16.msra.mxu1 %v3029_v62 }
0x1317   :  { %4613 = vmatprep.subr.bf16.mxu1 %v5227_v4 }
0x1319   :  { %4604 = vmatmul.mubr.msk.bf16.vlgmr.msra.gmra.mrb[84].mxu1 %vm538_vm3, %v3022_v29  ;;  %v4820_v29 = vld [vmem:[#allocation14 + $0x80] ss:$8 sps:$4 sm:$0xff]  }
0x131a   :  { %4614 = vmatpush3.bf16.msra.mxu1 %v3146_v63  ;;  %4615 = vmatprep.mubr.msk.bf16.mxu1 %vm5229_vm0, %v5227_v4  ;;  %v4822_v63 = vld [vmem:[#allocation14 + $0x84] ss:$8 sps:$4 sm:$0xff]  }
0x131b   :  { %v4959_v33 = vpop.eup %4958  ;;  %3465 = vmatprep.subr.bf16.mxu1 %v4822_v63 }
0x131c   :  { %v3138_v50 = vmul.f32 %v4959_v33, %v5841_v45  ;;  %v4825_v33 = vld [vmem:[#allocation14 + $0x94] ss:$8 sps:$4 sm:$0xff]  }
0x131e   :  { %v3139_v58 = vpack.c.bf16 %v3138_v50, %v3138_v50  ;;  %v4823_v50 = vld [vmem:[#allocation14 + $0x90] ss:$8 sps:$4 sm:$0xff]  }
0x1321   :  { %4616 = vmatmul.mubr.msk.bf16.vlgmr.msra.gmra.mrb[88].mxu1 %vm538_vm3, %v3139_v58 }
0x1322   :  { %3497 = vmatprep.mubr.bf16.mxu1 %v5228_v30  ;;  %3466 = vmatpush1.bf16.msra.mxu1 %v4820_v29 }
0x1323   :  { %3467 = vmatprep.subr.bf16.mxu1 %v4825_v33 }
0x1326   :  { %3468 = vmatpush1.bf16.msra.mxu1 %v4823_v50 }
0x13b1   :  { %v2479_v51 = vpop.f32.mrb[64].mxu1 }
0x13b2   :  { %2486 = vrot.lane.b32.xlu1 %v2479_v51, %s5231_s29  ;;  %v4545_v34 = vpop.f32.mrb[65].mxu1 }
0x13b3   :  { %v2482_v36 = vpop.f32.mrb[66].mxu1 }
0x13b4   :  { %v4546_v37 = vpop.f32.mrb[67].mxu1 }
0x13b9   :  { %v2596_v38 = vpop.f32.mrb[68].mxu1 }
0x13ba   :  { %2603 = vrot.lane.b32.xlu1 %v2596_v38, %s6012_s12  ;;  %v4557_v15 = vpop.f32.mrb[69].mxu1 }
0x13bb   :  { %v2599_v39 = vpop.f32.mrb[70].mxu1 }
0x13bc   :  { %v4558_v40 = vpop.f32.mrb[71].mxu1  ;;  %v4826_v39 = vld [vmem:[#allocation14 + $0xa0] ss:$8 sps:$4 sm:$0xff]  }
0x13bd   :  { %v4831_v40 = vld [vmem:[#allocation14 + $0xb4] ss:$8 sps:$4 sm:$0xff]  }
0x13c1   :  { %v2713_v41 = vpop.f32.mrb[72].mxu1 }
0x13c2   :  { %2720 = vrot.lane.b32.xlu0 %v2713_v41, %s5230_s27  ;;  %v4569_v19 = vpop.f32.mrb[73].mxu1  ;;  %v4829_v41 = vld [vmem:[#allocation14 + $0xb0] ss:$8 sps:$4 sm:$0xff]  }
0x13c3   :  { %v2716_v42 = vpop.f32.mrb[74].mxu1  ;;  %v4834_v19 = vld [vmem:[#allocation14 + $0xc4] ss:$8 sps:$4 sm:$0xff]  }
0x13c4   :  { %v4570_v43 = vpop.f32.mrb[75].mxu1  ;;  %v4832_v42 = vld [vmem:[#allocation14 + $0xc0] ss:$8 sps:$4 sm:$0xff]  }
0x13c5   :  { %v4837_v43 = vld [vmem:[#allocation14 + $0xd4] ss:$8 sps:$4 sm:$0xff]  }
0x13c9   :  { %v2832_v44 = vpop.f32.mrb[76].mxu1 }
0x13ca   :  { %2838 = vst.msk [vmem:[#allocation2 + $0x8] sm:$0xff] %vm485_vm1, %v2832_v44  ;;  %v4581_v30 = vpop.f32.mrb[77].mxu1  ;;  %v4835_v44 = vld [vmem:[#allocation14 + $0xd0] ss:$8 sps:$4 sm:$0xff]  }
0x13cb   :  { %v2835_v7 = vpop.f32.mrb[78].mxu1  ;;  %v4840_v30 = vld [vmem:[#allocation14 + $0xe4] ss:$8 sps:$4 sm:$0xff]  }
0x13cc   :  { %v4582_v45 = vpop.f32.mrb[79].mxu1  ;;  %v4838_v7 = vld [vmem:[#allocation14 + $0xe0] ss:$8 sps:$4 sm:$0xff]  }
0x13cd   :  { %v4843_v45 = vld [vmem:[#allocation14 + $0xf4] ss:$8 sps:$4 sm:$0xff]  }
0x13df   :  { %v2948_v49 = vpop.f32.mrb[80].mxu1 }
0x13e0   :  { %2955 = vrot.lane.b32.xlu1 %v2948_v49, %s5231_s29  ;;  %v4593_v52 = vpop.f32.mrb[81].mxu1 }
0x13e1   :  { %v2951_v35 = vpop.f32.mrb[82].mxu1 }
0x13e2   :  { %v4594_v56 = vpop.f32.mrb[83].mxu1 }
0x13ec   :  { %v3065_v60 = vpop.f32.mrb[84].mxu1 }
0x13ed   :  { %3072 = vrot.lane.b32.xlu1 %v3065_v60, %s6012_s12  ;;  %v4605_v0 = vpop.f32.mrb[85].mxu1 }
0x13ee   :  { %v3068_v1 = vpop.f32.mrb[86].mxu1  ;;  %v4149_v0 = vld [vmem:[%s5989_s9 + $0x1] ss:$0 sm:$0xff] }
0x13ef   :  { %v4606_v2 = vpop.f32.mrb[87].mxu1 }
0x13f4   :  { %v3182_v3 = vpop.f32.mrb[88].mxu1 }
0x13f5   :  { %3189 = vrot.lane.b32.xlu1 %v3182_v3, %s5230_s27  ;;  %v4617_v5 = vpop.f32.mrb[89].mxu1 }
0x13f6   :  { %v3185_v6 = vpop.f32.mrb[90].mxu1 }
0x13f7   :  { %v4618_v8 = vpop.f32.mrb[91].mxu1  ;;  %v4844_v6 = vld [vmem:[#allocation15 + $0xc0] sm:$0xff]  }
0x13f8   :  { %v4845_v8 = vld [vmem:[#allocation15 + $0x80] sm:$0xff]   ;;  %4327 = vmatprep.subr.bf16.mxu0 %v4844_v6 }
0x1424   :  { %v2487_v9 = vpop.permute.xlu1 %2486 }
0x1425   :  { %2489 = vst.msk [vmem:[#allocation2] sm:$0xff] %vm719_vm4, %v2487_v9  ;;  %v4846_v9 = vld [vmem:[#allocation15 + $0xc8] sm:$0xff]  }
0x142c   :  { %v2604_v11 = vpop.permute.xlu1 %2603 }
0x142d   :  { %2606 = vst.msk [vmem:[#allocation2] sm:$0xff] %vm837_vm5, %v2604_v11  ;;  %v4847_v11 = vld [vmem:[#allocation15 + $0x88] sm:$0xff]  }
0x1434   :  { %v2721_v14 = vpop.permute.xlu0 %2720 }
0x1435   :  { %2723 = vst.msk [vmem:[#allocation2] sm:$0xff] %vm955_vm6, %v2721_v14  ;;  %v4848_v14 = vld [vmem:[#allocation15 + $0xd0] sm:$0xff]  }
0x143c   :  { %v3193_v18 = vld [vmem:[#allocation2] sm:$0xff] }
0x1452   :  { %v2956_v16 = vpop.permute.xlu1 %2955 }
0x1453   :  { %2958 = vst.msk [vmem:[#allocation2 + $0x8] sm:$0xff] %vm719_vm4, %v2956_v16  ;;  %v4849_v16 = vld [vmem:[#allocation15 + $0x90] sm:$0xff]  }
0x145f   :  { %v3073_v10 = vpop.permute.xlu1 %3072 }
0x1460   :  { %3075 = vst.msk [vmem:[#allocation2 + $0x8] sm:$0xff] %vm837_vm5, %v3073_v10  ;;  %v4850_v10 = vld [vmem:[#allocation15 + $0xd8] sm:$0xff]  }
0x1467   :  { %v3190_v17 = vpop.permute.xlu1 %3189 }
0x1468   :  { %3192 = vst.msk [vmem:[#allocation2 + $0x8] sm:$0xff] %vm955_vm6, %v3190_v17  ;;  %v4851_v17 = vld [vmem:[#allocation15 + $0x98] sm:$0xff]  }
0x146f   :  { %v3194_v20 = vld [vmem:[#allocation2 + $0x8] sm:$0xff] }
0x1470   :  { %v3195_v21 = vpack.c.bf16 %v3194_v20, %v3193_v18  ;;  %v4852_v18 = vld [vmem:[#allocation15 + $0xe0] sm:$0xff]  }
0x1471   :  { %v4853_v20 = vld [vmem:[#allocation15 + $0xa0] sm:$0xff]  }
0x1472   :  { %4636 = vmatmul.mubr.bf16.vlgmr.msra.gmra.mrb[64].mxu0 %v3195_v21  ;;  %v4854_v21 = vld [vmem:[#allocation15 + $0xe8] sm:$0xff]  }
0x1473   :  { %4328 = vmatpush3.bf16.msra.mxu0 %v4845_v8 }
0x1474   :  { %4329 = vmatprep.subr.bf16.mxu0 %v4846_v9 }
0x1477   :  { %4330 = vmatpush3.bf16.msra.mxu0 %v4847_v11 }
0x1478   :  { %4331 = vmatprep.subr.bf16.mxu0 %v4848_v14 }
0x147b   :  { %4332 = vmatpush3.bf16.msra.mxu0 %v4849_v16  ;;  %v4168_v16 = vld [vmem:[%s5993_s13 + $0x1] ss:$0 sm:$0xff] }
0x147c   :  { %4333 = vmatprep.subr.bf16.mxu0 %v4850_v10 }
0x147f   :  { %4334 = vmatpush3.bf16.msra.mxu0 %v4851_v17 }
0x1480   :  { %4335 = vmatprep.subr.bf16.mxu0 %v4852_v18 }
0x1483   :  { %4336 = vmatpush3.bf16.msra.mxu0 %v4853_v20 }
0x1484   :  { %4337 = vmatprep.subr.bf16.mxu0 %v4854_v21 }
0x1545   :  { %v3303_v23 = vpop.f32.mrb[64].mxu0 }
0x1546   :  { %v3304_v24 = vadd.f32 %v4137_v22, %v3303_v23  ;;  %v4637_v25 = vpop.f32.mrb[65].mxu0  ;;  %v4856_v23 = vld [vmem:[#allocation15 + $0xf0] sm:$0xff]  }
0x1547   :  { %v3306_v26 = vpop.f32.mrb[66].mxu0  ;;  %v4858_v25 = vld [vmem:[#allocation15 + $0xf8] sm:$0xff]  }
0x1548   :  { %v3307_v27 = vadd.f32 %v4137_v22, %v3306_v26  ;;  %v4638_v31 = vpop.f32.mrb[67].mxu0  ;;  %v3310_v62 = vadd.f32 %v3304_v24, %v5719_v12  ;;  %v4855_v22 = vld [vmem:[#allocation15 + $0xa8] sm:$0xff]   ;;  %v4857_v24 = vld [vmem:[#allocation15 + $0xb0] sm:$0xff]   ;;  %v4859_v26 = vld [vmem:[#allocation15 + $0xb8] sm:$0xff]  }
0x1549   :  { %4338 = vmatpush3.bf16.msra.mxu0 %v4855_v22 }
0x154a   :  { %3316 = vadd.xlane.f32.xlu0 %v3310_v62  ;;  %v3311_v32 = vadd.f32 %v3307_v27, %v5721_v13  ;;  %v4828_v13 = vld [vmem:[#allocation14 + $0xa4] ss:$8 sps:$4 sm:$0xff]   ;;  %4339 = vmatprep.subr.bf16.mxu0 %v4856_v23  ;;  %v4150_v27 = vld [vmem:[%s5991_s11 + $0x2] sm:$0x3] }
0x154b   :  { %3469 = vmatprep.subr.bf16.mxu1 %v4828_v13  ;;  %v3378_v31 = vrot.slane %v4150_v27, %v5493_v57 }
0x154c   :  { %3318 = vadd.xlane.f32.xlu1 %v3311_v32  ;;  %3470 = vmatpush1.bf16.msra.mxu1 %v4826_v39 }
0x154d   :  { %3471 = vmatprep.subr.bf16.mxu1 %v4831_v40  ;;  %4340 = vmatpush3.bf16.msra.mxu0 %v4857_v24 }
0x154e   :  { %4341 = vmatprep.subr.bf16.mxu0 %v4858_v25 }
0x1550   :  { %3472 = vmatpush1.bf16.msra.mxu1 %v4829_v41 }
0x1551   :  { %3473 = vmatprep.subr.bf16.mxu1 %v4834_v19  ;;  %4342 = vmatpush3.bf16.msra.mxu0 %v4859_v26  ;;  %v4860_v26 = vld [vmem:[#allocation17] sm:$0xff]  }
0x1552   :  { %4659 = vmatprep.subr.bf16.mxu0 %v5227_v4 }
0x1554   :  { %3474 = vmatpush1.bf16.msra.mxu1 %v4832_v42 }
0x1555   :  { %3475 = vmatprep.subr.bf16.mxu1 %v4837_v43 }
0x1558   :  { %3476 = vmatpush1.bf16.msra.mxu1 %v4835_v44 }
0x1559   :  { %3477 = vmatprep.subr.bf16.mxu1 %v4840_v30 }
0x155c   :  { %3478 = vmatpush1.bf16.msra.mxu1 %v4838_v7 }
0x155d   :  { %3479 = vmatprep.subr.bf16.mxu1 %v4843_v45 }
0x1560   :  { %3480 = vmatpush1.bf16.msra.mxu1 %v4841_v46 }
0x1561   :  { %4639 = vmatprep.subr.bf16.mxu1 %v5227_v4 }
0x15d7   :  { %v3317_v58 = vpop.xlane.xlu0 %3316 }
0x15d8   :  { %v3320_v51 = vmul.f32 0.0078125, %v3317_v58 }
0x15d9   :  { %v3319_v34 = vpop.xlane.xlu1 %3318 }
0x15da   :  { %v3322_v36 = vsub.f32 %v3310_v62, %v3320_v51  ;;  %v3321_v37 = vmul.f32 0.0078125, %v3319_v34  ;;  %v3382_v62 = vrot.slane %v4150_v27, %v5487_v55  ;;  %v4861_v27 = vld [vmem:[#allocation17] sm:$0xff]  }
0x15dc   :  { %v3323_v38 = vsub.f32 %v3311_v32, %v3321_v37  ;;  %v3324_v15 = vmul.f32 %v3322_v36, %v3322_v36 }
0x15de   :  { %3326 = vadd.xlane.f32.xlu0 %v3324_v15  ;;  %v3325_v12 = vmul.f32 %v3323_v38, %v3323_v38 }
0x15e2   :  { %3328 = vadd.xlane.f32.xlu0 %v3325_v12 }
0x166b   :  { %v3327_v54 = vpop.xlane.xlu0 %3326 }
0x166c   :  { %v3330_v47 = vmul.f32 0.0078125, %v3327_v54 }
0x166e   :  { %v3332_v48 = vadd.f32 1e-05, %v3330_v47 }
0x166f   :  { %v3329_v49 = vpop.xlane.xlu0 %3328 }
0x1670   :  { %4960 = vrsqrt.f32 %v3332_v48  ;;  %v3331_v52 = vmul.f32 0.0078125, %v3329_v49 }
0x1672   :  { %v3333_v53 = vadd.f32 1e-05, %v3331_v52 }
0x1674   :  { %4962 = vrsqrt.f32 %v3333_v53 }
0x167a   :  { %v4961_v35 = vpop.eup %4960 }
0x167b   :  { %v3336_v56 = vmul.f32 %v4961_v35, %v3322_v36 }
0x167d   :  { %v3344_v61 = vmul.f32 %v4148_v28, %v3336_v56 }
0x167e   :  { %v4963_v59 = vpop.eup %4962 }
0x167f   :  { %v3337_v60 = vmul.f32 %v4963_v59, %v3323_v38  ;;  %v5921_v2 = vadd.f32 %v4149_v0, %v3344_v61 }
0x1681   :  { %v3345_v1 = vmul.f32 %v4148_v28, %v3337_v60 }
0x1683   :  { %v5923_v3 = vadd.f32 %v4149_v0, %v3345_v1 }
0x1685   :  { %v3354_v5 = vpack.c.bf16 %v5923_v3, %v5921_v2 }
0x1687   :  { %3498 = vmatmul.mubr.bf16.vlgmr.msra.gmra.mrb[92].mxu1 %v3354_v5 }
0x1688   :  { %4655 = vmatprep.mubr.msk.bf16.mxu1 %vm5229_vm0, %v5227_v4  ;;  %4640 = vmatpush3.bf16.msra.mxu1 %v4860_v26 }
0x1689   :  { %4641 = vmatprep.subr.bf16.mxu1 %v5227_v4 }
0x175a   :  { %v3499_v32 = vpop.f32.mrb[92].mxu1 }
0x175b   :  { %v3500_v29 = vadd.f32 %v3499_v32, %v3378_v31  ;;  %v3501_v63 = vpop.f32.mrb[93].mxu1 }
0x175c   :  { %v3502_v33 = vadd.f32 %v3501_v63, %v3382_v62  ;;  %v3503_v50 = vpop.f32.mrb[94].mxu1 }
0x175d   :  { %v3512_v58 = vmul.f32 0.044715, %v3500_v29  ;;  %v3504_v51 = vadd.f32 %v3503_v50, %v3378_v31  ;;  %v3505_v34 = vpop.f32.mrb[95].mxu1  ;;  %v3508_v56 = vmul.f32 0.5, %v3500_v29  ;;  %v4862_v31 = vld [vmem:[#allocation17 + $0x8] sm:$0xff]  }
0x175e   :  { %v3513_v36 = vmul.f32 0.044715, %v3502_v33  ;;  %v3506_v37 = vadd.f32 %v3505_v34, %v3382_v62  ;;  %v3509_v60 = vmul.f32 0.5, %v3502_v33  ;;  %v4863_v62 = vld [vmem:[#allocation17 + $0x8] sm:$0xff]   ;;  %4642 = vmatpush3.bf16.msra.mxu1 %v4862_v31  ;;  %v4865_v34 = vld [vmem:[#allocation17 + $0x10] sm:$0xff]  }
0x175f   :  { %v3516_v38 = vmul.f32 %v3512_v58, %v3500_v29  ;;  %v3514_v15 = vmul.f32 0.044715, %v3504_v51  ;;  %v3510_v28 = vmul.f32 0.5, %v3504_v51  ;;  %4643 = vmatprep.subr.bf16.mxu1 %v5227_v4 }
0x1760   :  { %v3517_v12 = vmul.f32 %v3513_v36, %v3502_v33  ;;  %v3515_v13 = vmul.f32 0.044715, %v3506_v37  ;;  %v3511_v61 = vmul.f32 0.5, %v3506_v37  ;;  %v4866_v36 = vld [vmem:[#allocation17 + $0x18] sm:$0xff]  }
0x1761   :  { %v3520_v39 = vmul.f32 %v3516_v38, %v3500_v29  ;;  %v3518_v40 = vmul.f32 %v3514_v15, %v3504_v51  ;;  %v4868_v38 = vld [vmem:[#allocation17 + $0x20] sm:$0xff]  }
0x1762   :  { %v3521_v41 = vmul.f32 %v3517_v12, %v3502_v33  ;;  %v3519_v57 = vmul.f32 %v3515_v13, %v3506_v37  ;;  %v4869_v15 = vld [vmem:[#allocation17 + $0x20] sm:$0xff]   ;;  %v4870_v12 = vld [vmem:[#allocation17 + $0x28] sm:$0xff]  }
0x1763   :  { %v3524_v19 = vadd.f32 %v3520_v39, %v3500_v29  ;;  %v3522_v55 = vmul.f32 %v3518_v40, %v3504_v51  ;;  %v4871_v13 = vld [vmem:[#allocation17 + $0x28] sm:$0xff]   ;;  %v4872_v39 = vld [vmem:[#allocation17 + $0x30] sm:$0xff]  }
0x1764   :  { %v3523_v42 = vmul.f32 %v3519_v57, %v3506_v37  ;;  %v3525_v43 = vadd.f32 %v3521_v41, %v3502_v33  ;;  %v4873_v40 = vld [vmem:[#allocation17 + $0x30] sm:$0xff]   ;;  %v4874_v41 = vld [vmem:[#allocation17 + $0x38] sm:$0xff]  }
0x1765   :  { %v3528_v44 = vmul.f32 0.7978846, %v3524_v19  ;;  %v3526_v30 = vadd.f32 %v3522_v55, %v3504_v51  ;;  %v4864_v51 = vld [vmem:[#allocation17 + $0x10] sm:$0xff]   ;;  %v4875_v57 = vld [vmem:[#allocation17 + $0x38] sm:$0xff]  }
0x1766   :  { %v3527_v7 = vadd.f32 %v3523_v42, %v3506_v37  ;;  %v3529_v45 = vmul.f32 0.7978846, %v3525_v43  ;;  %4644 = vmatpush3.bf16.msra.mxu1 %v4864_v51  ;;  %v4867_v37 = vld [vmem:[#allocation17 + $0x18] sm:$0xff]  }
0x1767   :  { %4964 = vtanh.f32 %v3528_v44  ;;  %v3530_v46 = vmul.f32 0.7978846, %v3526_v30  ;;  %4645 = vmatprep.subr.bf16.mxu1 %v5227_v4 }
0x1768   :  { %v3531_v54 = vmul.f32 0.7978846, %v3527_v7  ;;  %4966 = vtanh.f32 %v3529_v45  ;;  %v4187_v45 = vld [vmem:[%s5994_s14 + $0x1] ss:$0 sm:$0xff] }
0x1769   :  { %4968 = vtanh.f32 %v3530_v46 }
0x176a   :  { %4970 = vtanh.f32 %v3531_v54  ;;  %4646 = vmatpush3.bf16.msra.mxu1 %v4866_v36 }
0x176b   :  { %4647 = vmatprep.subr.bf16.mxu1 %v5227_v4 }
0x176e   :  { %4648 = vmatpush3.bf16.msra.mxu1 %v4868_v38 }
0x176f   :  { %4649 = vmatprep.subr.bf16.mxu1 %v5227_v4 }
0x1771   :  { %v4965_v47 = vpop.eup %4964 }
0x1772   :  { %v4967_v48 = vpop.eup %4966  ;;  %v3536_v49 = vadd.f32 1.0, %v4965_v47  ;;  %4650 = vmatpush3.bf16.msra.mxu1 %v4870_v12 }
0x1773   :  { %v4969_v52 = vpop.eup %4968  ;;  %v3537_v53 = vadd.f32 1.0, %v4967_v48  ;;  %4651 = vmatprep.subr.bf16.mxu1 %v5227_v4 }
0x1774   :  { %v4971_v35 = vpop.eup %4970  ;;  %v3538_v59 = vadd.f32 1.0, %v4969_v52  ;;  %v3540_v1 = vmul.f32 %v3536_v49, %v3508_v56 }
0x1775   :  { %v3539_v0 = vadd.f32 1.0, %v4971_v35  ;;  %v3541_v6 = vmul.f32 %v3537_v53, %v3509_v60  ;;  %v3893_v60 = vld [vmem:[%s5997_s17] sm:$0x1] }
0x1776   :  { %v3542_v5 = vmul.f32 %v3538_v59, %v3510_v28  ;;  %4652 = vmatpush3.bf16.msra.mxu1 %v4872_v39  ;;  %v3785_v28 = vld [vmem:[%s5997_s17] sm:$0x1] }
0x1777   :  { %v3543_v8 = vmul.f32 %v3539_v0, %v3511_v61  ;;  %4653 = vmatprep.subr.bf16.mxu1 %v5227_v4 }
0x1778   :  { %v3544_v9 = vpack.c.bf16 %v3542_v5, %v3540_v1 }
0x1779   :  { %v3545_v11 = vpack.c.bf16 %v3543_v8, %v3541_v6 }
0x177a   :  { %4654 = vmatpush3.bf16.msra.mxu1 %v4874_v41 }
0x177b   :  { %3715 = vmatprep.mubr.bf16.mxu0 %v3545_v11 }
0x177c   :  { %3716 = vmatmul.mubr.bf16.vlgmr.msra.gmra.mrb[68].mxu0 %v3544_v9 }
0x177d   :  { %4675 = vmatprep.mubr.msk.bf16.mxu0 %vm5229_vm0, %v5227_v4  ;;  %4660 = vmatpush3.bf16.msra.mxu0 %v4861_v27 }
0x177e   :  { %4661 = vmatprep.subr.bf16.mxu0 %v5227_v4 }
0x1781   :  { %4662 = vmatpush3.bf16.msra.mxu0 %v4863_v62 }
0x1782   :  { %4663 = vmatprep.subr.bf16.mxu0 %v5227_v4 }
0x1785   :  { %4664 = vmatpush3.bf16.msra.mxu0 %v4865_v34 }
0x1786   :  { %4665 = vmatprep.subr.bf16.mxu0 %v5227_v4 }
0x1789   :  { %4666 = vmatpush3.bf16.msra.mxu0 %v4867_v37 }
0x178a   :  { %4667 = vmatprep.subr.bf16.mxu0 %v5227_v4 }
0x178d   :  { %4668 = vmatpush3.bf16.msra.mxu0 %v4869_v15 }
0x178e   :  { %4669 = vmatprep.subr.bf16.mxu0 %v5227_v4 }
0x1791   :  { %4670 = vmatpush3.bf16.msra.mxu0 %v4871_v13 }
0x1792   :  { %4671 = vmatprep.subr.bf16.mxu0 %v5227_v4 }
0x1795   :  { %4672 = vmatpush3.bf16.msra.mxu0 %v4873_v40 }
0x1796   :  { %4673 = vmatprep.subr.bf16.mxu0 %v5227_v4  ;;  %v4188_v4 = vld [vmem:[%s5995_s15 + $0x1] ss:$0 sm:$0xff]  ;;  %s5232_s15 = smov [#allocation18]  }
0x1797   :  { %s3990_s20 = sshll.u32 %s5232_s15, 4  ;;  %s3991_s20 = int_to_ptr.vmem [resolvable:$true] %s3990_s20 }
0x1798   :  { %s5178_s26 = scalar_lea.vmem %s3991_s20, 32  ;;  %p5183_p3 = scmp.lt.s32.totalorder %s3991_s20, %s3991_s20 }
0x1799   :  { %4674 = vmatpush3.bf16.msra.mxu0 %v4875_v57  ;;  %p5179_p2 = scmp.ne.s32.totalorder %s3991_s20, %s5178_s26  ;;  %p5184_p4 = scmp.lt.s32.totalorder %s5178_s26, %s5178_s26 }
0x179b   :  { %p5185_p5 = por %p5184_p4, %p5183_p3 }
0x179d   :  { %p5186_p6 = pnand %p5185_p5, %p5179_p2 }
0x184f   :  { %v4343_v14 = vpop.f32.mrb[68].mxu0 }
0x1850   :  { %v4344_v10 = vpop.f32.mrb[69].mxu0 }
0x1851   :  { %v4345_v17 = vadd.f32 %v4344_v10, %v4343_v14  ;;  %v4346_v18 = vpop.f32.mrb[70].mxu0 }
0x1852   :  { %v4347_v20 = vpop.f32.mrb[71].mxu0 }
0x1853   :  { %v3718_v21 = vadd.f32 %v4345_v17, %v4168_v16  ;;  %v4348_v22 = vadd.f32 %v4347_v20, %v4346_v18 }
0x1855   :  { %v3721_v23 = vadd.f32 %v4348_v22, %v4168_v16  ;;  %v3724_v24 = vadd.f32 %v3718_v21, %v5921_v2 }
0x1857   :  { %3730 = vadd.xlane.f32.xlu0 %v3724_v24  ;;  %v3725_v25 = vadd.f32 %v3721_v23, %v5923_v3 }
0x1859   :  { %3732 = vadd.xlane.f32.xlu1 %v3725_v25 }
0x18e4   :  { %v3731_v2 = vpop.xlane.xlu0 %3730 }
0x18e5   :  { %v3734_v32 = vmul.f32 0.0078125, %v3731_v2 }
0x18e6   :  { %v3733_v3 = vpop.xlane.xlu1 %3732 }
0x18e7   :  { %v3736_v29 = vsub.f32 %v3724_v24, %v3734_v32  ;;  %v3735_v63 = vmul.f32 0.0078125, %v3733_v3 }
0x18e9   :  { %v3737_v33 = vsub.f32 %v3725_v25, %v3735_v63  ;;  %v3738_v50 = vmul.f32 %v3736_v29, %v3736_v29 }
0x18eb   :  { %3740 = vadd.xlane.f32.xlu0 %v3738_v50  ;;  %v3739_v58 = vmul.f32 %v3737_v33, %v3737_v33 }
0x18ed   :  { %3742 = vadd.xlane.f32.xlu1 %v3739_v58 }
0x1978   :  { %v3741_v19 = vpop.xlane.xlu0 %3740 }
0x1979   :  { %v3744_v55 = vmul.f32 0.0078125, %v3741_v19 }
0x197a   :  { %v3743_v42 = vpop.xlane.xlu1 %3742 }
0x197b   :  { %v3746_v43 = vadd.f32 1e-05, %v3744_v55  ;;  %v3745_v44 = vmul.f32 0.0078125, %v3743_v42 }
0x197d   :  { %4972 = vrsqrt.f32 %v3746_v43  ;;  %v3747_v30 = vadd.f32 1e-05, %v3745_v44 }
0x197f   :  { %4974 = vrsqrt.f32 %v3747_v30 }
0x1987   :  { %v4973_v7 = vpop.eup %4972 }
0x1988   :  { %v3750_v46 = vmul.f32 %v4973_v7, %v3736_v29 }
0x1989   :  { %v4975_v54 = vpop.eup %4974 }
0x198a   :  { %v3751_v47 = vmul.f32 %v4975_v54, %v3737_v33  ;;  %v3758_v48 = vmul.f32 %v4187_v45, %v3750_v46 }
0x198c   :  { %v3766_v49 = vadd.f32 %v4188_v4, %v3758_v48  ;;  %v3759_v52 = vmul.f32 %v4187_v45, %v3751_v47 }
0x198e   :  { %v3768_v53 = vpack.c.bf16 %v3766_v49, %v3766_v49  ;;  %v3767_v35 = vadd.f32 %v4188_v4, %v3759_v52 }
0x1990   :  { %4656 = vmatmul.mubr.bf16.vlgmr.msra.gmra.mrb[96].mxu1 %v3768_v53  ;;  %v3876_v56 = vpack.c.bf16 %v3767_v35, %v3767_v35 }
0x1992   :  { %4676 = vmatmul.mubr.bf16.vlgmr.msra.gmra.mrb[72].mxu0 %v3876_v56 }
0x1a63   :  { %v3868_v59 = vpop.f32.mrb[96].mxu1 }
0x1a64   :  { %v3869_v61 = vadd.f32 %v3868_v59, %v3785_v28  ;;  %v4657_v0 = vpop.f32.mrb[97].mxu1 }
0x1a65   :  { %v3871_v1 = vpop.f32.mrb[98].mxu1  ;;  %v3976_v5 = vpop.f32.mrb[72].mxu0 }
0x1a66   :  { %4976 = vtanh.f32 %v3869_v61  ;;  %v3977_v6 = vadd.f32 %v3976_v5, %v3893_v60  ;;  %v4658_v8 = vpop.f32.mrb[99].mxu1  ;;  %v4677_v9 = vpop.f32.mrb[73].mxu0 }
0x1a67   :  { %v3979_v11 = vpop.f32.mrb[74].mxu0 }
0x1a68   :  { %4978 = vtanh.f32 %v3977_v6  ;;  %v4678_v14 = vpop.f32.mrb[75].mxu0 }
0x1a70   :  { %v4977_v16 = vpop.eup %4976 }
0x1a71   :  { %3875 = vst [vmem:[#allocation18] sm:$0x1] %v4977_v16 }
0x1a72   :  { %v4979_v10 = vpop.eup %4978 }
0x1a73   :  { %3983 = vst [vmem:[#allocation18 + $0x1] sm:$0x1] %v4979_v10 }
0x1a74   :  { %5189 = shalt.err (!%p5186_p6)
}
0x1a75   :  { %s5190_s6 = scalar_lea.hbm %s5998_s18, 32 }
0x1a76   :  { %p5191_p7 = scmp.ne.s32.totalorder %s5998_s18, %s5190_s6  ;;  %p5194_p8 = scmp.lt.u32.totalorder %s5190_s6, %s5998_s18 }
0x1a78   :  { %p5196_p9 = pnand %p5194_p8, %p5191_p7 }
0x1a7a   :  { %5199 = shalt.err (!%p5196_p9)
}
0x1a7b   :  { %3993 = dma.vmem_to_hbm [thread:$0]  %s3991_s20, 32, %s5998_s18, [#allocation5]  }
0x1a7c   :  { %5210 = dma.done.wait [#allocation5], 32  }
0x1a7d   :  { %5211 = vsyncadd [#allocation5], 4294967264 }
0x1a7e   :  { %3997 = vsyncpa [#allocation4], 1 }
0x1a7f   :  { %3998 = vsyncpa [#allocation7], 1 }
0x1a80   :  { %3999 = vsyncpa [#allocation10], 1 }
0x1a81   :  { %4000 = vsyncpa [#allocation13], 1 }
0x1a82   :  { %4001 = vsyncpa [#allocation16], 1 }
0x1a83   :  { %4002 = vsyncpa [#allocation5], 1 }

</bundles_post_ra>
